<compile_context>
chip_gen: v5e
topology: v5e:2x2
jax: 0.10.0
libtpu: 0.0.40
codegen_flags: <defaults>
</compile_context>

<pallas_src>
import math

import jax
import jax.numpy as jnp
from jax import lax
from jax.experimental import pallas as pl
from jax.experimental.pallas import tpu as pltpu

# ---------------- configuration (small, consistent with the module) ----------
NUM_CLASSES = 10
INPUT_RES   = 16
PATCH       = 4
IN_CH       = 3
HIDDEN      = 32
LAYERS      = 2
HEADS       = 4

HEAD_DIM    = HIDDEN // HEADS
NUM_PATCHES = (INPUT_RES // PATCH) ** 2
SEQ         = NUM_PATCHES + 1          # 17
ROWS_PAD    = 24                       # SEQ padded up to a multiple of 8 sublanes
MLP_DIM     = 4 * HIDDEN
PATCH_DIM   = IN_CH * PATCH * PATCH
LN_EPS      = 1e-5
BN_EPS      = 1e-5
LOGIT_PAD   = 128                      # lane-dense padded class dimension
CLS_ROWS    = 8                        # rows fed to the head (full sublane group)
NEG_INF     = -1e30

N_LAYER_PARAMS = 16


# ---------------- in-kernel helpers ------------------------------------------
def _layernorm(x, g, b):
    mu = jnp.mean(x, axis=-1, keepdims=True)
    var = jnp.mean((x - mu) ** 2, axis=-1, keepdims=True)
    return (x - mu) * lax.rsqrt(var + LN_EPS) * g + b


def _gelu(x):
    # tanh-form GELU: transcendental runs on the EUP slot.
    return 0.5 * x * (1.0 + jnp.tanh(0.7978845608028654 * (x + 0.044715 * x * x * x)))


# ---------------- the fused per-sequence ViT kernel ---------------------------
def vit_fused_kernel(*refs):
    refs = list(refs)
    out_ref = refs[-1]
    patches_ref, wemb_ref, addend_ref = refs[0:3]
    idx = 3
    layer_refs = []
    for _ in range(LAYERS):
        layer_refs.append(refs[idx:idx + N_LAYER_PARAMS])
        idx += N_LAYER_PARAMS
    clsg_ref, clsb_ref, headw_ref, headb_ref = refs[idx:idx + 4]

    # Patch embedding (conv bias + BN folded into wemb / addend) + pos + cls.
    # Rows >= SEQ are zero padding (zero patch rows, zero addend rows).
    x = jnp.dot(patches_ref[...], wemb_ref[...],
                preferred_element_type=jnp.float32) + addend_ref[...]      # (P, D)

    # In-kernel additive key mask for the padding rows: columns >= SEQ get
    # -inf so real rows never attend to padding.  (Every row keeps SEQ
    # unmasked columns, so the softmax never sees a fully-masked row.)
    col = lax.broadcasted_iota(jnp.int32, (ROWS_PAD, ROWS_PAD), 1)
    kmask = jnp.where(col < SEQ, 0.0, NEG_INF).astype(jnp.float32)

    for (ln1g, ln1b, wq, bq, wkT, bkT, wv, bv, wo, bo,
         ln2g, ln2b, w1, b1, w2, b2) in layer_refs:
        # --- multi-head self-attention branch ---
        h = _layernorm(x, ln1g[...], ln1b[...])                            # (P, D)
        hT = h.T                                                           # (D, P), one transpose/layer
        attn = jnp.broadcast_to(bo[...], (ROWS_PAD, HIDDEN))
        for hh in range(HEADS):
            # 1/sqrt(head_dim) is folded into wq/bq in the wrapper.
            q  = jnp.dot(h, wq[hh], preferred_element_type=jnp.float32) + bq[hh]   # (P, hd)
            kT = jnp.dot(wkT[hh], hT, preferred_element_type=jnp.float32) + bkT[hh]  # (hd, P)
            v  = jnp.dot(h, wv[hh], preferred_element_type=jnp.float32) + bv[hh]   # (P, hd)
            s = jnp.dot(q, kT, preferred_element_type=jnp.float32) + kmask          # (P, P) NN matmul
            s = s - jnp.max(s, axis=-1, keepdims=True)
            p = jnp.exp(s)
            # approx reciprocal (EUP): rows sum to 1 within ~1e-3 rel. error.
            p = p * pl.reciprocal(jnp.sum(p, axis=-1, keepdims=True), approx=True)
            ctx = jnp.dot(p, v, preferred_element_type=jnp.float32)                 # (P, hd)
            attn = attn + jnp.dot(ctx, wo[hh], preferred_element_type=jnp.float32)  # (P, D)
        x = x + attn                                                       # residual 1

        # --- MLP branch ---
        h2 = _layernorm(x, ln2g[...], ln2b[...])
        m = jnp.dot(h2, w1[...], preferred_element_type=jnp.float32) + b1[...]
        m = _gelu(m)
        x = x + jnp.dot(m, w2[...], preferred_element_type=jnp.float32) + b2[...]

    # --- classifier head on the first full sublane group only (row 0 = CLS);
    #     lane-dense (8, 128) store; wrapper extracts [0, :NUM_CLASSES].
    hc = _layernorm(x[:CLS_ROWS], clsg_ref[...], clsb_ref[...])
    out_ref[...] = jnp.dot(hc, headw_ref[...],
                           preferred_element_type=jnp.float32) + headb_ref[...]


# ---------------- glue: patch extraction (pure layout op) --------------------
def extract_patches(x):
    # x: (B, C, H, W) -> (B, num_patches, C*patch*patch); patch order row-major
    # over (h, w) and inner order (c, kh, kw) to match Conv2d weight flattening.
    B, C, H, W = x.shape
    gh, gw = H // PATCH, W // PATCH
    x = x.reshape(B, C, gh, PATCH, gw, PATCH)
    x = x.transpose(0, 2, 4, 1, 3, 5)
    return x.reshape(B, gh * gw, C * PATCH * PATCH)


# ---------------- wrapper-side per-layer weight preparation -------------------
def _prep_layer(lp):
    """Split qkv per head (head-major, K pre-transposed, scale folded into Q)."""
    ln1g, ln1b, wqkv, bqkv, wo, bo, ln2g, ln2b, w1, b1, w2, b2 = lp
    scale = 1.0 / math.sqrt(HEAD_DIM)
    wq = wqkv[:, 0:HIDDEN] * scale
    wk = wqkv[:, HIDDEN:2 * HIDDEN]
    wv = wqkv[:, 2 * HIDDEN:3 * HIDDEN]
    bq = bqkv[:, 0:HIDDEN] * scale
    bk = bqkv[:, HIDDEN:2 * HIDDEN]
    bv = bqkv[:, 2 * HIDDEN:3 * HIDDEN]

    wq_h  = wq.reshape(HIDDEN, HEADS, HEAD_DIM).transpose(1, 0, 2)   # (H, D, hd)
    wv_h  = wv.reshape(HIDDEN, HEADS, HEAD_DIM).transpose(1, 0, 2)   # (H, D, hd)
    wkT_h = wk.reshape(HIDDEN, HEADS, HEAD_DIM).transpose(1, 2, 0)   # (H, hd, D)
    bq_h  = bq.reshape(1, HEADS, HEAD_DIM).transpose(1, 0, 2)        # (H, 1, hd)
    bv_h  = bv.reshape(1, HEADS, HEAD_DIM).transpose(1, 0, 2)        # (H, 1, hd)
    bkT_h = bk.reshape(1, HEADS, HEAD_DIM).transpose(1, 2, 0)        # (H, hd, 1)
    wo_h  = wo.reshape(HEADS, HEAD_DIM, HIDDEN)                      # (H, hd, D)

    return [ln1g, ln1b, wq_h, bq_h, wkT_h, bkT_h, wv_h, bv_h, wo_h, bo,
            ln2g, ln2b, w1, b1, w2, b2]


# ---------------- full forward pass -------------------------------------------
def vit_forward(x, params):
    B = x.shape[0]

    # ---- layout-only / constant-folding glue (no compute kernels) ----
    patches = extract_patches(x)                                   # (B, N, PD)
    # zero CLS-slot row in front, zero sublane-padding rows at the back
    patches = jnp.pad(patches, ((0, 0), (1, ROWS_PAD - 1 - NUM_PATCHES), (0, 0)))

    # fold conv bias + BatchNorm (eval) into the embedding matmul
    w_eff = params["conv_w"] * params["bn_scale"]                              # (PD, D)
    b_eff = params["conv_b"] * params["bn_scale"] + params["bn_shift"]         # (1, D)
    pos = params["pos_embed"][0]                                               # (SEQ, D)
    cls_row = pos[0:1] + params["cls_token"][0]                                # (1, D)
    patch_rows = pos[1:] + b_eff                                               # (N, D)
    addend = jnp.concatenate([cls_row, patch_rows], axis=0)                    # (SEQ, D)
    addend = jnp.pad(addend, ((0, ROWS_PAD - SEQ), (0, 0)))                    # (P, D) single copy

    # lane-dense padded classifier weights
    head_w = jnp.zeros((HIDDEN, LOGIT_PAD), jnp.float32).at[:, :NUM_CLASSES].set(params["head_w"])
    head_b = jnp.zeros((1, LOGIT_PAD), jnp.float32).at[:, :NUM_CLASSES].set(params["head_b"])

    args = [patches, w_eff, addend]
    for lp in params["layers"]:
        args.extend(_prep_layer(lp))
    args.extend([params["cls_ln_g"], params["cls_ln_b"], head_w, head_b])

    # ---- BlockSpecs: batch-sliced patches/output, constant-resident weights ----
    def _const_spec(a):
        return pl.BlockSpec(a.shape, lambda b, nd=a.ndim: (0,) * nd)

    in_specs = [pl.BlockSpec((None, ROWS_PAD, PATCH_DIM), lambda b: (b, 0, 0))]
    in_specs += [_const_spec(a) for a in args[1:]]
    out_spec = pl.BlockSpec((None, CLS_ROWS, LOGIT_PAD), lambda b: (b, 0, 0))

    # ---- advisory cost estimate (per-sequence flops x batch) ----
    flops_per_seq = (
        2 * ROWS_PAD * PATCH_DIM * HIDDEN
        + LAYERS * (
            3 * HEADS * 2 * ROWS_PAD * HIDDEN * HEAD_DIM     # q, k, v projections
            + 2 * HEADS * 2 * ROWS_PAD * HEAD_DIM * ROWS_PAD  # scores + context
            + HEADS * 2 * ROWS_PAD * HEAD_DIM * HIDDEN        # output projection
            + 2 * 2 * ROWS_PAD * HIDDEN * MLP_DIM             # MLP
        )
        + 2 * CLS_ROWS * HIDDEN * LOGIT_PAD                   # classifier head
    )
    transc_per_seq = LAYERS * (HEADS * ROWS_PAD * ROWS_PAD + ROWS_PAD * MLP_DIM) + 8 * ROWS_PAD
    bytes_accessed = sum(int(a.size) * 4 for a in args) + B * CLS_ROWS * LOGIT_PAD * 4

    out = pl.pallas_call(
        vit_fused_kernel,
        out_shape=jax.ShapeDtypeStruct((B, CLS_ROWS, LOGIT_PAD), jnp.float32),
        grid=(B,),
        in_specs=in_specs,
        out_specs=out_spec,
        compiler_params=pltpu.CompilerParams(
            dimension_semantics=("parallel",),
            vmem_limit_bytes=16 * 1024 * 1024),
        cost_estimate=pl.CostEstimate(
            flops=B * flops_per_seq,
            transcendentals=B * transc_per_seq,
            bytes_accessed=bytes_accessed),
    )(*args)

    logits = out[:, 0, :NUM_CLASSES]
    return logits


# ---------------- deterministic parameter init --------------------------------
def init_params(key):
    keys = iter(jax.random.split(key, 8 + 8 * LAYERS))

    def nrm(shape):
        return 0.02 * jax.random.normal(next(keys), shape, jnp.float32)

    params = {}

    # PatchEmbeddings: Conv2d(IN_CH, HIDDEN, k=PATCH, s=PATCH) + BatchNorm2d
    conv_w = nrm((HIDDEN, IN_CH, PATCH, PATCH))
    params["conv_w"] = conv_w.reshape(HIDDEN, PATCH_DIM).T          # (PD, HIDDEN)
    params["conv_b"] = jnp.zeros((1, HIDDEN), jnp.float32)
    bn_gamma = jnp.ones((HIDDEN,), jnp.float32)
    bn_beta = jnp.zeros((HIDDEN,), jnp.float32)
    bn_mean = jnp.zeros((HIDDEN,), jnp.float32)
    bn_var = jnp.ones((HIDDEN,), jnp.float32)
    scale = bn_gamma / jnp.sqrt(bn_var + BN_EPS)
    params["bn_scale"] = scale.reshape(1, HIDDEN)
    params["bn_shift"] = (bn_beta - bn_mean * scale).reshape(1, HIDDEN)

    # PositionEmbedding
    params["cls_token"] = jnp.zeros((1, 1, HIDDEN), jnp.float32)
    params["pos_embed"] = 0.02 * jax.random.truncated_normal(
        next(keys), -2.0, 2.0, (1, SEQ, HIDDEN), jnp.float32)

    # Transformer encoder blocks
    layers = []
    for _ in range(LAYERS):
        in_proj_w = nrm((3 * HIDDEN, HIDDEN))      # PyTorch (3D, D)
        out_proj_w = nrm((HIDDEN, HIDDEN))
        fc1_w = nrm((MLP_DIM, HIDDEN))
        fc2_w = nrm((HIDDEN, MLP_DIM))
        layers.append((
            jnp.ones((1, HIDDEN), jnp.float32), jnp.zeros((1, HIDDEN), jnp.float32),   # ln1
            in_proj_w.T, jnp.zeros((1, 3 * HIDDEN), jnp.float32),                      # qkv
            out_proj_w.T, jnp.zeros((1, HIDDEN), jnp.float32),                         # out proj
            jnp.ones((1, HIDDEN), jnp.float32), jnp.zeros((1, HIDDEN), jnp.float32),   # ln2
            fc1_w.T, jnp.zeros((1, MLP_DIM), jnp.float32),                             # fc1
            fc2_w.T, jnp.zeros((1, HIDDEN), jnp.float32),                              # fc2
        ))
    params["layers"] = layers

    # Classifier head
    params["cls_ln_g"] = jnp.ones((1, HIDDEN), jnp.float32)
    params["cls_ln_b"] = jnp.zeros((1, HIDDEN), jnp.float32)
    params["head_w"] = nrm((NUM_CLASSES, HIDDEN)).T                 # (HIDDEN, C)
    params["head_b"] = jnp.zeros((1, NUM_CLASSES), jnp.float32)
    return params


if __name__ == "__main__":
    key = jax.random.PRNGKey(0)
    pkey, xkey = jax.random.split(key)
    params = init_params(pkey)

    x = jax.random.normal(xkey, (2, IN_CH, INPUT_RES, INPUT_RES), jnp.float32)  # NCHW

    fwd = jax.jit(vit_forward)
    logits = jax.block_until_ready(fwd(x, params))
    assert logits.shape == (2, NUM_CLASSES), logits.shape
    assert bool(jnp.all(jnp.isfinite(logits)))
    print("KERNEL_OK")
</pallas_src>

<mosaic_0001>
module attributes {stable_mosaic.version = 11 : i64} {
  func.func @vit_fused_kernel(%arg0: i32, %arg1: memref<1x24x48xf32, #tpu.memory_space<vmem>>, %arg2: memref<48x32xf32, #tpu.memory_space<vmem>>, %arg3: memref<24x32xf32, #tpu.memory_space<vmem>>, %arg4: memref<1x32xf32, #tpu.memory_space<vmem>>, %arg5: memref<1x32xf32, #tpu.memory_space<vmem>>, %arg6: memref<4x32x8xf32, #tpu.memory_space<vmem>>, %arg7: memref<4x1x8xf32, #tpu.memory_space<vmem>>, %arg8: memref<4x8x32xf32, #tpu.memory_space<vmem>>, %arg9: memref<4x8x1xf32, #tpu.memory_space<vmem>>, %arg10: memref<4x32x8xf32, #tpu.memory_space<vmem>>, %arg11: memref<4x1x8xf32, #tpu.memory_space<vmem>>, %arg12: memref<4x8x32xf32, #tpu.memory_space<vmem>>, %arg13: memref<1x32xf32, #tpu.memory_space<vmem>>, %arg14: memref<1x32xf32, #tpu.memory_space<vmem>>, %arg15: memref<1x32xf32, #tpu.memory_space<vmem>>, %arg16: memref<32x128xf32, #tpu.memory_space<vmem>>, %arg17: memref<1x128xf32, #tpu.memory_space<vmem>>, %arg18: memref<128x32xf32, #tpu.memory_space<vmem>>, %arg19: memref<1x32xf32, #tpu.memory_space<vmem>>, %arg20: memref<1x32xf32, #tpu.memory_space<vmem>>, %arg21: memref<1x32xf32, #tpu.memory_space<vmem>>, %arg22: memref<4x32x8xf32, #tpu.memory_space<vmem>>, %arg23: memref<4x1x8xf32, #tpu.memory_space<vmem>>, %arg24: memref<4x8x32xf32, #tpu.memory_space<vmem>>, %arg25: memref<4x8x1xf32, #tpu.memory_space<vmem>>, %arg26: memref<4x32x8xf32, #tpu.memory_space<vmem>>, %arg27: memref<4x1x8xf32, #tpu.memory_space<vmem>>, %arg28: memref<4x8x32xf32, #tpu.memory_space<vmem>>, %arg29: memref<1x32xf32, #tpu.memory_space<vmem>>, %arg30: memref<1x32xf32, #tpu.memory_space<vmem>>, %arg31: memref<1x32xf32, #tpu.memory_space<vmem>>, %arg32: memref<32x128xf32, #tpu.memory_space<vmem>>, %arg33: memref<1x128xf32, #tpu.memory_space<vmem>>, %arg34: memref<128x32xf32, #tpu.memory_space<vmem>>, %arg35: memref<1x32xf32, #tpu.memory_space<vmem>>, %arg36: memref<1x32xf32, #tpu.memory_space<vmem>>, %arg37: memref<1x32xf32, #tpu.memory_space<vmem>>, %arg38: memref<32x128xf32, #tpu.memory_space<vmem>>, %arg39: memref<1x128xf32, #tpu.memory_space<vmem>>, %arg40: memref<1x8x128xf32, #tpu.memory_space<vmem>>) attributes {dimension_semantics = [#tpu.dimension_semantics<parallel>], iteration_bounds = array<i64: 2>, scalar_prefetch = 0 : i64, scratch_operands = 0 : i64, tpu.core_type = #tpu.core_type<tc>, window_params = [{transform_indices = @transform_0, window_bounds = array<i64: 1, 24, 48>}, {pipeline_mode = #tpu.pipeline_mode<synchronous>, transform_indices = @transform_1, window_bounds = array<i64: 48, 32>}, {pipeline_mode = #tpu.pipeline_mode<synchronous>, transform_indices = @transform_2, window_bounds = array<i64: 24, 32>}, {pipeline_mode = #tpu.pipeline_mode<synchronous>, transform_indices = @transform_3, window_bounds = array<i64: 1, 32>}, {pipeline_mode = #tpu.pipeline_mode<synchronous>, transform_indices = @transform_4, window_bounds = array<i64: 1, 32>}, {pipeline_mode = #tpu.pipeline_mode<synchronous>, transform_indices = @transform_5, window_bounds = array<i64: 4, 32, 8>}, {pipeline_mode = #tpu.pipeline_mode<synchronous>, transform_indices = @transform_6, window_bounds = array<i64: 4, 1, 8>}, {pipeline_mode = #tpu.pipeline_mode<synchronous>, transform_indices = @transform_7, window_bounds = array<i64: 4, 8, 32>}, {pipeline_mode = #tpu.pipeline_mode<synchronous>, transform_indices = @transform_8, window_bounds = array<i64: 4, 8, 1>}, {pipeline_mode = #tpu.pipeline_mode<synchronous>, transform_indices = @transform_9, window_bounds = array<i64: 4, 32, 8>}, {pipeline_mode = #tpu.pipeline_mode<synchronous>, transform_indices = @transform_10, window_bounds = array<i64: 4, 1, 8>}, {pipeline_mode = #tpu.pipeline_mode<synchronous>, transform_indices = @transform_11, window_bounds = array<i64: 4, 8, 32>}, {pipeline_mode = #tpu.pipeline_mode<synchronous>, transform_indices = @transform_12, window_bounds = array<i64: 1, 32>}, {pipeline_mode = #tpu.pipeline_mode<synchronous>, transform_indices = @transform_13, window_bounds = array<i64: 1, 32>}, {pipeline_mode = #tpu.pipeline_mode<synchronous>, transform_indices = @transform_14, window_bounds = array<i64: 1, 32>}, {pipeline_mode = #tpu.pipeline_mode<synchronous>, transform_indices = @transform_15, window_bounds = array<i64: 32, 128>}, {pipeline_mode = #tpu.pipeline_mode<synchronous>, transform_indices = @transform_16, window_bounds = array<i64: 1, 128>}, {pipeline_mode = #tpu.pipeline_mode<synchronous>, transform_indices = @transform_17, window_bounds = array<i64: 128, 32>}, {pipeline_mode = #tpu.pipeline_mode<synchronous>, transform_indices = @transform_18, window_bounds = array<i64: 1, 32>}, {pipeline_mode = #tpu.pipeline_mode<synchronous>, transform_indices = @transform_19, window_bounds = array<i64: 1, 32>}, {pipeline_mode = #tpu.pipeline_mode<synchronous>, transform_indices = @transform_20, window_bounds = array<i64: 1, 32>}, {pipeline_mode = #tpu.pipeline_mode<synchronous>, transform_indices = @transform_21, window_bounds = array<i64: 4, 32, 8>}, {pipeline_mode = #tpu.pipeline_mode<synchronous>, transform_indices = @transform_22, window_bounds = array<i64: 4, 1, 8>}, {pipeline_mode = #tpu.pipeline_mode<synchronous>, transform_indices = @transform_23, window_bounds = array<i64: 4, 8, 32>}, {pipeline_mode = #tpu.pipeline_mode<synchronous>, transform_indices = @transform_24, window_bounds = array<i64: 4, 8, 1>}, {pipeline_mode = #tpu.pipeline_mode<synchronous>, transform_indices = @transform_25, window_bounds = array<i64: 4, 32, 8>}, {pipeline_mode = #tpu.pipeline_mode<synchronous>, transform_indices = @transform_26, window_bounds = array<i64: 4, 1, 8>}, {pipeline_mode = #tpu.pipeline_mode<synchronous>, transform_indices = @transform_27, window_bounds = array<i64: 4, 8, 32>}, {pipeline_mode = #tpu.pipeline_mode<synchronous>, transform_indices = @transform_28, window_bounds = array<i64: 1, 32>}, {pipeline_mode = #tpu.pipeline_mode<synchronous>, transform_indices = @transform_29, window_bounds = array<i64: 1, 32>}, {pipeline_mode = #tpu.pipeline_mode<synchronous>, transform_indices = @transform_30, window_bounds = array<i64: 1, 32>}, {pipeline_mode = #tpu.pipeline_mode<synchronous>, transform_indices = @transform_31, window_bounds = array<i64: 32, 128>}, {pipeline_mode = #tpu.pipeline_mode<synchronous>, transform_indices = @transform_32, window_bounds = array<i64: 1, 128>}, {pipeline_mode = #tpu.pipeline_mode<synchronous>, transform_indices = @transform_33, window_bounds = array<i64: 128, 32>}, {pipeline_mode = #tpu.pipeline_mode<synchronous>, transform_indices = @transform_34, window_bounds = array<i64: 1, 32>}, {pipeline_mode = #tpu.pipeline_mode<synchronous>, transform_indices = @transform_35, window_bounds = array<i64: 1, 32>}, {pipeline_mode = #tpu.pipeline_mode<synchronous>, transform_indices = @transform_36, window_bounds = array<i64: 1, 32>}, {pipeline_mode = #tpu.pipeline_mode<synchronous>, transform_indices = @transform_37, window_bounds = array<i64: 32, 128>}, {pipeline_mode = #tpu.pipeline_mode<synchronous>, transform_indices = @transform_38, window_bounds = array<i64: 1, 128>}, {transform_indices = @transform_39, window_bounds = array<i64: 1, 8, 128>}]} {
    %c0 = arith.constant 0 : index
    %c0_0 = arith.constant 0 : index
    %c0_1 = arith.constant 0 : index
    %0 = vector.load %arg1[%c0, %c0_0, %c0_1] : memref<1x24x48xf32, #tpu.memory_space<vmem>>, vector<1x24x48xf32>
    %1 = vector.shape_cast %0 : vector<1x24x48xf32> to vector<24x48xf32>
    %c0_2 = arith.constant 0 : index
    %c0_3 = arith.constant 0 : index
    %2 = vector.load %arg2[%c0_2, %c0_3] : memref<48x32xf32, #tpu.memory_space<vmem>>, vector<48x32xf32>
    %cst = arith.constant dense<0.000000e+00> : vector<24x32xf32>
    %3 = tpu.matmul %1, %2, %cst {dimension_numbers = #tpu.dot_dimension_numbers<[1], [0], [0], [1], [0, 0, 1, 1], [], []>} : vector<24x48xf32>, vector<48x32xf32>, vector<24x32xf32> -> vector<24x32xf32>
    %c0_4 = arith.constant 0 : index
    %c0_5 = arith.constant 0 : index
    %4 = vector.load %arg3[%c0_4, %c0_5] : memref<24x32xf32, #tpu.memory_space<vmem>>, vector<24x32xf32>
    %5 = arith.addf %3, %4 : vector<24x32xf32>
    %6 = tpu.iota {dimensions = array<i32: 1>} : vector<24x24xi32>
    %c17_i32 = arith.constant 17 : i32
    %7 = vector.broadcast %c17_i32 : i32 to vector<24x24xi32>
    %8 = arith.cmpi slt, %6, %7 : vector<24x24xi32>
    %cst_6 = arith.constant 0.000000e+00 : f32
    %cst_7 = arith.constant -1.000000e+30 : f32
    %9 = vector.broadcast %cst_6 : f32 to vector<24x24xf32>
    %10 = vector.broadcast %cst_7 : f32 to vector<24x24xf32>
    %11 = arith.select %8, %9, %10 : vector<24x24xi1>, vector<24x24xf32>
    %c0_8 = arith.constant 0 : index
    %c0_9 = arith.constant 0 : index
    %12 = vector.load %arg4[%c0_8, %c0_9] : memref<1x32xf32, #tpu.memory_space<vmem>>, vector<1x32xf32>
    %c0_10 = arith.constant 0 : index
    %c0_11 = arith.constant 0 : index
    %13 = vector.load %arg5[%c0_10, %c0_11] : memref<1x32xf32, #tpu.memory_space<vmem>>, vector<1x32xf32>
    %cst_12 = arith.constant dense<0.000000e+00> : vector<24xf32>
    %14 = vector.multi_reduction <add>, %5, %cst_12 [1] : vector<24x32xf32> to vector<24xf32>
    %15 = vector.shape_cast %14 : vector<24xf32> to vector<24x1xf32>
    %cst_13 = arith.constant 3.200000e+01 : f32
    %16 = vector.broadcast %cst_13 : f32 to vector<24x1xf32>
    %17 = arith.divf %15, %16 : vector<24x1xf32>
    %18 = vector.broadcast %17 : vector<24x1xf32> to vector<24x32xf32>
    %19 = arith.subf %5, %18 : vector<24x32xf32>
    %20 = arith.mulf %19, %19 : vector<24x32xf32>
    %cst_14 = arith.constant dense<0.000000e+00> : vector<24xf32>
    %21 = vector.multi_reduction <add>, %20, %cst_14 [1] : vector<24x32xf32> to vector<24xf32>
    %22 = vector.shape_cast %21 : vector<24xf32> to vector<24x1xf32>
    %cst_15 = arith.constant 3.200000e+01 : f32
    %23 = vector.broadcast %cst_15 : f32 to vector<24x1xf32>
    %24 = arith.divf %22, %23 : vector<24x1xf32>
    %25 = vector.broadcast %17 : vector<24x1xf32> to vector<24x32xf32>
    %26 = arith.subf %5, %25 : vector<24x32xf32>
    %cst_16 = arith.constant 9.99999974E-6 : f32
    %27 = vector.broadcast %cst_16 : f32 to vector<24x1xf32>
    %28 = arith.addf %24, %27 : vector<24x1xf32>
    %29 = math.rsqrt %28 : vector<24x1xf32>
    %30 = vector.broadcast %29 : vector<24x1xf32> to vector<24x32xf32>
    %31 = arith.mulf %26, %30 : vector<24x32xf32>
    %32 = vector.broadcast %12 : vector<1x32xf32> to vector<24x32xf32>
    %33 = arith.mulf %31, %32 : vector<24x32xf32>
    %34 = vector.broadcast %13 : vector<1x32xf32> to vector<24x32xf32>
    %35 = arith.addf %33, %34 : vector<24x32xf32>
    %36 = tpu.transpose %35, [1, 0] : vector<24x32xf32> -> vector<32x24xf32>
    %c0_17 = arith.constant 0 : index
    %c0_18 = arith.constant 0 : index
    %37 = vector.load %arg13[%c0_17, %c0_18] : memref<1x32xf32, #tpu.memory_space<vmem>>, vector<1x32xf32>
    %38 = vector.shape_cast %37 : vector<1x32xf32> to vector<1x32xf32>
    %39 = vector.broadcast %38 : vector<1x32xf32> to vector<24x32xf32>
    %c0_19 = arith.constant 0 : index
    %c0_20 = arith.constant 0 : index
    %c0_21 = arith.constant 0 : index
    %40 = vector.load %arg6[%c0_19, %c0_20, %c0_21] : memref<4x32x8xf32, #tpu.memory_space<vmem>>, vector<1x32x8xf32>
    %41 = vector.shape_cast %40 : vector<1x32x8xf32> to vector<32x8xf32>
    %cst_22 = arith.constant dense<0.000000e+00> : vector<24x8xf32>
    %42 = tpu.matmul %35, %41, %cst_22 {dimension_numbers = #tpu.dot_dimension_numbers<[1], [0], [0], [1], [0, 0, 1, 1], [], []>} : vector<24x32xf32>, vector<32x8xf32>, vector<24x8xf32> -> vector<24x8xf32>
    %c0_23 = arith.constant 0 : index
    %c0_24 = arith.constant 0 : index
    %c0_25 = arith.constant 0 : index
    %43 = vector.load %arg7[%c0_23, %c0_24, %c0_25] : memref<4x1x8xf32, #tpu.memory_space<vmem>>, vector<1x1x8xf32>
    %44 = vector.shape_cast %43 : vector<1x1x8xf32> to vector<1x8xf32>
    %45 = vector.broadcast %44 : vector<1x8xf32> to vector<24x8xf32>
    %46 = arith.addf %42, %45 : vector<24x8xf32>
    %c0_26 = arith.constant 0 : index
    %c0_27 = arith.constant 0 : index
    %c0_28 = arith.constant 0 : index
    %47 = vector.load %arg8[%c0_26, %c0_27, %c0_28] : memref<4x8x32xf32, #tpu.memory_space<vmem>>, vector<1x8x32xf32>
    %48 = vector.shape_cast %47 : vector<1x8x32xf32> to vector<8x32xf32>
    %cst_29 = arith.constant dense<0.000000e+00> : vector<8x24xf32>
    %49 = tpu.matmul %48, %36, %cst_29 {dimension_numbers = #tpu.dot_dimension_numbers<[1], [0], [0], [1], [0, 0, 1, 1], [], []>} : vector<8x32xf32>, vector<32x24xf32>, vector<8x24xf32> -> vector<8x24xf32>
    %c0_30 = arith.constant 0 : index
    %c0_31 = arith.constant 0 : index
    %c0_32 = arith.constant 0 : index
    %50 = vector.load %arg9[%c0_30, %c0_31, %c0_32] : memref<4x8x1xf32, #tpu.memory_space<vmem>>, vector<1x8x1xf32>
    %51 = vector.shape_cast %50 : vector<1x8x1xf32> to vector<8x1xf32>
    %52 = vector.broadcast %51 : vector<8x1xf32> to vector<8x24xf32>
    %53 = arith.addf %49, %52 : vector<8x24xf32>
    %c0_33 = arith.constant 0 : index
    %c0_34 = arith.constant 0 : index
    %c0_35 = arith.constant 0 : index
    %54 = vector.load %arg10[%c0_33, %c0_34, %c0_35] : memref<4x32x8xf32, #tpu.memory_space<vmem>>, vector<1x32x8xf32>
    %55 = vector.shape_cast %54 : vector<1x32x8xf32> to vector<32x8xf32>
    %cst_36 = arith.constant dense<0.000000e+00> : vector<24x8xf32>
    %56 = tpu.matmul %35, %55, %cst_36 {dimension_numbers = #tpu.dot_dimension_numbers<[1], [0], [0], [1], [0, 0, 1, 1], [], []>} : vector<24x32xf32>, vector<32x8xf32>, vector<24x8xf32> -> vector<24x8xf32>
    %c0_37 = arith.constant 0 : index
    %c0_38 = arith.constant 0 : index
    %c0_39 = arith.constant 0 : index
    %57 = vector.load %arg11[%c0_37, %c0_38, %c0_39] : memref<4x1x8xf32, #tpu.memory_space<vmem>>, vector<1x1x8xf32>
    %58 = vector.shape_cast %57 : vector<1x1x8xf32> to vector<1x8xf32>
    %59 = vector.broadcast %58 : vector<1x8xf32> to vector<24x8xf32>
    %60 = arith.addf %56, %59 : vector<24x8xf32>
    %cst_40 = arith.constant dense<0.000000e+00> : vector<24x24xf32>
    %61 = tpu.matmul %46, %53, %cst_40 {dimension_numbers = #tpu.dot_dimension_numbers<[1], [0], [0], [1], [0, 0, 1, 1], [], []>} : vector<24x8xf32>, vector<8x24xf32>, vector<24x24xf32> -> vector<24x24xf32>
    %62 = arith.addf %61, %11 : vector<24x24xf32>
    %cst_41 = arith.constant dense<0xFF800000> : vector<24xf32>
    %63 = vector.multi_reduction <maximumf>, %62, %cst_41 [1] : vector<24x24xf32> to vector<24xf32>
    %64 = vector.shape_cast %63 : vector<24xf32> to vector<24x1xf32>
    %65 = vector.broadcast %64 : vector<24x1xf32> to vector<24x24xf32>
    %66 = arith.subf %62, %65 : vector<24x24xf32>
    %67 = math.exp %66 : vector<24x24xf32>
    %cst_42 = arith.constant dense<0.000000e+00> : vector<24xf32>
    %68 = vector.multi_reduction <add>, %67, %cst_42 [1] : vector<24x24xf32> to vector<24xf32>
    %69 = vector.shape_cast %68 : vector<24xf32> to vector<24x1xf32>
    %70 = tpu.reciprocal %69 {approx = true} : vector<24x1xf32> -> vector<24x1xf32>
    %71 = vector.broadcast %70 : vector<24x1xf32> to vector<24x24xf32>
    %72 = arith.mulf %67, %71 : vector<24x24xf32>
    %cst_43 = arith.constant dense<0.000000e+00> : vector<24x8xf32>
    %73 = tpu.matmul %72, %60, %cst_43 {dimension_numbers = #tpu.dot_dimension_numbers<[1], [0], [0], [1], [0, 0, 1, 1], [], []>} : vector<24x24xf32>, vector<24x8xf32>, vector<24x8xf32> -> vector<24x8xf32>
    %c0_44 = arith.constant 0 : index
    %c0_45 = arith.constant 0 : index
    %c0_46 = arith.constant 0 : index
    %74 = vector.load %arg12[%c0_44, %c0_45, %c0_46] : memref<4x8x32xf32, #tpu.memory_space<vmem>>, vector<1x8x32xf32>
    %75 = vector.shape_cast %74 : vector<1x8x32xf32> to vector<8x32xf32>
    %cst_47 = arith.constant dense<0.000000e+00> : vector<24x32xf32>
    %76 = tpu.matmul %73, %75, %cst_47 {dimension_numbers = #tpu.dot_dimension_numbers<[1], [0], [0], [1], [0, 0, 1, 1], [], []>} : vector<24x8xf32>, vector<8x32xf32>, vector<24x32xf32> -> vector<24x32xf32>
    %77 = arith.addf %39, %76 : vector<24x32xf32>
    %c1 = arith.constant 1 : index
    %c0_48 = arith.constant 0 : index
    %c0_49 = arith.constant 0 : index
    %78 = vector.load %arg6[%c1, %c0_48, %c0_49] : memref<4x32x8xf32, #tpu.memory_space<vmem>>, vector<1x32x8xf32>
    %79 = vector.shape_cast %78 : vector<1x32x8xf32> to vector<32x8xf32>
    %cst_50 = arith.constant dense<0.000000e+00> : vector<24x8xf32>
    %80 = tpu.matmul %35, %79, %cst_50 {dimension_numbers = #tpu.dot_dimension_numbers<[1], [0], [0], [1], [0, 0, 1, 1], [], []>} : vector<24x32xf32>, vector<32x8xf32>, vector<24x8xf32> -> vector<24x8xf32>
    %c1_51 = arith.constant 1 : index
    %c0_52 = arith.constant 0 : index
    %c0_53 = arith.constant 0 : index
    %81 = vector.load %arg7[%c1_51, %c0_52, %c0_53] : memref<4x1x8xf32, #tpu.memory_space<vmem>>, vector<1x1x8xf32>
    %82 = vector.shape_cast %81 : vector<1x1x8xf32> to vector<1x8xf32>
    %83 = vector.broadcast %82 : vector<1x8xf32> to vector<24x8xf32>
    %84 = arith.addf %80, %83 : vector<24x8xf32>
    %c1_54 = arith.constant 1 : index
    %c0_55 = arith.constant 0 : index
    %c0_56 = arith.constant 0 : index
    %85 = vector.load %arg8[%c1_54, %c0_55, %c0_56] : memref<4x8x32xf32, #tpu.memory_space<vmem>>, vector<1x8x32xf32>
    %86 = vector.shape_cast %85 : vector<1x8x32xf32> to vector<8x32xf32>
    %cst_57 = arith.constant dense<0.000000e+00> : vector<8x24xf32>
    %87 = tpu.matmul %86, %36, %cst_57 {dimension_numbers = #tpu.dot_dimension_numbers<[1], [0], [0], [1], [0, 0, 1, 1], [], []>} : vector<8x32xf32>, vector<32x24xf32>, vector<8x24xf32> -> vector<8x24xf32>
    %c1_58 = arith.constant 1 : index
    %c0_59 = arith.constant 0 : index
    %c0_60 = arith.constant 0 : index
    %88 = vector.load %arg9[%c1_58, %c0_59, %c0_60] : memref<4x8x1xf32, #tpu.memory_space<vmem>>, vector<1x8x1xf32>
    %89 = vector.shape_cast %88 : vector<1x8x1xf32> to vector<8x1xf32>
    %90 = vector.broadcast %89 : vector<8x1xf32> to vector<8x24xf32>
    %91 = arith.addf %87, %90 : vector<8x24xf32>
    %c1_61 = arith.constant 1 : index
    %c0_62 = arith.constant 0 : index
    %c0_63 = arith.constant 0 : index
    %92 = vector.load %arg10[%c1_61, %c0_62, %c0_63] : memref<4x32x8xf32, #tpu.memory_space<vmem>>, vector<1x32x8xf32>
    %93 = vector.shape_cast %92 : vector<1x32x8xf32> to vector<32x8xf32>
    %cst_64 = arith.constant dense<0.000000e+00> : vector<24x8xf32>
    %94 = tpu.matmul %35, %93, %cst_64 {dimension_numbers = #tpu.dot_dimension_numbers<[1], [0], [0], [1], [0, 0, 1, 1], [], []>} : vector<24x32xf32>, vector<32x8xf32>, vector<24x8xf32> -> vector<24x8xf32>
    %c1_65 = arith.constant 1 : index
    %c0_66 = arith.constant 0 : index
    %c0_67 = arith.constant 0 : index
    %95 = vector.load %arg11[%c1_65, %c0_66, %c0_67] : memref<4x1x8xf32, #tpu.memory_space<vmem>>, vector<1x1x8xf32>
    %96 = vector.shape_cast %95 : vector<1x1x8xf32> to vector<1x8xf32>
    %97 = vector.broadcast %96 : vector<1x8xf32> to vector<24x8xf32>
    %98 = arith.addf %94, %97 : vector<24x8xf32>
    %cst_68 = arith.constant dense<0.000000e+00> : vector<24x24xf32>
    %99 = tpu.matmul %84, %91, %cst_68 {dimension_numbers = #tpu.dot_dimension_numbers<[1], [0], [0], [1], [0, 0, 1, 1], [], []>} : vector<24x8xf32>, vector<8x24xf32>, vector<24x24xf32> -> vector<24x24xf32>
    %100 = arith.addf %99, %11 : vector<24x24xf32>
    %cst_69 = arith.constant dense<0xFF800000> : vector<24xf32>
    %101 = vector.multi_reduction <maximumf>, %100, %cst_69 [1] : vector<24x24xf32> to vector<24xf32>
    %102 = vector.shape_cast %101 : vector<24xf32> to vector<24x1xf32>
    %103 = vector.broadcast %102 : vector<24x1xf32> to vector<24x24xf32>
    %104 = arith.subf %100, %103 : vector<24x24xf32>
    %105 = math.exp %104 : vector<24x24xf32>
    %cst_70 = arith.constant dense<0.000000e+00> : vector<24xf32>
    %106 = vector.multi_reduction <add>, %105, %cst_70 [1] : vector<24x24xf32> to vector<24xf32>
    %107 = vector.shape_cast %106 : vector<24xf32> to vector<24x1xf32>
    %108 = tpu.reciprocal %107 {approx = true} : vector<24x1xf32> -> vector<24x1xf32>
    %109 = vector.broadcast %108 : vector<24x1xf32> to vector<24x24xf32>
    %110 = arith.mulf %105, %109 : vector<24x24xf32>
    %cst_71 = arith.constant dense<0.000000e+00> : vector<24x8xf32>
    %111 = tpu.matmul %110, %98, %cst_71 {dimension_numbers = #tpu.dot_dimension_numbers<[1], [0], [0], [1], [0, 0, 1, 1], [], []>} : vector<24x24xf32>, vector<24x8xf32>, vector<24x8xf32> -> vector<24x8xf32>
    %c1_72 = arith.constant 1 : index
    %c0_73 = arith.constant 0 : index
    %c0_74 = arith.constant 0 : index
    %112 = vector.load %arg12[%c1_72, %c0_73, %c0_74] : memref<4x8x32xf32, #tpu.memory_space<vmem>>, vector<1x8x32xf32>
    %113 = vector.shape_cast %112 : vector<1x8x32xf32> to vector<8x32xf32>
    %cst_75 = arith.constant dense<0.000000e+00> : vector<24x32xf32>
    %114 = tpu.matmul %111, %113, %cst_75 {dimension_numbers = #tpu.dot_dimension_numbers<[1], [0], [0], [1], [0, 0, 1, 1], [], []>} : vector<24x8xf32>, vector<8x32xf32>, vector<24x32xf32> -> vector<24x32xf32>
    %115 = arith.addf %77, %114 : vector<24x32xf32>
    %c2 = arith.constant 2 : index
    %c0_76 = arith.constant 0 : index
    %c0_77 = arith.constant 0 : index
    %116 = vector.load %arg6[%c2, %c0_76, %c0_77] : memref<4x32x8xf32, #tpu.memory_space<vmem>>, vector<1x32x8xf32>
    %117 = vector.shape_cast %116 : vector<1x32x8xf32> to vector<32x8xf32>
    %cst_78 = arith.constant dense<0.000000e+00> : vector<24x8xf32>
    %118 = tpu.matmul %35, %117, %cst_78 {dimension_numbers = #tpu.dot_dimension_numbers<[1], [0], [0], [1], [0, 0, 1, 1], [], []>} : vector<24x32xf32>, vector<32x8xf32>, vector<24x8xf32> -> vector<24x8xf32>
    %c2_79 = arith.constant 2 : index
    %c0_80 = arith.constant 0 : index
    %c0_81 = arith.constant 0 : index
    %119 = vector.load %arg7[%c2_79, %c0_80, %c0_81] : memref<4x1x8xf32, #tpu.memory_space<vmem>>, vector<1x1x8xf32>
    %120 = vector.shape_cast %119 : vector<1x1x8xf32> to vector<1x8xf32>
    %121 = vector.broadcast %120 : vector<1x8xf32> to vector<24x8xf32>
    %122 = arith.addf %118, %121 : vector<24x8xf32>
    %c2_82 = arith.constant 2 : index
    %c0_83 = arith.constant 0 : index
    %c0_84 = arith.constant 0 : index
    %123 = vector.load %arg8[%c2_82, %c0_83, %c0_84] : memref<4x8x32xf32, #tpu.memory_space<vmem>>, vector<1x8x32xf32>
    %124 = vector.shape_cast %123 : vector<1x8x32xf32> to vector<8x32xf32>
    %cst_85 = arith.constant dense<0.000000e+00> : vector<8x24xf32>
    %125 = tpu.matmul %124, %36, %cst_85 {dimension_numbers = #tpu.dot_dimension_numbers<[1], [0], [0], [1], [0, 0, 1, 1], [], []>} : vector<8x32xf32>, vector<32x24xf32>, vector<8x24xf32> -> vector<8x24xf32>
    %c2_86 = arith.constant 2 : index
    %c0_87 = arith.constant 0 : index
    %c0_88 = arith.constant 0 : index
    %126 = vector.load %arg9[%c2_86, %c0_87, %c0_88] : memref<4x8x1xf32, #tpu.memory_space<vmem>>, vector<1x8x1xf32>
    %127 = vector.shape_cast %126 : vector<1x8x1xf32> to vector<8x1xf32>
    %128 = vector.broadcast %127 : vector<8x1xf32> to vector<8x24xf32>
    %129 = arith.addf %125, %128 : vector<8x24xf32>
    %c2_89 = arith.constant 2 : index
    %c0_90 = arith.constant 0 : index
    %c0_91 = arith.constant 0 : index
    %130 = vector.load %arg10[%c2_89, %c0_90, %c0_91] : memref<4x32x8xf32, #tpu.memory_space<vmem>>, vector<1x32x8xf32>
    %131 = vector.shape_cast %130 : vector<1x32x8xf32> to vector<32x8xf32>
    %cst_92 = arith.constant dense<0.000000e+00> : vector<24x8xf32>
    %132 = tpu.matmul %35, %131, %cst_92 {dimension_numbers = #tpu.dot_dimension_numbers<[1], [0], [0], [1], [0, 0, 1, 1], [], []>} : vector<24x32xf32>, vector<32x8xf32>, vector<24x8xf32> -> vector<24x8xf32>
    %c2_93 = arith.constant 2 : index
    %c0_94 = arith.constant 0 : index
    %c0_95 = arith.constant 0 : index
    %133 = vector.load %arg11[%c2_93, %c0_94, %c0_95] : memref<4x1x8xf32, #tpu.memory_space<vmem>>, vector<1x1x8xf32>
    %134 = vector.shape_cast %133 : vector<1x1x8xf32> to vector<1x8xf32>
    %135 = vector.broadcast %134 : vector<1x8xf32> to vector<24x8xf32>
    %136 = arith.addf %132, %135 : vector<24x8xf32>
    %cst_96 = arith.constant dense<0.000000e+00> : vector<24x24xf32>
    %137 = tpu.matmul %122, %129, %cst_96 {dimension_numbers = #tpu.dot_dimension_numbers<[1], [0], [0], [1], [0, 0, 1, 1], [], []>} : vector<24x8xf32>, vector<8x24xf32>, vector<24x24xf32> -> vector<24x24xf32>
    %138 = arith.addf %137, %11 : vector<24x24xf32>
    %cst_97 = arith.constant dense<0xFF800000> : vector<24xf32>
    %139 = vector.multi_reduction <maximumf>, %138, %cst_97 [1] : vector<24x24xf32> to vector<24xf32>
    %140 = vector.shape_cast %139 : vector<24xf32> to vector<24x1xf32>
    %141 = vector.broadcast %140 : vector<24x1xf32> to vector<24x24xf32>
    %142 = arith.subf %138, %141 : vector<24x24xf32>
    %143 = math.exp %142 : vector<24x24xf32>
    %cst_98 = arith.constant dense<0.000000e+00> : vector<24xf32>
    %144 = vector.multi_reduction <add>, %143, %cst_98 [1] : vector<24x24xf32> to vector<24xf32>
    %145 = vector.shape_cast %144 : vector<24xf32> to vector<24x1xf32>
    %146 = tpu.reciprocal %145 {approx = true} : vector<24x1xf32> -> vector<24x1xf32>
    %147 = vector.broadcast %146 : vector<24x1xf32> to vector<24x24xf32>
    %148 = arith.mulf %143, %147 : vector<24x24xf32>
    %cst_99 = arith.constant dense<0.000000e+00> : vector<24x8xf32>
    %149 = tpu.matmul %148, %136, %cst_99 {dimension_numbers = #tpu.dot_dimension_numbers<[1], [0], [0], [1], [0, 0, 1, 1], [], []>} : vector<24x24xf32>, vector<24x8xf32>, vector<24x8xf32> -> vector<24x8xf32>
    %c2_100 = arith.constant 2 : index
    %c0_101 = arith.constant 0 : index
    %c0_102 = arith.constant 0 : index
    %150 = vector.load %arg12[%c2_100, %c0_101, %c0_102] : memref<4x8x32xf32, #tpu.memory_space<vmem>>, vector<1x8x32xf32>
    %151 = vector.shape_cast %150 : vector<1x8x32xf32> to vector<8x32xf32>
    %cst_103 = arith.constant dense<0.000000e+00> : vector<24x32xf32>
    %152 = tpu.matmul %149, %151, %cst_103 {dimension_numbers = #tpu.dot_dimension_numbers<[1], [0], [0], [1], [0, 0, 1, 1], [], []>} : vector<24x8xf32>, vector<8x32xf32>, vector<24x32xf32> -> vector<24x32xf32>
    %153 = arith.addf %115, %152 : vector<24x32xf32>
    %c3 = arith.constant 3 : index
    %c0_104 = arith.constant 0 : index
    %c0_105 = arith.constant 0 : index
    %154 = vector.load %arg6[%c3, %c0_104, %c0_105] : memref<4x32x8xf32, #tpu.memory_space<vmem>>, vector<1x32x8xf32>
    %155 = vector.shape_cast %154 : vector<1x32x8xf32> to vector<32x8xf32>
    %cst_106 = arith.constant dense<0.000000e+00> : vector<24x8xf32>
    %156 = tpu.matmul %35, %155, %cst_106 {dimension_numbers = #tpu.dot_dimension_numbers<[1], [0], [0], [1], [0, 0, 1, 1], [], []>} : vector<24x32xf32>, vector<32x8xf32>, vector<24x8xf32> -> vector<24x8xf32>
    %c3_107 = arith.constant 3 : index
    %c0_108 = arith.constant 0 : index
    %c0_109 = arith.constant 0 : index
    %157 = vector.load %arg7[%c3_107, %c0_108, %c0_109] : memref<4x1x8xf32, #tpu.memory_space<vmem>>, vector<1x1x8xf32>
    %158 = vector.shape_cast %157 : vector<1x1x8xf32> to vector<1x8xf32>
    %159 = vector.broadcast %158 : vector<1x8xf32> to vector<24x8xf32>
    %160 = arith.addf %156, %159 : vector<24x8xf32>
    %c3_110 = arith.constant 3 : index
    %c0_111 = arith.constant 0 : index
    %c0_112 = arith.constant 0 : index
    %161 = vector.load %arg8[%c3_110, %c0_111, %c0_112] : memref<4x8x32xf32, #tpu.memory_space<vmem>>, vector<1x8x32xf32>
    %162 = vector.shape_cast %161 : vector<1x8x32xf32> to vector<8x32xf32>
    %cst_113 = arith.constant dense<0.000000e+00> : vector<8x24xf32>
    %163 = tpu.matmul %162, %36, %cst_113 {dimension_numbers = #tpu.dot_dimension_numbers<[1], [0], [0], [1], [0, 0, 1, 1], [], []>} : vector<8x32xf32>, vector<32x24xf32>, vector<8x24xf32> -> vector<8x24xf32>
    %c3_114 = arith.constant 3 : index
    %c0_115 = arith.constant 0 : index
    %c0_116 = arith.constant 0 : index
    %164 = vector.load %arg9[%c3_114, %c0_115, %c0_116] : memref<4x8x1xf32, #tpu.memory_space<vmem>>, vector<1x8x1xf32>
    %165 = vector.shape_cast %164 : vector<1x8x1xf32> to vector<8x1xf32>
    %166 = vector.broadcast %165 : vector<8x1xf32> to vector<8x24xf32>
    %167 = arith.addf %163, %166 : vector<8x24xf32>
    %c3_117 = arith.constant 3 : index
    %c0_118 = arith.constant 0 : index
    %c0_119 = arith.constant 0 : index
    %168 = vector.load %arg10[%c3_117, %c0_118, %c0_119] : memref<4x32x8xf32, #tpu.memory_space<vmem>>, vector<1x32x8xf32>
    %169 = vector.shape_cast %168 : vector<1x32x8xf32> to vector<32x8xf32>
    %cst_120 = arith.constant dense<0.000000e+00> : vector<24x8xf32>
    %170 = tpu.matmul %35, %169, %cst_120 {dimension_numbers = #tpu.dot_dimension_numbers<[1], [0], [0], [1], [0, 0, 1, 1], [], []>} : vector<24x32xf32>, vector<32x8xf32>, vector<24x8xf32> -> vector<24x8xf32>
    %c3_121 = arith.constant 3 : index
    %c0_122 = arith.constant 0 : index
    %c0_123 = arith.constant 0 : index
    %171 = vector.load %arg11[%c3_121, %c0_122, %c0_123] : memref<4x1x8xf32, #tpu.memory_space<vmem>>, vector<1x1x8xf32>
    %172 = vector.shape_cast %171 : vector<1x1x8xf32> to vector<1x8xf32>
    %173 = vector.broadcast %172 : vector<1x8xf32> to vector<24x8xf32>
    %174 = arith.addf %170, %173 : vector<24x8xf32>
    %cst_124 = arith.constant dense<0.000000e+00> : vector<24x24xf32>
    %175 = tpu.matmul %160, %167, %cst_124 {dimension_numbers = #tpu.dot_dimension_numbers<[1], [0], [0], [1], [0, 0, 1, 1], [], []>} : vector<24x8xf32>, vector<8x24xf32>, vector<24x24xf32> -> vector<24x24xf32>
    %176 = arith.addf %175, %11 : vector<24x24xf32>
    %cst_125 = arith.constant dense<0xFF800000> : vector<24xf32>
    %177 = vector.multi_reduction <maximumf>, %176, %cst_125 [1] : vector<24x24xf32> to vector<24xf32>
    %178 = vector.shape_cast %177 : vector<24xf32> to vector<24x1xf32>
    %179 = vector.broadcast %178 : vector<24x1xf32> to vector<24x24xf32>
    %180 = arith.subf %176, %179 : vector<24x24xf32>
    %181 = math.exp %180 : vector<24x24xf32>
    %cst_126 = arith.constant dense<0.000000e+00> : vector<24xf32>
    %182 = vector.multi_reduction <add>, %181, %cst_126 [1] : vector<24x24xf32> to vector<24xf32>
    %183 = vector.shape_cast %182 : vector<24xf32> to vector<24x1xf32>
    %184 = tpu.reciprocal %183 {approx = true} : vector<24x1xf32> -> vector<24x1xf32>
    %185 = vector.broadcast %184 : vector<24x1xf32> to vector<24x24xf32>
    %186 = arith.mulf %181, %185 : vector<24x24xf32>
    %cst_127 = arith.constant dense<0.000000e+00> : vector<24x8xf32>
    %187 = tpu.matmul %186, %174, %cst_127 {dimension_numbers = #tpu.dot_dimension_numbers<[1], [0], [0], [1], [0, 0, 1, 1], [], []>} : vector<24x24xf32>, vector<24x8xf32>, vector<24x8xf32> -> vector<24x8xf32>
    %c3_128 = arith.constant 3 : index
    %c0_129 = arith.constant 0 : index
    %c0_130 = arith.constant 0 : index
    %188 = vector.load %arg12[%c3_128, %c0_129, %c0_130] : memref<4x8x32xf32, #tpu.memory_space<vmem>>, vector<1x8x32xf32>
    %189 = vector.shape_cast %188 : vector<1x8x32xf32> to vector<8x32xf32>
    %cst_131 = arith.constant dense<0.000000e+00> : vector<24x32xf32>
    %190 = tpu.matmul %187, %189, %cst_131 {dimension_numbers = #tpu.dot_dimension_numbers<[1], [0], [0], [1], [0, 0, 1, 1], [], []>} : vector<24x8xf32>, vector<8x32xf32>, vector<24x32xf32> -> vector<24x32xf32>
    %191 = arith.addf %153, %190 : vector<24x32xf32>
    %192 = arith.addf %5, %191 : vector<24x32xf32>
    %c0_132 = arith.constant 0 : index
    %c0_133 = arith.constant 0 : index
    %193 = vector.load %arg14[%c0_132, %c0_133] : memref<1x32xf32, #tpu.memory_space<vmem>>, vector<1x32xf32>
    %c0_134 = arith.constant 0 : index
    %c0_135 = arith.constant 0 : index
    %194 = vector.load %arg15[%c0_134, %c0_135] : memref<1x32xf32, #tpu.memory_space<vmem>>, vector<1x32xf32>
    %cst_136 = arith.constant dense<0.000000e+00> : vector<24xf32>
    %195 = vector.multi_reduction <add>, %192, %cst_136 [1] : vector<24x32xf32> to vector<24xf32>
    %196 = vector.shape_cast %195 : vector<24xf32> to vector<24x1xf32>
    %cst_137 = arith.constant 3.200000e+01 : f32
    %197 = vector.broadcast %cst_137 : f32 to vector<24x1xf32>
    %198 = arith.divf %196, %197 : vector<24x1xf32>
    %199 = vector.broadcast %198 : vector<24x1xf32> to vector<24x32xf32>
    %200 = arith.subf %192, %199 : vector<24x32xf32>
    %201 = arith.mulf %200, %200 : vector<24x32xf32>
    %cst_138 = arith.constant dense<0.000000e+00> : vector<24xf32>
    %202 = vector.multi_reduction <add>, %201, %cst_138 [1] : vector<24x32xf32> to vector<24xf32>
    %203 = vector.shape_cast %202 : vector<24xf32> to vector<24x1xf32>
    %cst_139 = arith.constant 3.200000e+01 : f32
    %204 = vector.broadcast %cst_139 : f32 to vector<24x1xf32>
    %205 = arith.divf %203, %204 : vector<24x1xf32>
    %206 = vector.broadcast %198 : vector<24x1xf32> to vector<24x32xf32>
    %207 = arith.subf %192, %206 : vector<24x32xf32>
    %cst_140 = arith.constant 9.99999974E-6 : f32
    %208 = vector.broadcast %cst_140 : f32 to vector<24x1xf32>
    %209 = arith.addf %205, %208 : vector<24x1xf32>
    %210 = math.rsqrt %209 : vector<24x1xf32>
    %211 = vector.broadcast %210 : vector<24x1xf32> to vector<24x32xf32>
    %212 = arith.mulf %207, %211 : vector<24x32xf32>
    %213 = vector.broadcast %193 : vector<1x32xf32> to vector<24x32xf32>
    %214 = arith.mulf %212, %213 : vector<24x32xf32>
    %215 = vector.broadcast %194 : vector<1x32xf32> to vector<24x32xf32>
    %216 = arith.addf %214, %215 : vector<24x32xf32>
    %c0_141 = arith.constant 0 : index
    %c0_142 = arith.constant 0 : index
    %217 = vector.load %arg16[%c0_141, %c0_142] : memref<32x128xf32, #tpu.memory_space<vmem>>, vector<32x128xf32>
    %cst_143 = arith.constant dense<0.000000e+00> : vector<24x128xf32>
    %218 = tpu.matmul %216, %217, %cst_143 {dimension_numbers = #tpu.dot_dimension_numbers<[1], [0], [0], [1], [0, 0, 1, 1], [], []>} : vector<24x32xf32>, vector<32x128xf32>, vector<24x128xf32> -> vector<24x128xf32>
    %c0_144 = arith.constant 0 : index
    %c0_145 = arith.constant 0 : index
    %219 = vector.load %arg17[%c0_144, %c0_145] : memref<1x128xf32, #tpu.memory_space<vmem>>, vector<1x128xf32>
    %220 = vector.broadcast %219 : vector<1x128xf32> to vector<24x128xf32>
    %221 = arith.addf %218, %220 : vector<24x128xf32>
    %cst_146 = arith.constant 5.000000e-01 : f32
    %222 = vector.broadcast %cst_146 : f32 to vector<24x128xf32>
    %223 = arith.mulf %222, %221 : vector<24x128xf32>
    %cst_147 = arith.constant 4.471500e-02 : f32
    %224 = vector.broadcast %cst_147 : f32 to vector<24x128xf32>
    %225 = arith.mulf %224, %221 : vector<24x128xf32>
    %226 = arith.mulf %225, %221 : vector<24x128xf32>
    %227 = arith.mulf %226, %221 : vector<24x128xf32>
    %228 = arith.addf %221, %227 : vector<24x128xf32>
    %cst_148 = arith.constant 0.797884583 : f32
    %229 = vector.broadcast %cst_148 : f32 to vector<24x128xf32>
    %230 = arith.mulf %229, %228 : vector<24x128xf32>
    %231 = math.tanh %230 : vector<24x128xf32>
    %cst_149 = arith.constant 1.000000e+00 : f32
    %232 = vector.broadcast %cst_149 : f32 to vector<24x128xf32>
    %233 = arith.addf %232, %231 : vector<24x128xf32>
    %234 = arith.mulf %223, %233 : vector<24x128xf32>
    %c0_150 = arith.constant 0 : index
    %c0_151 = arith.constant 0 : index
    %235 = vector.load %arg18[%c0_150, %c0_151] : memref<128x32xf32, #tpu.memory_space<vmem>>, vector<128x32xf32>
    %cst_152 = arith.constant dense<0.000000e+00> : vector<24x32xf32>
    %236 = tpu.matmul %234, %235, %cst_152 {dimension_numbers = #tpu.dot_dimension_numbers<[1], [0], [0], [1], [0, 0, 1, 1], [], []>} : vector<24x128xf32>, vector<128x32xf32>, vector<24x32xf32> -> vector<24x32xf32>
    %237 = arith.addf %192, %236 : vector<24x32xf32>
    %c0_153 = arith.constant 0 : index
    %c0_154 = arith.constant 0 : index
    %238 = vector.load %arg19[%c0_153, %c0_154] : memref<1x32xf32, #tpu.memory_space<vmem>>, vector<1x32xf32>
    %239 = vector.broadcast %238 : vector<1x32xf32> to vector<24x32xf32>
    %240 = arith.addf %237, %239 : vector<24x32xf32>
    %c0_155 = arith.constant 0 : index
    %c0_156 = arith.constant 0 : index
    %241 = vector.load %arg20[%c0_155, %c0_156] : memref<1x32xf32, #tpu.memory_space<vmem>>, vector<1x32xf32>
    %c0_157 = arith.constant 0 : index
    %c0_158 = arith.constant 0 : index
    %242 = vector.load %arg21[%c0_157, %c0_158] : memref<1x32xf32, #tpu.memory_space<vmem>>, vector<1x32xf32>
    %cst_159 = arith.constant dense<0.000000e+00> : vector<24xf32>
    %243 = vector.multi_reduction <add>, %240, %cst_159 [1] : vector<24x32xf32> to vector<24xf32>
    %244 = vector.shape_cast %243 : vector<24xf32> to vector<24x1xf32>
    %cst_160 = arith.constant 3.200000e+01 : f32
    %245 = vector.broadcast %cst_160 : f32 to vector<24x1xf32>
    %246 = arith.divf %244, %245 : vector<24x1xf32>
    %247 = vector.broadcast %246 : vector<24x1xf32> to vector<24x32xf32>
    %248 = arith.subf %240, %247 : vector<24x32xf32>
    %249 = arith.mulf %248, %248 : vector<24x32xf32>
    %cst_161 = arith.constant dense<0.000000e+00> : vector<24xf32>
    %250 = vector.multi_reduction <add>, %249, %cst_161 [1] : vector<24x32xf32> to vector<24xf32>
    %251 = vector.shape_cast %250 : vector<24xf32> to vector<24x1xf32>
    %cst_162 = arith.constant 3.200000e+01 : f32
    %252 = vector.broadcast %cst_162 : f32 to vector<24x1xf32>
    %253 = arith.divf %251, %252 : vector<24x1xf32>
    %254 = vector.broadcast %246 : vector<24x1xf32> to vector<24x32xf32>
    %255 = arith.subf %240, %254 : vector<24x32xf32>
    %cst_163 = arith.constant 9.99999974E-6 : f32
    %256 = vector.broadcast %cst_163 : f32 to vector<24x1xf32>
    %257 = arith.addf %253, %256 : vector<24x1xf32>
    %258 = math.rsqrt %257 : vector<24x1xf32>
    %259 = vector.broadcast %258 : vector<24x1xf32> to vector<24x32xf32>
    %260 = arith.mulf %255, %259 : vector<24x32xf32>
    %261 = vector.broadcast %241 : vector<1x32xf32> to vector<24x32xf32>
    %262 = arith.mulf %260, %261 : vector<24x32xf32>
    %263 = vector.broadcast %242 : vector<1x32xf32> to vector<24x32xf32>
    %264 = arith.addf %262, %263 : vector<24x32xf32>
    %265 = tpu.transpose %264, [1, 0] : vector<24x32xf32> -> vector<32x24xf32>
    %c0_164 = arith.constant 0 : index
    %c0_165 = arith.constant 0 : index
    %266 = vector.load %arg29[%c0_164, %c0_165] : memref<1x32xf32, #tpu.memory_space<vmem>>, vector<1x32xf32>
    %267 = vector.shape_cast %266 : vector<1x32xf32> to vector<1x32xf32>
    %268 = vector.broadcast %267 : vector<1x32xf32> to vector<24x32xf32>
    %c0_166 = arith.constant 0 : index
    %c0_167 = arith.constant 0 : index
    %c0_168 = arith.constant 0 : index
    %269 = vector.load %arg22[%c0_166, %c0_167, %c0_168] : memref<4x32x8xf32, #tpu.memory_space<vmem>>, vector<1x32x8xf32>
    %270 = vector.shape_cast %269 : vector<1x32x8xf32> to vector<32x8xf32>
    %cst_169 = arith.constant dense<0.000000e+00> : vector<24x8xf32>
    %271 = tpu.matmul %264, %270, %cst_169 {dimension_numbers = #tpu.dot_dimension_numbers<[1], [0], [0], [1], [0, 0, 1, 1], [], []>} : vector<24x32xf32>, vector<32x8xf32>, vector<24x8xf32> -> vector<24x8xf32>
    %c0_170 = arith.constant 0 : index
    %c0_171 = arith.constant 0 : index
    %c0_172 = arith.constant 0 : index
    %272 = vector.load %arg23[%c0_170, %c0_171, %c0_172] : memref<4x1x8xf32, #tpu.memory_space<vmem>>, vector<1x1x8xf32>
    %273 = vector.shape_cast %272 : vector<1x1x8xf32> to vector<1x8xf32>
    %274 = vector.broadcast %273 : vector<1x8xf32> to vector<24x8xf32>
    %275 = arith.addf %271, %274 : vector<24x8xf32>
    %c0_173 = arith.constant 0 : index
    %c0_174 = arith.constant 0 : index
    %c0_175 = arith.constant 0 : index
    %276 = vector.load %arg24[%c0_173, %c0_174, %c0_175] : memref<4x8x32xf32, #tpu.memory_space<vmem>>, vector<1x8x32xf32>
    %277 = vector.shape_cast %276 : vector<1x8x32xf32> to vector<8x32xf32>
    %cst_176 = arith.constant dense<0.000000e+00> : vector<8x24xf32>
    %278 = tpu.matmul %277, %265, %cst_176 {dimension_numbers = #tpu.dot_dimension_numbers<[1], [0], [0], [1], [0, 0, 1, 1], [], []>} : vector<8x32xf32>, vector<32x24xf32>, vector<8x24xf32> -> vector<8x24xf32>
    %c0_177 = arith.constant 0 : index
    %c0_178 = arith.constant 0 : index
    %c0_179 = arith.constant 0 : index
    %279 = vector.load %arg25[%c0_177, %c0_178, %c0_179] : memref<4x8x1xf32, #tpu.memory_space<vmem>>, vector<1x8x1xf32>
    %280 = vector.shape_cast %279 : vector<1x8x1xf32> to vector<8x1xf32>
    %281 = vector.broadcast %280 : vector<8x1xf32> to vector<8x24xf32>
    %282 = arith.addf %278, %281 : vector<8x24xf32>
    %c0_180 = arith.constant 0 : index
    %c0_181 = arith.constant 0 : index
    %c0_182 = arith.constant 0 : index
    %283 = vector.load %arg26[%c0_180, %c0_181, %c0_182] : memref<4x32x8xf32, #tpu.memory_space<vmem>>, vector<1x32x8xf32>
    %284 = vector.shape_cast %283 : vector<1x32x8xf32> to vector<32x8xf32>
    %cst_183 = arith.constant dense<0.000000e+00> : vector<24x8xf32>
    %285 = tpu.matmul %264, %284, %cst_183 {dimension_numbers = #tpu.dot_dimension_numbers<[1], [0], [0], [1], [0, 0, 1, 1], [], []>} : vector<24x32xf32>, vector<32x8xf32>, vector<24x8xf32> -> vector<24x8xf32>
    %c0_184 = arith.constant 0 : index
    %c0_185 = arith.constant 0 : index
    %c0_186 = arith.constant 0 : index
    %286 = vector.load %arg27[%c0_184, %c0_185, %c0_186] : memref<4x1x8xf32, #tpu.memory_space<vmem>>, vector<1x1x8xf32>
    %287 = vector.shape_cast %286 : vector<1x1x8xf32> to vector<1x8xf32>
    %288 = vector.broadcast %287 : vector<1x8xf32> to vector<24x8xf32>
    %289 = arith.addf %285, %288 : vector<24x8xf32>
    %cst_187 = arith.constant dense<0.000000e+00> : vector<24x24xf32>
    %290 = tpu.matmul %275, %282, %cst_187 {dimension_numbers = #tpu.dot_dimension_numbers<[1], [0], [0], [1], [0, 0, 1, 1], [], []>} : vector<24x8xf32>, vector<8x24xf32>, vector<24x24xf32> -> vector<24x24xf32>
    %291 = arith.addf %290, %11 : vector<24x24xf32>
    %cst_188 = arith.constant dense<0xFF800000> : vector<24xf32>
    %292 = vector.multi_reduction <maximumf>, %291, %cst_188 [1] : vector<24x24xf32> to vector<24xf32>
    %293 = vector.shape_cast %292 : vector<24xf32> to vector<24x1xf32>
    %294 = vector.broadcast %293 : vector<24x1xf32> to vector<24x24xf32>
    %295 = arith.subf %291, %294 : vector<24x24xf32>
    %296 = math.exp %295 : vector<24x24xf32>
    %cst_189 = arith.constant dense<0.000000e+00> : vector<24xf32>
    %297 = vector.multi_reduction <add>, %296, %cst_189 [1] : vector<24x24xf32> to vector<24xf32>
    %298 = vector.shape_cast %297 : vector<24xf32> to vector<24x1xf32>
    %299 = tpu.reciprocal %298 {approx = true} : vector<24x1xf32> -> vector<24x1xf32>
    %300 = vector.broadcast %299 : vector<24x1xf32> to vector<24x24xf32>
    %301 = arith.mulf %296, %300 : vector<24x24xf32>
    %cst_190 = arith.constant dense<0.000000e+00> : vector<24x8xf32>
    %302 = tpu.matmul %301, %289, %cst_190 {dimension_numbers = #tpu.dot_dimension_numbers<[1], [0], [0], [1], [0, 0, 1, 1], [], []>} : vector<24x24xf32>, vector<24x8xf32>, vector<24x8xf32> -> vector<24x8xf32>
    %c0_191 = arith.constant 0 : index
    %c0_192 = arith.constant 0 : index
    %c0_193 = arith.constant 0 : index
    %303 = vector.load %arg28[%c0_191, %c0_192, %c0_193] : memref<4x8x32xf32, #tpu.memory_space<vmem>>, vector<1x8x32xf32>
    %304 = vector.shape_cast %303 : vector<1x8x32xf32> to vector<8x32xf32>
    %cst_194 = arith.constant dense<0.000000e+00> : vector<24x32xf32>
    %305 = tpu.matmul %302, %304, %cst_194 {dimension_numbers = #tpu.dot_dimension_numbers<[1], [0], [0], [1], [0, 0, 1, 1], [], []>} : vector<24x8xf32>, vector<8x32xf32>, vector<24x32xf32> -> vector<24x32xf32>
    %306 = arith.addf %268, %305 : vector<24x32xf32>
    %c1_195 = arith.constant 1 : index
    %c0_196 = arith.constant 0 : index
    %c0_197 = arith.constant 0 : index
    %307 = vector.load %arg22[%c1_195, %c0_196, %c0_197] : memref<4x32x8xf32, #tpu.memory_space<vmem>>, vector<1x32x8xf32>
    %308 = vector.shape_cast %307 : vector<1x32x8xf32> to vector<32x8xf32>
    %cst_198 = arith.constant dense<0.000000e+00> : vector<24x8xf32>
    %309 = tpu.matmul %264, %308, %cst_198 {dimension_numbers = #tpu.dot_dimension_numbers<[1], [0], [0], [1], [0, 0, 1, 1], [], []>} : vector<24x32xf32>, vector<32x8xf32>, vector<24x8xf32> -> vector<24x8xf32>
    %c1_199 = arith.constant 1 : index
    %c0_200 = arith.constant 0 : index
    %c0_201 = arith.constant 0 : index
    %310 = vector.load %arg23[%c1_199, %c0_200, %c0_201] : memref<4x1x8xf32, #tpu.memory_space<vmem>>, vector<1x1x8xf32>
    %311 = vector.shape_cast %310 : vector<1x1x8xf32> to vector<1x8xf32>
    %312 = vector.broadcast %311 : vector<1x8xf32> to vector<24x8xf32>
    %313 = arith.addf %309, %312 : vector<24x8xf32>
    %c1_202 = arith.constant 1 : index
    %c0_203 = arith.constant 0 : index
    %c0_204 = arith.constant 0 : index
    %314 = vector.load %arg24[%c1_202, %c0_203, %c0_204] : memref<4x8x32xf32, #tpu.memory_space<vmem>>, vector<1x8x32xf32>
    %315 = vector.shape_cast %314 : vector<1x8x32xf32> to vector<8x32xf32>
    %cst_205 = arith.constant dense<0.000000e+00> : vector<8x24xf32>
    %316 = tpu.matmul %315, %265, %cst_205 {dimension_numbers = #tpu.dot_dimension_numbers<[1], [0], [0], [1], [0, 0, 1, 1], [], []>} : vector<8x32xf32>, vector<32x24xf32>, vector<8x24xf32> -> vector<8x24xf32>
    %c1_206 = arith.constant 1 : index
    %c0_207 = arith.constant 0 : index
    %c0_208 = arith.constant 0 : index
    %317 = vector.load %arg25[%c1_206, %c0_207, %c0_208] : memref<4x8x1xf32, #tpu.memory_space<vmem>>, vector<1x8x1xf32>
    %318 = vector.shape_cast %317 : vector<1x8x1xf32> to vector<8x1xf32>
    %319 = vector.broadcast %318 : vector<8x1xf32> to vector<8x24xf32>
    %320 = arith.addf %316, %319 : vector<8x24xf32>
    %c1_209 = arith.constant 1 : index
    %c0_210 = arith.constant 0 : index
    %c0_211 = arith.constant 0 : index
    %321 = vector.load %arg26[%c1_209, %c0_210, %c0_211] : memref<4x32x8xf32, #tpu.memory_space<vmem>>, vector<1x32x8xf32>
    %322 = vector.shape_cast %321 : vector<1x32x8xf32> to vector<32x8xf32>
    %cst_212 = arith.constant dense<0.000000e+00> : vector<24x8xf32>
    %323 = tpu.matmul %264, %322, %cst_212 {dimension_numbers = #tpu.dot_dimension_numbers<[1], [0], [0], [1], [0, 0, 1, 1], [], []>} : vector<24x32xf32>, vector<32x8xf32>, vector<24x8xf32> -> vector<24x8xf32>
    %c1_213 = arith.constant 1 : index
    %c0_214 = arith.constant 0 : index
    %c0_215 = arith.constant 0 : index
    %324 = vector.load %arg27[%c1_213, %c0_214, %c0_215] : memref<4x1x8xf32, #tpu.memory_space<vmem>>, vector<1x1x8xf32>
    %325 = vector.shape_cast %324 : vector<1x1x8xf32> to vector<1x8xf32>
    %326 = vector.broadcast %325 : vector<1x8xf32> to vector<24x8xf32>
    %327 = arith.addf %323, %326 : vector<24x8xf32>
    %cst_216 = arith.constant dense<0.000000e+00> : vector<24x24xf32>
    %328 = tpu.matmul %313, %320, %cst_216 {dimension_numbers = #tpu.dot_dimension_numbers<[1], [0], [0], [1], [0, 0, 1, 1], [], []>} : vector<24x8xf32>, vector<8x24xf32>, vector<24x24xf32> -> vector<24x24xf32>
    %329 = arith.addf %328, %11 : vector<24x24xf32>
    %cst_217 = arith.constant dense<0xFF800000> : vector<24xf32>
    %330 = vector.multi_reduction <maximumf>, %329, %cst_217 [1] : vector<24x24xf32> to vector<24xf32>
    %331 = vector.shape_cast %330 : vector<24xf32> to vector<24x1xf32>
    %332 = vector.broadcast %331 : vector<24x1xf32> to vector<24x24xf32>
    %333 = arith.subf %329, %332 : vector<24x24xf32>
    %334 = math.exp %333 : vector<24x24xf32>
    %cst_218 = arith.constant dense<0.000000e+00> : vector<24xf32>
    %335 = vector.multi_reduction <add>, %334, %cst_218 [1] : vector<24x24xf32> to vector<24xf32>
    %336 = vector.shape_cast %335 : vector<24xf32> to vector<24x1xf32>
    %337 = tpu.reciprocal %336 {approx = true} : vector<24x1xf32> -> vector<24x1xf32>
    %338 = vector.broadcast %337 : vector<24x1xf32> to vector<24x24xf32>
    %339 = arith.mulf %334, %338 : vector<24x24xf32>
    %cst_219 = arith.constant dense<0.000000e+00> : vector<24x8xf32>
    %340 = tpu.matmul %339, %327, %cst_219 {dimension_numbers = #tpu.dot_dimension_numbers<[1], [0], [0], [1], [0, 0, 1, 1], [], []>} : vector<24x24xf32>, vector<24x8xf32>, vector<24x8xf32> -> vector<24x8xf32>
    %c1_220 = arith.constant 1 : index
    %c0_221 = arith.constant 0 : index
    %c0_222 = arith.constant 0 : index
    %341 = vector.load %arg28[%c1_220, %c0_221, %c0_222] : memref<4x8x32xf32, #tpu.memory_space<vmem>>, vector<1x8x32xf32>
    %342 = vector.shape_cast %341 : vector<1x8x32xf32> to vector<8x32xf32>
    %cst_223 = arith.constant dense<0.000000e+00> : vector<24x32xf32>
    %343 = tpu.matmul %340, %342, %cst_223 {dimension_numbers = #tpu.dot_dimension_numbers<[1], [0], [0], [1], [0, 0, 1, 1], [], []>} : vector<24x8xf32>, vector<8x32xf32>, vector<24x32xf32> -> vector<24x32xf32>
    %344 = arith.addf %306, %343 : vector<24x32xf32>
    %c2_224 = arith.constant 2 : index
    %c0_225 = arith.constant 0 : index
    %c0_226 = arith.constant 0 : index
    %345 = vector.load %arg22[%c2_224, %c0_225, %c0_226] : memref<4x32x8xf32, #tpu.memory_space<vmem>>, vector<1x32x8xf32>
    %346 = vector.shape_cast %345 : vector<1x32x8xf32> to vector<32x8xf32>
    %cst_227 = arith.constant dense<0.000000e+00> : vector<24x8xf32>
    %347 = tpu.matmul %264, %346, %cst_227 {dimension_numbers = #tpu.dot_dimension_numbers<[1], [0], [0], [1], [0, 0, 1, 1], [], []>} : vector<24x32xf32>, vector<32x8xf32>, vector<24x8xf32> -> vector<24x8xf32>
    %c2_228 = arith.constant 2 : index
    %c0_229 = arith.constant 0 : index
    %c0_230 = arith.constant 0 : index
    %348 = vector.load %arg23[%c2_228, %c0_229, %c0_230] : memref<4x1x8xf32, #tpu.memory_space<vmem>>, vector<1x1x8xf32>
    %349 = vector.shape_cast %348 : vector<1x1x8xf32> to vector<1x8xf32>
    %350 = vector.broadcast %349 : vector<1x8xf32> to vector<24x8xf32>
    %351 = arith.addf %347, %350 : vector<24x8xf32>
    %c2_231 = arith.constant 2 : index
    %c0_232 = arith.constant 0 : index
    %c0_233 = arith.constant 0 : index
    %352 = vector.load %arg24[%c2_231, %c0_232, %c0_233] : memref<4x8x32xf32, #tpu.memory_space<vmem>>, vector<1x8x32xf32>
    %353 = vector.shape_cast %352 : vector<1x8x32xf32> to vector<8x32xf32>
    %cst_234 = arith.constant dense<0.000000e+00> : vector<8x24xf32>
    %354 = tpu.matmul %353, %265, %cst_234 {dimension_numbers = #tpu.dot_dimension_numbers<[1], [0], [0], [1], [0, 0, 1, 1], [], []>} : vector<8x32xf32>, vector<32x24xf32>, vector<8x24xf32> -> vector<8x24xf32>
    %c2_235 = arith.constant 2 : index
    %c0_236 = arith.constant 0 : index
    %c0_237 = arith.constant 0 : index
    %355 = vector.load %arg25[%c2_235, %c0_236, %c0_237] : memref<4x8x1xf32, #tpu.memory_space<vmem>>, vector<1x8x1xf32>
    %356 = vector.shape_cast %355 : vector<1x8x1xf32> to vector<8x1xf32>
    %357 = vector.broadcast %356 : vector<8x1xf32> to vector<8x24xf32>
    %358 = arith.addf %354, %357 : vector<8x24xf32>
    %c2_238 = arith.constant 2 : index
    %c0_239 = arith.constant 0 : index
    %c0_240 = arith.constant 0 : index
    %359 = vector.load %arg26[%c2_238, %c0_239, %c0_240] : memref<4x32x8xf32, #tpu.memory_space<vmem>>, vector<1x32x8xf32>
    %360 = vector.shape_cast %359 : vector<1x32x8xf32> to vector<32x8xf32>
    %cst_241 = arith.constant dense<0.000000e+00> : vector<24x8xf32>
    %361 = tpu.matmul %264, %360, %cst_241 {dimension_numbers = #tpu.dot_dimension_numbers<[1], [0], [0], [1], [0, 0, 1, 1], [], []>} : vector<24x32xf32>, vector<32x8xf32>, vector<24x8xf32> -> vector<24x8xf32>
    %c2_242 = arith.constant 2 : index
    %c0_243 = arith.constant 0 : index
    %c0_244 = arith.constant 0 : index
    %362 = vector.load %arg27[%c2_242, %c0_243, %c0_244] : memref<4x1x8xf32, #tpu.memory_space<vmem>>, vector<1x1x8xf32>
    %363 = vector.shape_cast %362 : vector<1x1x8xf32> to vector<1x8xf32>
    %364 = vector.broadcast %363 : vector<1x8xf32> to vector<24x8xf32>
    %365 = arith.addf %361, %364 : vector<24x8xf32>
    %cst_245 = arith.constant dense<0.000000e+00> : vector<24x24xf32>
    %366 = tpu.matmul %351, %358, %cst_245 {dimension_numbers = #tpu.dot_dimension_numbers<[1], [0], [0], [1], [0, 0, 1, 1], [], []>} : vector<24x8xf32>, vector<8x24xf32>, vector<24x24xf32> -> vector<24x24xf32>
    %367 = arith.addf %366, %11 : vector<24x24xf32>
    %cst_246 = arith.constant dense<0xFF800000> : vector<24xf32>
    %368 = vector.multi_reduction <maximumf>, %367, %cst_246 [1] : vector<24x24xf32> to vector<24xf32>
    %369 = vector.shape_cast %368 : vector<24xf32> to vector<24x1xf32>
    %370 = vector.broadcast %369 : vector<24x1xf32> to vector<24x24xf32>
    %371 = arith.subf %367, %370 : vector<24x24xf32>
    %372 = math.exp %371 : vector<24x24xf32>
    %cst_247 = arith.constant dense<0.000000e+00> : vector<24xf32>
    %373 = vector.multi_reduction <add>, %372, %cst_247 [1] : vector<24x24xf32> to vector<24xf32>
    %374 = vector.shape_cast %373 : vector<24xf32> to vector<24x1xf32>
    %375 = tpu.reciprocal %374 {approx = true} : vector<24x1xf32> -> vector<24x1xf32>
    %376 = vector.broadcast %375 : vector<24x1xf32> to vector<24x24xf32>
    %377 = arith.mulf %372, %376 : vector<24x24xf32>
    %cst_248 = arith.constant dense<0.000000e+00> : vector<24x8xf32>
    %378 = tpu.matmul %377, %365, %cst_248 {dimension_numbers = #tpu.dot_dimension_numbers<[1], [0], [0], [1], [0, 0, 1, 1], [], []>} : vector<24x24xf32>, vector<24x8xf32>, vector<24x8xf32> -> vector<24x8xf32>
    %c2_249 = arith.constant 2 : index
    %c0_250 = arith.constant 0 : index
    %c0_251 = arith.constant 0 : index
    %379 = vector.load %arg28[%c2_249, %c0_250, %c0_251] : memref<4x8x32xf32, #tpu.memory_space<vmem>>, vector<1x8x32xf32>
    %380 = vector.shape_cast %379 : vector<1x8x32xf32> to vector<8x32xf32>
    %cst_252 = arith.constant dense<0.000000e+00> : vector<24x32xf32>
    %381 = tpu.matmul %378, %380, %cst_252 {dimension_numbers = #tpu.dot_dimension_numbers<[1], [0], [0], [1], [0, 0, 1, 1], [], []>} : vector<24x8xf32>, vector<8x32xf32>, vector<24x32xf32> -> vector<24x32xf32>
    %382 = arith.addf %344, %381 : vector<24x32xf32>
    %c3_253 = arith.constant 3 : index
    %c0_254 = arith.constant 0 : index
    %c0_255 = arith.constant 0 : index
    %383 = vector.load %arg22[%c3_253, %c0_254, %c0_255] : memref<4x32x8xf32, #tpu.memory_space<vmem>>, vector<1x32x8xf32>
    %384 = vector.shape_cast %383 : vector<1x32x8xf32> to vector<32x8xf32>
    %cst_256 = arith.constant dense<0.000000e+00> : vector<24x8xf32>
    %385 = tpu.matmul %264, %384, %cst_256 {dimension_numbers = #tpu.dot_dimension_numbers<[1], [0], [0], [1], [0, 0, 1, 1], [], []>} : vector<24x32xf32>, vector<32x8xf32>, vector<24x8xf32> -> vector<24x8xf32>
    %c3_257 = arith.constant 3 : index
    %c0_258 = arith.constant 0 : index
    %c0_259 = arith.constant 0 : index
    %386 = vector.load %arg23[%c3_257, %c0_258, %c0_259] : memref<4x1x8xf32, #tpu.memory_space<vmem>>, vector<1x1x8xf32>
    %387 = vector.shape_cast %386 : vector<1x1x8xf32> to vector<1x8xf32>
    %388 = vector.broadcast %387 : vector<1x8xf32> to vector<24x8xf32>
    %389 = arith.addf %385, %388 : vector<24x8xf32>
    %c3_260 = arith.constant 3 : index
    %c0_261 = arith.constant 0 : index
    %c0_262 = arith.constant 0 : index
    %390 = vector.load %arg24[%c3_260, %c0_261, %c0_262] : memref<4x8x32xf32, #tpu.memory_space<vmem>>, vector<1x8x32xf32>
    %391 = vector.shape_cast %390 : vector<1x8x32xf32> to vector<8x32xf32>
    %cst_263 = arith.constant dense<0.000000e+00> : vector<8x24xf32>
    %392 = tpu.matmul %391, %265, %cst_263 {dimension_numbers = #tpu.dot_dimension_numbers<[1], [0], [0], [1], [0, 0, 1, 1], [], []>} : vector<8x32xf32>, vector<32x24xf32>, vector<8x24xf32> -> vector<8x24xf32>
    %c3_264 = arith.constant 3 : index
    %c0_265 = arith.constant 0 : index
    %c0_266 = arith.constant 0 : index
    %393 = vector.load %arg25[%c3_264, %c0_265, %c0_266] : memref<4x8x1xf32, #tpu.memory_space<vmem>>, vector<1x8x1xf32>
    %394 = vector.shape_cast %393 : vector<1x8x1xf32> to vector<8x1xf32>
    %395 = vector.broadcast %394 : vector<8x1xf32> to vector<8x24xf32>
    %396 = arith.addf %392, %395 : vector<8x24xf32>
    %c3_267 = arith.constant 3 : index
    %c0_268 = arith.constant 0 : index
    %c0_269 = arith.constant 0 : index
    %397 = vector.load %arg26[%c3_267, %c0_268, %c0_269] : memref<4x32x8xf32, #tpu.memory_space<vmem>>, vector<1x32x8xf32>
    %398 = vector.shape_cast %397 : vector<1x32x8xf32> to vector<32x8xf32>
    %cst_270 = arith.constant dense<0.000000e+00> : vector<24x8xf32>
    %399 = tpu.matmul %264, %398, %cst_270 {dimension_numbers = #tpu.dot_dimension_numbers<[1], [0], [0], [1], [0, 0, 1, 1], [], []>} : vector<24x32xf32>, vector<32x8xf32>, vector<24x8xf32> -> vector<24x8xf32>
    %c3_271 = arith.constant 3 : index
    %c0_272 = arith.constant 0 : index
    %c0_273 = arith.constant 0 : index
    %400 = vector.load %arg27[%c3_271, %c0_272, %c0_273] : memref<4x1x8xf32, #tpu.memory_space<vmem>>, vector<1x1x8xf32>
    %401 = vector.shape_cast %400 : vector<1x1x8xf32> to vector<1x8xf32>
    %402 = vector.broadcast %401 : vector<1x8xf32> to vector<24x8xf32>
    %403 = arith.addf %399, %402 : vector<24x8xf32>
    %cst_274 = arith.constant dense<0.000000e+00> : vector<24x24xf32>
    %404 = tpu.matmul %389, %396, %cst_274 {dimension_numbers = #tpu.dot_dimension_numbers<[1], [0], [0], [1], [0, 0, 1, 1], [], []>} : vector<24x8xf32>, vector<8x24xf32>, vector<24x24xf32> -> vector<24x24xf32>
    %405 = arith.addf %404, %11 : vector<24x24xf32>
    %cst_275 = arith.constant dense<0xFF800000> : vector<24xf32>
    %406 = vector.multi_reduction <maximumf>, %405, %cst_275 [1] : vector<24x24xf32> to vector<24xf32>
    %407 = vector.shape_cast %406 : vector<24xf32> to vector<24x1xf32>
    %408 = vector.broadcast %407 : vector<24x1xf32> to vector<24x24xf32>
    %409 = arith.subf %405, %408 : vector<24x24xf32>
    %410 = math.exp %409 : vector<24x24xf32>
    %cst_276 = arith.constant dense<0.000000e+00> : vector<24xf32>
    %411 = vector.multi_reduction <add>, %410, %cst_276 [1] : vector<24x24xf32> to vector<24xf32>
    %412 = vector.shape_cast %411 : vector<24xf32> to vector<24x1xf32>
    %413 = tpu.reciprocal %412 {approx = true} : vector<24x1xf32> -> vector<24x1xf32>
    %414 = vector.broadcast %413 : vector<24x1xf32> to vector<24x24xf32>
    %415 = arith.mulf %410, %414 : vector<24x24xf32>
    %cst_277 = arith.constant dense<0.000000e+00> : vector<24x8xf32>
    %416 = tpu.matmul %415, %403, %cst_277 {dimension_numbers = #tpu.dot_dimension_numbers<[1], [0], [0], [1], [0, 0, 1, 1], [], []>} : vector<24x24xf32>, vector<24x8xf32>, vector<24x8xf32> -> vector<24x8xf32>
    %c3_278 = arith.constant 3 : index
    %c0_279 = arith.constant 0 : index
    %c0_280 = arith.constant 0 : index
    %417 = vector.load %arg28[%c3_278, %c0_279, %c0_280] : memref<4x8x32xf32, #tpu.memory_space<vmem>>, vector<1x8x32xf32>
    %418 = vector.shape_cast %417 : vector<1x8x32xf32> to vector<8x32xf32>
    %cst_281 = arith.constant dense<0.000000e+00> : vector<24x32xf32>
    %419 = tpu.matmul %416, %418, %cst_281 {dimension_numbers = #tpu.dot_dimension_numbers<[1], [0], [0], [1], [0, 0, 1, 1], [], []>} : vector<24x8xf32>, vector<8x32xf32>, vector<24x32xf32> -> vector<24x32xf32>
    %420 = arith.addf %382, %419 : vector<24x32xf32>
    %421 = arith.addf %240, %420 : vector<24x32xf32>
    %c0_282 = arith.constant 0 : index
    %c0_283 = arith.constant 0 : index
    %422 = vector.load %arg30[%c0_282, %c0_283] : memref<1x32xf32, #tpu.memory_space<vmem>>, vector<1x32xf32>
    %c0_284 = arith.constant 0 : index
    %c0_285 = arith.constant 0 : index
    %423 = vector.load %arg31[%c0_284, %c0_285] : memref<1x32xf32, #tpu.memory_space<vmem>>, vector<1x32xf32>
    %cst_286 = arith.constant dense<0.000000e+00> : vector<24xf32>
    %424 = vector.multi_reduction <add>, %421, %cst_286 [1] : vector<24x32xf32> to vector<24xf32>
    %425 = vector.shape_cast %424 : vector<24xf32> to vector<24x1xf32>
    %cst_287 = arith.constant 3.200000e+01 : f32
    %426 = vector.broadcast %cst_287 : f32 to vector<24x1xf32>
    %427 = arith.divf %425, %426 : vector<24x1xf32>
    %428 = vector.broadcast %427 : vector<24x1xf32> to vector<24x32xf32>
    %429 = arith.subf %421, %428 : vector<24x32xf32>
    %430 = arith.mulf %429, %429 : vector<24x32xf32>
    %cst_288 = arith.constant dense<0.000000e+00> : vector<24xf32>
    %431 = vector.multi_reduction <add>, %430, %cst_288 [1] : vector<24x32xf32> to vector<24xf32>
    %432 = vector.shape_cast %431 : vector<24xf32> to vector<24x1xf32>
    %cst_289 = arith.constant 3.200000e+01 : f32
    %433 = vector.broadcast %cst_289 : f32 to vector<24x1xf32>
    %434 = arith.divf %432, %433 : vector<24x1xf32>
    %435 = vector.broadcast %427 : vector<24x1xf32> to vector<24x32xf32>
    %436 = arith.subf %421, %435 : vector<24x32xf32>
    %cst_290 = arith.constant 9.99999974E-6 : f32
    %437 = vector.broadcast %cst_290 : f32 to vector<24x1xf32>
    %438 = arith.addf %434, %437 : vector<24x1xf32>
    %439 = math.rsqrt %438 : vector<24x1xf32>
    %440 = vector.broadcast %439 : vector<24x1xf32> to vector<24x32xf32>
    %441 = arith.mulf %436, %440 : vector<24x32xf32>
    %442 = vector.broadcast %422 : vector<1x32xf32> to vector<24x32xf32>
    %443 = arith.mulf %441, %442 : vector<24x32xf32>
    %444 = vector.broadcast %423 : vector<1x32xf32> to vector<24x32xf32>
    %445 = arith.addf %443, %444 : vector<24x32xf32>
    %c0_291 = arith.constant 0 : index
    %c0_292 = arith.constant 0 : index
    %446 = vector.load %arg32[%c0_291, %c0_292] : memref<32x128xf32, #tpu.memory_space<vmem>>, vector<32x128xf32>
    %cst_293 = arith.constant dense<0.000000e+00> : vector<24x128xf32>
    %447 = tpu.matmul %445, %446, %cst_293 {dimension_numbers = #tpu.dot_dimension_numbers<[1], [0], [0], [1], [0, 0, 1, 1], [], []>} : vector<24x32xf32>, vector<32x128xf32>, vector<24x128xf32> -> vector<24x128xf32>
    %c0_294 = arith.constant 0 : index
    %c0_295 = arith.constant 0 : index
    %448 = vector.load %arg33[%c0_294, %c0_295] : memref<1x128xf32, #tpu.memory_space<vmem>>, vector<1x128xf32>
    %449 = vector.broadcast %448 : vector<1x128xf32> to vector<24x128xf32>
    %450 = arith.addf %447, %449 : vector<24x128xf32>
    %cst_296 = arith.constant 5.000000e-01 : f32
    %451 = vector.broadcast %cst_296 : f32 to vector<24x128xf32>
    %452 = arith.mulf %451, %450 : vector<24x128xf32>
    %cst_297 = arith.constant 4.471500e-02 : f32
    %453 = vector.broadcast %cst_297 : f32 to vector<24x128xf32>
    %454 = arith.mulf %453, %450 : vector<24x128xf32>
    %455 = arith.mulf %454, %450 : vector<24x128xf32>
    %456 = arith.mulf %455, %450 : vector<24x128xf32>
    %457 = arith.addf %450, %456 : vector<24x128xf32>
    %cst_298 = arith.constant 0.797884583 : f32
    %458 = vector.broadcast %cst_298 : f32 to vector<24x128xf32>
    %459 = arith.mulf %458, %457 : vector<24x128xf32>
    %460 = math.tanh %459 : vector<24x128xf32>
    %cst_299 = arith.constant 1.000000e+00 : f32
    %461 = vector.broadcast %cst_299 : f32 to vector<24x128xf32>
    %462 = arith.addf %461, %460 : vector<24x128xf32>
    %463 = arith.mulf %452, %462 : vector<24x128xf32>
    %c0_300 = arith.constant 0 : index
    %c0_301 = arith.constant 0 : index
    %464 = vector.load %arg34[%c0_300, %c0_301] : memref<128x32xf32, #tpu.memory_space<vmem>>, vector<128x32xf32>
    %cst_302 = arith.constant dense<0.000000e+00> : vector<24x32xf32>
    %465 = tpu.matmul %463, %464, %cst_302 {dimension_numbers = #tpu.dot_dimension_numbers<[1], [0], [0], [1], [0, 0, 1, 1], [], []>} : vector<24x128xf32>, vector<128x32xf32>, vector<24x32xf32> -> vector<24x32xf32>
    %466 = arith.addf %421, %465 : vector<24x32xf32>
    %c0_303 = arith.constant 0 : index
    %c0_304 = arith.constant 0 : index
    %467 = vector.load %arg35[%c0_303, %c0_304] : memref<1x32xf32, #tpu.memory_space<vmem>>, vector<1x32xf32>
    %468 = vector.broadcast %467 : vector<1x32xf32> to vector<24x32xf32>
    %469 = arith.addf %466, %468 : vector<24x32xf32>
    %470 = vector.extract_strided_slice %469 {offsets = [0, 0], sizes = [8, 32], strides = [1, 1]} : vector<24x32xf32> to vector<8x32xf32>
    %c0_305 = arith.constant 0 : index
    %c0_306 = arith.constant 0 : index
    %471 = vector.load %arg36[%c0_305, %c0_306] : memref<1x32xf32, #tpu.memory_space<vmem>>, vector<1x32xf32>
    %c0_307 = arith.constant 0 : index
    %c0_308 = arith.constant 0 : index
    %472 = vector.load %arg37[%c0_307, %c0_308] : memref<1x32xf32, #tpu.memory_space<vmem>>, vector<1x32xf32>
    %cst_309 = arith.constant dense<0.000000e+00> : vector<8xf32>
    %473 = vector.multi_reduction <add>, %470, %cst_309 [1] : vector<8x32xf32> to vector<8xf32>
    %474 = vector.shape_cast %473 : vector<8xf32> to vector<8x1xf32>
    %cst_310 = arith.constant 3.200000e+01 : f32
    %475 = vector.broadcast %cst_310 : f32 to vector<8x1xf32>
    %476 = arith.divf %474, %475 : vector<8x1xf32>
    %477 = vector.broadcast %476 : vector<8x1xf32> to vector<8x32xf32>
    %478 = arith.subf %470, %477 : vector<8x32xf32>
    %479 = arith.mulf %478, %478 : vector<8x32xf32>
    %cst_311 = arith.constant dense<0.000000e+00> : vector<8xf32>
    %480 = vector.multi_reduction <add>, %479, %cst_311 [1] : vector<8x32xf32> to vector<8xf32>
    %481 = vector.shape_cast %480 : vector<8xf32> to vector<8x1xf32>
    %cst_312 = arith.constant 3.200000e+01 : f32
    %482 = vector.broadcast %cst_312 : f32 to vector<8x1xf32>
    %483 = arith.divf %481, %482 : vector<8x1xf32>
    %484 = vector.broadcast %476 : vector<8x1xf32> to vector<8x32xf32>
    %485 = arith.subf %470, %484 : vector<8x32xf32>
    %cst_313 = arith.constant 9.99999974E-6 : f32
    %486 = vector.broadcast %cst_313 : f32 to vector<8x1xf32>
    %487 = arith.addf %483, %486 : vector<8x1xf32>
    %488 = math.rsqrt %487 : vector<8x1xf32>
    %489 = vector.broadcast %488 : vector<8x1xf32> to vector<8x32xf32>
    %490 = arith.mulf %485, %489 : vector<8x32xf32>
    %491 = vector.broadcast %471 : vector<1x32xf32> to vector<8x32xf32>
    %492 = arith.mulf %490, %491 : vector<8x32xf32>
    %493 = vector.broadcast %472 : vector<1x32xf32> to vector<8x32xf32>
    %494 = arith.addf %492, %493 : vector<8x32xf32>
    %c0_314 = arith.constant 0 : index
    %c0_315 = arith.constant 0 : index
    %495 = vector.load %arg38[%c0_314, %c0_315] : memref<32x128xf32, #tpu.memory_space<vmem>>, vector<32x128xf32>
    %cst_316 = arith.constant dense<0.000000e+00> : vector<8x128xf32>
    %496 = tpu.matmul %494, %495, %cst_316 {dimension_numbers = #tpu.dot_dimension_numbers<[1], [0], [0], [1], [0, 0, 1, 1], [], []>} : vector<8x32xf32>, vector<32x128xf32>, vector<8x128xf32> -> vector<8x128xf32>
    %c0_317 = arith.constant 0 : index
    %c0_318 = arith.constant 0 : index
    %497 = vector.load %arg39[%c0_317, %c0_318] : memref<1x128xf32, #tpu.memory_space<vmem>>, vector<1x128xf32>
    %498 = vector.broadcast %497 : vector<1x128xf32> to vector<8x128xf32>
    %499 = arith.addf %496, %498 : vector<8x128xf32>
    %c0_319 = arith.constant 0 : index
    %c0_320 = arith.constant 0 : index
    %c0_321 = arith.constant 0 : index
    %500 = vector.load %arg40[%c0_319, %c0_320, %c0_321] : memref<1x8x128xf32, #tpu.memory_space<vmem>>, vector<1x8x128xf32>
    %501 = vector.shape_cast %500 : vector<1x8x128xf32> to vector<8x128xf32>
    %502 = vector.shape_cast %499 : vector<8x128xf32> to vector<1x8x128xf32>
    tpu.vector_store %arg40[%c0_319, %c0_320, %c0_321], %502 {strides = array<i32>} : memref<1x8x128xf32, #tpu.memory_space<vmem>>, vector<1x8x128xf32>,
    return
  }
  func.func @transform_0(%arg0: i32) -> (i32, i32, i32) {
    %c0_i32 = arith.constant 0 : i32
    %c0_i32_0 = arith.constant 0 : i32
    %c0_i32_1 = arith.constant 0 : i32
    return %arg0, %c0_i32, %c0_i32_0 : i32, i32, i32
  }
  func.func @transform_1(%arg0: i32) -> (i32, i32) {
    %c0_i32 = arith.constant 0 : i32
    %c0_i32_0 = arith.constant 0 : i32
    %c0_i32_1 = arith.constant 0 : i32
    return %c0_i32, %c0_i32_0 : i32, i32
  }
  func.func @transform_2(%arg0: i32) -> (i32, i32) {
    %c0_i32 = arith.constant 0 : i32
    %c0_i32_0 = arith.constant 0 : i32
    %c0_i32_1 = arith.constant 0 : i32
    return %c0_i32, %c0_i32_0 : i32, i32
  }
  func.func @transform_3(%arg0: i32) -> (i32, i32) {
    %c0_i32 = arith.constant 0 : i32
    %c0_i32_0 = arith.constant 0 : i32
    %c0_i32_1 = arith.constant 0 : i32
    return %c0_i32, %c0_i32_0 : i32, i32
  }
  func.func @transform_4(%arg0: i32) -> (i32, i32) {
    %c0_i32 = arith.constant 0 : i32
    %c0_i32_0 = arith.constant 0 : i32
    %c0_i32_1 = arith.constant 0 : i32
    return %c0_i32, %c0_i32_0 : i32, i32
  }
  func.func @transform_5(%arg0: i32) -> (i32, i32, i32) {
    %c0_i32 = arith.constant 0 : i32
    %c0_i32_0 = arith.constant 0 : i32
    %c0_i32_1 = arith.constant 0 : i32
    %c0_i32_2 = arith.constant 0 : i32
    return %c0_i32, %c0_i32_0, %c0_i32_1 : i32, i32, i32
  }
  func.func @transform_6(%arg0: i32) -> (i32, i32, i32) {
    %c0_i32 = arith.constant 0 : i32
    %c0_i32_0 = arith.constant 0 : i32
    %c0_i32_1 = arith.constant 0 : i32
    %c0_i32_2 = arith.constant 0 : i32
    return %c0_i32, %c0_i32_0, %c0_i32_1 : i32, i32, i32
  }
  func.func @transform_7(%arg0: i32) -> (i32, i32, i32) {
    %c0_i32 = arith.constant 0 : i32
    %c0_i32_0 = arith.constant 0 : i32
    %c0_i32_1 = arith.constant 0 : i32
    %c0_i32_2 = arith.constant 0 : i32
    return %c0_i32, %c0_i32_0, %c0_i32_1 : i32, i32, i32
  }
  func.func @transform_8(%arg0: i32) -> (i32, i32, i32) {
    %c0_i32 = arith.constant 0 : i32
    %c0_i32_0 = arith.constant 0 : i32
    %c0_i32_1 = arith.constant 0 : i32
    %c0_i32_2 = arith.constant 0 : i32
    return %c0_i32, %c0_i32_0, %c0_i32_1 : i32, i32, i32
  }
  func.func @transform_9(%arg0: i32) -> (i32, i32, i32) {
    %c0_i32 = arith.constant 0 : i32
    %c0_i32_0 = arith.constant 0 : i32
    %c0_i32_1 = arith.constant 0 : i32
    %c0_i32_2 = arith.constant 0 : i32
    return %c0_i32, %c0_i32_0, %c0_i32_1 : i32, i32, i32
  }
  func.func @transform_10(%arg0: i32) -> (i32, i32, i32) {
    %c0_i32 = arith.constant 0 : i32
    %c0_i32_0 = arith.constant 0 : i32
    %c0_i32_1 = arith.constant 0 : i32
    %c0_i32_2 = arith.constant 0 : i32
    return %c0_i32, %c0_i32_0, %c0_i32_1 : i32, i32, i32
  }
  func.func @transform_11(%arg0: i32) -> (i32, i32, i32) {
    %c0_i32 = arith.constant 0 : i32
    %c0_i32_0 = arith.constant 0 : i32
    %c0_i32_1 = arith.constant 0 : i32
    %c0_i32_2 = arith.constant 0 : i32
    return %c0_i32, %c0_i32_0, %c0_i32_1 : i32, i32, i32
  }
  func.func @transform_12(%arg0: i32) -> (i32, i32) {
    %c0_i32 = arith.constant 0 : i32
    %c0_i32_0 = arith.constant 0 : i32
    %c0_i32_1 = arith.constant 0 : i32
    return %c0_i32, %c0_i32_0 : i32, i32
  }
  func.func @transform_13(%arg0: i32) -> (i32, i32) {
    %c0_i32 = arith.constant 0 : i32
    %c0_i32_0 = arith.constant 0 : i32
    %c0_i32_1 = arith.constant 0 : i32
    return %c0_i32, %c0_i32_0 : i32, i32
  }
  func.func @transform_14(%arg0: i32) -> (i32, i32) {
    %c0_i32 = arith.constant 0 : i32
    %c0_i32_0 = arith.constant 0 : i32
    %c0_i32_1 = arith.constant 0 : i32
    return %c0_i32, %c0_i32_0 : i32, i32
  }
  func.func @transform_15(%arg0: i32) -> (i32, i32) {
    %c0_i32 = arith.constant 0 : i32
    %c0_i32_0 = arith.constant 0 : i32
    %c0_i32_1 = arith.constant 0 : i32
    return %c0_i32, %c0_i32_0 : i32, i32
  }
  func.func @transform_16(%arg0: i32) -> (i32, i32) {
    %c0_i32 = arith.constant 0 : i32
    %c0_i32_0 = arith.constant 0 : i32
    %c0_i32_1 = arith.constant 0 : i32
    return %c0_i32, %c0_i32_0 : i32, i32
  }
  func.func @transform_17(%arg0: i32) -> (i32, i32) {
    %c0_i32 = arith.constant 0 : i32
    %c0_i32_0 = arith.constant 0 : i32
    %c0_i32_1 = arith.constant 0 : i32
    return %c0_i32, %c0_i32_0 : i32, i32
  }
  func.func @transform_18(%arg0: i32) -> (i32, i32) {
    %c0_i32 = arith.constant 0 : i32
    %c0_i32_0 = arith.constant 0 : i32
    %c0_i32_1 = arith.constant 0 : i32
    return %c0_i32, %c0_i32_0 : i32, i32
  }
  func.func @transform_19(%arg0: i32) -> (i32, i32) {
    %c0_i32 = arith.constant 0 : i32
    %c0_i32_0 = arith.constant 0 : i32
    %c0_i32_1 = arith.constant 0 : i32
    return %c0_i32, %c0_i32_0 : i32, i32
  }
  func.func @transform_20(%arg0: i32) -> (i32, i32) {
    %c0_i32 = arith.constant 0 : i32
    %c0_i32_0 = arith.constant 0 : i32
    %c0_i32_1 = arith.constant 0 : i32
    return %c0_i32, %c0_i32_0 : i32, i32
  }
  func.func @transform_21(%arg0: i32) -> (i32, i32, i32) {
    %c0_i32 = arith.constant 0 : i32
    %c0_i32_0 = arith.constant 0 : i32
    %c0_i32_1 = arith.constant 0 : i32
    %c0_i32_2 = arith.constant 0 : i32
    return %c0_i32, %c0_i32_0, %c0_i32_1 : i32, i32, i32
  }
  func.func @transform_22(%arg0: i32) -> (i32, i32, i32) {
    %c0_i32 = arith.constant 0 : i32
    %c0_i32_0 = arith.constant 0 : i32
    %c0_i32_1 = arith.constant 0 : i32
    %c0_i32_2 = arith.constant 0 : i32
    return %c0_i32, %c0_i32_0, %c0_i32_1 : i32, i32, i32
  }
  func.func @transform_23(%arg0: i32) -> (i32, i32, i32) {
    %c0_i32 = arith.constant 0 : i32
    %c0_i32_0 = arith.constant 0 : i32
    %c0_i32_1 = arith.constant 0 : i32
    %c0_i32_2 = arith.constant 0 : i32
    return %c0_i32, %c0_i32_0, %c0_i32_1 : i32, i32, i32
  }
  func.func @transform_24(%arg0: i32) -> (i32, i32, i32) {
    %c0_i32 = arith.constant 0 : i32
    %c0_i32_0 = arith.constant 0 : i32
    %c0_i32_1 = arith.constant 0 : i32
    %c0_i32_2 = arith.constant 0 : i32
    return %c0_i32, %c0_i32_0, %c0_i32_1 : i32, i32, i32
  }
  func.func @transform_25(%arg0: i32) -> (i32, i32, i32) {
    %c0_i32 = arith.constant 0 : i32
    %c0_i32_0 = arith.constant 0 : i32
    %c0_i32_1 = arith.constant 0 : i32
    %c0_i32_2 = arith.constant 0 : i32
    return %c0_i32, %c0_i32_0, %c0_i32_1 : i32, i32, i32
  }
  func.func @transform_26(%arg0: i32) -> (i32, i32, i32) {
    %c0_i32 = arith.constant 0 : i32
    %c0_i32_0 = arith.constant 0 : i32
    %c0_i32_1 = arith.constant 0 : i32
    %c0_i32_2 = arith.constant 0 : i32
    return %c0_i32, %c0_i32_0, %c0_i32_1 : i32, i32, i32
  }
  func.func @transform_27(%arg0: i32) -> (i32, i32, i32) {
    %c0_i32 = arith.constant 0 : i32
    %c0_i32_0 = arith.constant 0 : i32
    %c0_i32_1 = arith.constant 0 : i32
    %c0_i32_2 = arith.constant 0 : i32
    return %c0_i32, %c0_i32_0, %c0_i32_1 : i32, i32, i32
  }
  func.func @transform_28(%arg0: i32) -> (i32, i32) {
    %c0_i32 = arith.constant 0 : i32
    %c0_i32_0 = arith.constant 0 : i32
    %c0_i32_1 = arith.constant 0 : i32
    return %c0_i32, %c0_i32_0 : i32, i32
  }
  func.func @transform_29(%arg0: i32) -> (i32, i32) {
    %c0_i32 = arith.constant 0 : i32
    %c0_i32_0 = arith.constant 0 : i32
    %c0_i32_1 = arith.constant 0 : i32
    return %c0_i32, %c0_i32_0 : i32, i32
  }
  func.func @transform_30(%arg0: i32) -> (i32, i32) {
    %c0_i32 = arith.constant 0 : i32
    %c0_i32_0 = arith.constant 0 : i32
    %c0_i32_1 = arith.constant 0 : i32
    return %c0_i32, %c0_i32_0 : i32, i32
  }
  func.func @transform_31(%arg0: i32) -> (i32, i32) {
    %c0_i32 = arith.constant 0 : i32
    %c0_i32_0 = arith.constant 0 : i32
    %c0_i32_1 = arith.constant 0 : i32
    return %c0_i32, %c0_i32_0 : i32, i32
  }
  func.func @transform_32(%arg0: i32) -> (i32, i32) {
    %c0_i32 = arith.constant 0 : i32
    %c0_i32_0 = arith.constant 0 : i32
    %c0_i32_1 = arith.constant 0 : i32
    return %c0_i32, %c0_i32_0 : i32, i32
  }
  func.func @transform_33(%arg0: i32) -> (i32, i32) {
    %c0_i32 = arith.constant 0 : i32
    %c0_i32_0 = arith.constant 0 : i32
    %c0_i32_1 = arith.constant 0 : i32
    return %c0_i32, %c0_i32_0 : i32, i32
  }
  func.func @transform_34(%arg0: i32) -> (i32, i32) {
    %c0_i32 = arith.constant 0 : i32
    %c0_i32_0 = arith.constant 0 : i32
    %c0_i32_1 = arith.constant 0 : i32
    return %c0_i32, %c0_i32_0 : i32, i32
  }
  func.func @transform_35(%arg0: i32) -> (i32, i32) {
    %c0_i32 = arith.constant 0 : i32
    %c0_i32_0 = arith.constant 0 : i32
    %c0_i32_1 = arith.constant 0 : i32
    return %c0_i32, %c0_i32_0 : i32, i32
  }
  func.func @transform_36(%arg0: i32) -> (i32, i32) {
    %c0_i32 = arith.constant 0 : i32
    %c0_i32_0 = arith.constant 0 : i32
    %c0_i32_1 = arith.constant 0 : i32
    return %c0_i32, %c0_i32_0 : i32, i32
  }
  func.func @transform_37(%arg0: i32) -> (i32, i32) {
    %c0_i32 = arith.constant 0 : i32
    %c0_i32_0 = arith.constant 0 : i32
    %c0_i32_1 = arith.constant 0 : i32
    return %c0_i32, %c0_i32_0 : i32, i32
  }
  func.func @transform_38(%arg0: i32) -> (i32, i32) {
    %c0_i32 = arith.constant 0 : i32
    %c0_i32_0 = arith.constant 0 : i32
    %c0_i32_1 = arith.constant 0 : i32
    return %c0_i32, %c0_i32_0 : i32, i32
  }
  func.func @transform_39(%arg0: i32) -> (i32, i32, i32) {
    %c0_i32 = arith.constant 0 : i32
    %c0_i32_0 = arith.constant 0 : i32
    %c0_i32_1 = arith.constant 0 : i32
    return %arg0, %c0_i32, %c0_i32_0 : i32, i32, i32
  }
}

</mosaic_0001>

<bundles_post_ra>
// kernel: vit_forward.1
= control target key start
LH: loop header
LB: loop body
LE: loop exit
PB: predicated region body
PF: predicated region fallthrough
CT: control target
= control target key end

     0   :  { %s4438_s6 = smov 1   ;;  %s4439_s10 = smov 2   ;;  %s5398_s0 = inlined_call_operand.smem [shape: u32[40], index: -1, kind: input, shape index: {}] }
   0x1   :  { %s4488_s5 = sld [smem:[%s5398_s0]]   ;;  %s4440_s14 = smov 3  }
   0x2   :  { %s4493_s9 = sld [smem:[%s5398_s0 + %s4438_s6]]   ;;  %s4441_s18 = smov 4  }
   0x3   :  { %s4498_s13 = sld [smem:[%s5398_s0 + %s4439_s10]]   ;;  %s4442_s22 = smov 5  }
   0x4   :  { %s4503_s17 = sld [smem:[%s5398_s0 + %s4440_s14]]   ;;  %s4443_s26 = smov 6  }
   0x5   :  { %s4508_s21 = sld [smem:[%s5398_s0 + %s4441_s18]]   ;;  %s4444_s30 = smov 7  }
   0x6   :  { %s4513_s25 = sld [smem:[%s5398_s0 + %s4442_s22]]   ;;  %s4445_s4 = smov 8  }
   0x7   :  { %s4518_s29 = sld [smem:[%s5398_s0 + %s4443_s26]]   ;;  %s4446_s10 = smov 9  }
   0x8   :  { %s4523_s3 = sld [smem:[%s5398_s0 + %s4444_s30]]   ;;  %s4447_s15 = smov 10  }
   0x9   :  { %s4528_s8 = sld [smem:[%s5398_s0 + %s4445_s4]]   ;;  %s4448_s20 = smov 11  }
   0xa   :  { %s4533_s14 = sld [smem:[%s5398_s0 + %s4446_s10]]   ;;  %s4449_s26 = smov 12  }
   0xb   :  { %s4538_s19 = sld [smem:[%s5398_s0 + %s4447_s15]]   ;;  %s4450_s1 = smov 13  }
   0xc   :  { %s4543_s24 = sld [smem:[%s5398_s0 + %s4448_s20]]   ;;  %s4451_s7 = smov 14  }
   0xd   :  { %s4548_s30 = sld [smem:[%s5398_s0 + %s4449_s26]]   ;;  %s4452_s15 = smov 15  }
   0xe   :  { %s4553_s6 = sld [smem:[%s5398_s0 + %s4450_s1]]   ;;  %s4453_s22 = smov 16  }
   0xf   :  { %s4558_s12 = sld [smem:[%s5398_s0 + %s4451_s7]]   ;;  %s4454_s28 = smov 17  }
  0x10   :  { %s4563_s20 = sld [smem:[%s5398_s0 + %s4452_s15]]   ;;  %s4455_s7 = smov 18  }
  0x11   :  { %s4568_s27 = sld [smem:[%s5398_s0 + %s4453_s22]]   ;;  %s4456_s15 = smov 19  }
  0x12   :  { %s4573_s4 = sld [smem:[%s5398_s0 + %s4454_s28]]   ;;  %s4457_s22 = smov 20  }
  0x13   :  { %s4458_s28 = smov 21  }
  0x14   :  { %5411 = sst [smem:[#allocation2_spill]] %s4553_s6 }
  0x15   :  { %5412 = sst [smem:[#allocation3_spill]] %s4558_s12 }
  0x16   :  { %s4578_s12 = sld [smem:[%s5398_s0 + %s4455_s7]]   ;;  %s4459_s7 = smov 22  }
  0x17   :  { %5413 = sst [smem:[#allocation4_spill]] %s4568_s27 }
  0x18   :  { %5414 = sst [smem:[#allocation5_spill]] %s4573_s4 }
  0x19   :  { %s4583_s6 = sld [smem:[%s5398_s0 + %s4456_s15]]   ;;  %s4460_s15 = smov 23  }
  0x1a   :  { %s4588_s27 = sld [smem:[%s5398_s0 + %s4457_s22]]   ;;  %s4461_s22 = smov 24  }
  0x1b   :  { %s4593_s4 = sld [smem:[%s5398_s0 + %s4458_s28]]   ;;  %s4462_s28 = smov 25  }
  0x1c   :  { %5415 = sst [smem:[#allocation6_spill]] %s4578_s12 }
  0x1d   :  { %s4598_s12 = sld [smem:[%s5398_s0 + %s4459_s7]]   ;;  %s4463_s7 = smov 26  }
  0x1f   :  { %5416 = sst [smem:[#allocation7_spill]] %s4583_s6 }
  0x20   :  { %5417 = sst [smem:[#allocation8_spill]] %s4588_s27 }
  0x21   :  { %5418 = sst [smem:[#allocation9_spill]] %s4593_s4 }
  0x22   :  { %s4603_s6 = sld [smem:[%s5398_s0 + %s4460_s15]]   ;;  %s4464_s15 = smov 27  }
  0x23   :  { %5419 = sst [smem:[#allocation10_spill]] %s4598_s12 }
  0x24   :  { %s4608_s27 = sld [smem:[%s5398_s0 + %s4461_s22]]   ;;  %s4465_s22 = smov 28  }
  0x25   :  { %s4613_s4 = sld [smem:[%s5398_s0 + %s4462_s28]]   ;;  %s4466_s28 = smov 29  }
  0x26   :  { %s4618_s12 = sld [smem:[%s5398_s0 + %s4463_s7]]   ;;  %s4467_s7 = smov 30  }
  0x28   :  { %5420 = sst [smem:[#allocation11_spill]] %s4603_s6 }
  0x29   :  { %s4623_s6 = sld [smem:[%s5398_s0 + %s4464_s15]]   ;;  %s4468_s15 = smov 31  }
  0x2a   :  { %5421 = sst [smem:[#allocation12_spill]] %s4608_s27 }
  0x2b   :  { %5422 = sst [smem:[#allocation13_spill]] %s4613_s4 }
  0x2c   :  { %5423 = sst [smem:[#allocation14_spill]] %s4618_s12 }
  0x2d   :  { %s4628_s27 = sld [smem:[%s5398_s0 + %s4465_s22]]   ;;  %s4469_s22 = smov 32  }
  0x2e   :  { %s4633_s4 = sld [smem:[%s5398_s0 + %s4466_s28]]   ;;  %s4470_s28 = smov 33  }
  0x2f   :  { %5424 = sst [smem:[#allocation15_spill]] %s4623_s6 }
  0x30   :  { %s4638_s12 = sld [smem:[%s5398_s0 + %s4467_s7]]   ;;  %s4471_s7 = smov 34  }
  0x31   :  { %s4643_s6 = sld [smem:[%s5398_s0 + %s4468_s15]]   ;;  %s4472_s15 = smov 35  }
  0x33   :  { %5425 = sst [smem:[#allocation16_spill]] %s4628_s27 }
  0x34   :  { %5426 = sst [smem:[#allocation17_spill]] %s4633_s4 }
  0x35   :  { %s4648_s27 = sld [smem:[%s5398_s0 + %s4469_s22]]   ;;  %s4473_s22 = smov 36  }
  0x36   :  { %5427 = sst [smem:[#allocation18_spill]] %s4638_s12 }
  0x37   :  { %5428 = sst [smem:[#allocation19_spill]] %s4643_s6 }
  0x38   :  { %s4653_s4 = sld [smem:[%s5398_s0 + %s4470_s28]]   ;;  %s4474_s28 = smov 37  }
  0x39   :  { %s4658_s12 = sld [smem:[%s5398_s0 + %s4471_s7]]   ;;  %s4475_s7 = smov 38  }
  0x3a   :  { %s4663_s6 = sld [smem:[%s5398_s0 + %s4472_s15]]   ;;  %s4476_s15 = smov 39  }
  0x3b   :  { %5429 = sst [smem:[#allocation20_spill]] %s4648_s27 }
  0x3c   :  { %s4668_s27 = sld [smem:[%s5398_s0 + %s4473_s22]]   ;;  %s4685_s22 = smov 0  }
  0x3e   :  { %5430 = sst [smem:[#allocation21_spill]] %s4653_s4 }
  0x3f   :  { %5431 = sst [smem:[#allocation22_spill]] %s4658_s12 }
  0x40   :  { %5432 = sst [smem:[#allocation23_spill]] %s4663_s6 }
  0x41   :  { %s4673_s4 = sld [smem:[%s5398_s0 + %s4474_s28]]  }
  0x42   :  { %s4678_s12 = sld [smem:[%s5398_s0 + %s4475_s7]]  }
  0x43   :  { %s4683_s6 = sld [smem:[%s5398_s0 + %s4476_s15]]  }
  0x44 LB: > { %s3951_s23 = sadd.s32 4294967295, %s4436_s22   ;;  %p3955_p0 = scmp.ge.s32.totalorder %s4436_s22, 1  ;;  %s4436_s22 = sphi %s4685_s22, %s89_s22  }
  0x45   : > { %p1077_p1 = scmp.lt.s32.totalorder %s4436_s22, 3 }
  0x47   : > { %p1078_p2 = pnand %p3955_p0, %p1077_p1 }
  0x48   : > { %p1172_p3 = scmp.lt.s32.totalorder (!%p1078_p2), %s3951_s23, 1  ;;  %s5433_s28 = sld [smem:[#allocation5_spill]] (!%p1078_p2) }
  0x49   : > { %1081 = sbr.rel (%p1078_p2) target bundleno = 6082 (0x17c2), region = 176  ;;  %s5434_s1 = sld [smem:[#allocation2_spill]] (!%p1078_p2) }
  0x4a   : > { %s5435_s2 = sld [smem:[#allocation3_spill]] (!%p1078_p2) }
  0x4b   : > { %s5436_s7 = sld [smem:[#allocation4_spill]] (!%p1078_p2) }
  0x4c   : > { %s5437_s10 = sld [smem:[#allocation6_spill]] (!%p1078_p2) }
  0x4d   : > { %s5438_s11 = sld [smem:[#allocation12_spill]] (!%p1078_p2) }
  0x4e   : > { %v1189_v0 = vld [vmem:[%s4493_s9 + $0x28] sm:$0xff]  ;;  %v1188_v1 = vld [vmem:[%s4493_s9 + $0x20] sm:$0xff]  ;;  %v1187_v2 = vld [vmem:[%s4493_s9 + $0x18] sm:$0xff]  ;;  %s5456_s23 = smov (!%p1172_p3, %s3951_s23), 1  ;;  %vm1193_vm0 = vcmask 392192   ;;  %vm1235_vm1 = vcmask 261120  }
  0x4f   : > { %1213 = vmatpush.msra.mxu0 %v1189_v0  ;;  %4200 = vmatpush.msra.mxu2 %v1189_v0  ;;  %v1186_v3 = vld [vmem:[%s4493_s9 + $0x10] sm:$0xff]  ;;  %v1185_v4 = vld [vmem:[%s4493_s9 + $0x8] sm:$0xff]  ;;  %s4207_s0 = smul.u32 24, %s5456_s23  ;;  %v1184_v5 = vld [vmem:[%s4493_s9] sm:$0xff]  ;;  %v4477_v21 = vmov 32.0   ;;  %vm1432_vm12 = vcmask 64512  }
  0x50   : > { %v1190_v9 = vld [vmem:[%s4498_s13] sm:$0xff]  ;;  %v1192_v14 = vld [vmem:[%s4498_s13 + $0x10] sm:$0xff]  ;;  %v1191_v18 = vld [vmem:[%s4498_s13 + $0x8] sm:$0xff]  ;;  %4294 = vrcp.f32 %v4477_v21  ;;  %vm1468_vm14 = vcmask 195584   ;;  %s5439_s15 = sld [smem:[#allocation9_spill]] }
  0x51   : > { %1214 = vmatpush.msra.mxu0 %v1188_v1  ;;  %4201 = vmatpush.msra.mxu2 %v1188_v1  ;;  %s1176_s26 = scalar_lea.vmem %s4488_s5, %s4207_s0  ;;  %v1328_v46 = vld [vmem:[%s4513_s25 + $0x18] sm:$0xff]  ;;  %v1327_v49 = vld [vmem:[%s4513_s25 + $0x10] sm:$0xff]  ;;  %v1326_v54 = vld [vmem:[%s4513_s25 + $0x8] sm:$0xff]  ;;  %s5440_s16 = sld [smem:[#allocation13_spill]] }
  0x52   : > { %v1181_v6 = vld [vmem:[%s1176_s26] sm:$0xff]  ;;  %v1182_v7 = vld [vmem:[%s1176_s26 + $0x8] sm:$0xff]  ;;  %v1183_v8 = vld [vmem:[%s1176_s26 + $0x10] sm:$0xff]  ;;  %1354 = vmatpush.msra.mxu1 %v1328_v46  ;;  %s5441_s18 = sld [smem:[#allocation7_spill]] }
  0x53   : > { %1215 = vmatpush.msra.mxu0 %v1187_v2  ;;  %4202 = vmatpush.msra.mxu2 %v1187_v2  ;;  %v1401_v47 = vld [vmem:[%s4533_s14 + $0x18] sm:$0xff]  ;;  %v1400_v50 = vld [vmem:[%s4533_s14 + $0x10] sm:$0xff]  ;;  %v1399_v55 = vld [vmem:[%s4533_s14 + $0x8] sm:$0xff]  ;;  %s5442_s0 = sld [smem:[#allocation8_spill]] }
  0x54   : > { %v3983_v48 = vld [vmem:[%s4513_s25 + $0x38] sm:$0xff]  ;;  %1418 = vmatpush.msra.mxu3 %v1401_v47  ;;  %v3982_v51 = vld [vmem:[%s4513_s25 + $0x30] sm:$0xff]  ;;  %1355 = vmatpush.msra.mxu1 %v1327_v49  ;;  %v3981_v56 = vld [vmem:[%s4513_s25 + $0x28] sm:$0xff]  ;;  %s5443_s26 = sld [smem:[#allocation11_spill]] }
  0x55   : > { %1216 = vmatpush.msra.mxu0 %v1186_v3  ;;  %4203 = vmatpush.msra.mxu2 %v1186_v3  ;;  %v1325_v59 = vld [vmem:[%s4513_s25] sm:$0xff] }
  0x56   : > { %v4295_v22 = vpop.eup %4294  ;;  %1419 = vmatpush.msra.mxu3 %v1400_v50  ;;  %1356 = vmatpush.msra.mxu1 %v1326_v54  ;;  %v1398_v60 = vld [vmem:[%s4533_s14] sm:$0xff] }
  0x57   : > { %1217 = vmatpush.msra.mxu0 %v1185_v4  ;;  %4204 = vmatpush.msra.mxu2 %v1185_v4  ;;  %v1246_v23 = vmul.f32 32.0, %v4295_v22  ;;  %vm1250_vm2 = vweird.f32 %v4295_v22  ;;  %v3980_v61 = vld [vmem:[%s4513_s25 + $0x20] sm:$0xff] }
  0x58   : > { %1420 = vmatpush.msra.mxu3 %v1399_v55  ;;  %1357 = vmatpush.msra.mxu1 %v1325_v59  ;;  %v3994_v59 = vld [vmem:[%s4533_s14 + $0x20] sm:$0xff] }
  0x59   : > { %1218 = vmatpush.msra.mxu0 %v1184_v5  ;;  %4205 = vmatpush.msra.mxu2 %v1184_v5  ;;  %v1247_v24 = vsub.f32 1.0, %v1246_v23 }
  0x5a   : > { %3958 = vmatmul.msk.f32.vlgmr.msra.gmra.mxu0 %vm1193_vm0, %v1181_v6  ;;  %3959 = vmatmul.msk.f32.vlgmr.msra.gmra.mxu2 %vm1193_vm0, %v1182_v7 }
  0x5b   : > { %v1248_v25 = vmul.f32 %v4295_v22, %v1247_v24  ;;  %1598 = vmatpush.msrb.mxu0 %v3983_v48  ;;  %1421 = vmatpush.msra.mxu3 %v1398_v60 }
  0x5d   : > { %v1249_v26 = vadd.f32 %v4295_v22, %v1248_v25  ;;  %1599 = vmatpush.msrb.mxu0 %v3982_v51  ;;  %v1369_v25 = vld [vmem:[%s4528_s8] sm:$0xff]  ;;  %v3997_v51 = vld [vmem:[%s4533_s14 + $0x38] sm:$0xff] }
  0x5f   : > { %v4718_v27 = vsel %vm1250_vm2, %v4295_v22, %v1249_v26  ;;  %1600 = vmatpush.msrb.mxu0 %v3981_v56  ;;  %v3995_v56 = vld [vmem:[%s4533_s14 + $0x28] sm:$0xff] }
  0x61   : > { %1601 = vmatpush.msrb.mxu0 %v3980_v61  ;;  %v4015_v61 = vld [vmem:[%s4513_s25 + $0x58] sm:$0xff] }
  0x62   : > { %3960 = vmatmul.msk.f32.gmra.mxu2 %vm1193_vm0, %v1183_v8  ;;  %v4261_v8 = vld [vmem:[%s4503_s17] ss:$0 sm:$0xff] }
  0xd7   : > { %v1220_v10 = vpop.f32.mrf.mxu0 }
  0xd8   : > { %v4704_v11 = vadd.f32 %v1220_v10, %v1190_v9 }
  0xda   : > { %v1236_v12 = vsel %vm1235_vm1, %v4704_v11, 0.0 }
  0xdb   : > { %1237 = vadd.xlane.f32.xlu1 %v1236_v12  ;;  %v4262_v12 = vld [vmem:[%s4508_s21] ss:$0 sm:$0xff] }
  0xdd   : > { %v1223_v13 = vpop.f32.mrf.mxu2 }
  0xde   : > { %v4714_v19 = vadd.f32 %v1223_v13, %v1191_v18 }
  0xe0   : > { %v1239_v20 = vsel %vm1235_vm1, %v4714_v19, 0.0 }
  0xe5   : > { %v1226_v15 = vpop.f32.mrf.mxu2 }
  0xe6   : > { %v4709_v16 = vadd.f32 %v1226_v15, %v1192_v14 }
  0xe8   : > { %v1242_v17 = vsel %vm1235_vm1, %v4709_v16, 0.0 }
  0xe9   : > { %1243 = vadd.xlane.f32.xlu0 %v1242_v17 }
  0xf1   : > { %1240 = vadd.xlane.f32.xlu0 %v1239_v20 }
 0x14e   : > { %v1238_v33 = vpop.xlane.xlu1 %1237 }
 0x14f   : > { %v1252_v36 = vmul.f32 %v4718_v27, %v1238_v33 }
 0x151   : > { %v4735_v39 = vsub.f32 %v4704_v11, %v1252_v36 }
 0x153   : > { %v1258_v41 = vmul.f32 %v4735_v39, %v4735_v39 }
 0x155   : > { %v1261_v42 = vsel %vm1235_vm1, %v1258_v41, 0.0 }
 0x15c   : > { %v1244_v28 = vpop.xlane.xlu0 %1243 }
 0x15d   : > { %v1254_v29 = vmul.f32 %v4718_v27, %v1244_v28  ;;  %v4478_v28 = vmov 0  }
 0x15e   : > { %4258 = vset.pattern.permute.xlu0 %v4478_v28  ;;  %4259 = vset.pattern.permute.xlu1 %v4478_v28 }
 0x15f   : > { %v4722_v30 = vsub.f32 %v4709_v16, %v1254_v29  ;;  %1372 = vperm.xlu0 %4258, %v1369_v25   ;;  %4260 = vset.pattern.permute.xlu2 %v4478_v28 }
 0x161   : > { %v1260_v31 = vmul.f32 %v4722_v30, %v4722_v30 }
 0x163   : > { %v1267_v32 = vsel %vm1235_vm1, %v1260_v31, 0.0 }
 0x164   : > { %v1241_v34 = vpop.xlane.xlu0 %1240  ;;  %1268 = vadd.xlane.f32.xlu1 %v1267_v32 }
 0x165   : > { %v1253_v35 = vmul.f32 %v4718_v27, %v1241_v34 }
 0x167   : > { %v4730_v37 = vsub.f32 %v4714_v19, %v1253_v35 }
 0x169   : > { %v1259_v38 = vmul.f32 %v4730_v37, %v4730_v37 }
 0x16b   : > { %v1264_v40 = vsel %vm1235_vm1, %v1259_v38, 0.0  ;;  %v1368_v38 = vld [vmem:[%s4523_s3] sm:$0xff] }
 0x16c   : > { %1265 = vadd.xlane.f32.xlu2 %v1264_v40  ;;  %v4263_v40 = vld [vmem:[%s4518_s29] ss:$0 sm:$0xff] }
 0x174   : > { %1262 = vadd.xlane.f32.xlu2 %v1261_v42 }
 0x1d1   : > { %v1373_v42 = vpop.permute.xlu0 %1372 }
 0x1d7   : > { %v1269_v43 = vpop.xlane.xlu1 %1268 }
 0x1d8   : > { %v1272_v44 = vmul.f32 %v1269_v43, %v4718_v27 }
 0x1da   : > { %v1275_v45 = vadd.f32 1e-05, %v1272_v44 }
 0x1dc   : > { %4296 = vrsqrt.f32 %v1275_v45  ;;  %vm1302_vm4 = vweird.f32 %v1275_v45 }
 0x1df   : > { %v1266_v52 = vpop.xlane.xlu2 %1265 }
 0x1e0   : > { %v1271_v53 = vmul.f32 %v1266_v52, %v4718_v27  ;;  %v4265_v52 = vld [vmem:[%s4538_s19] ss:$0 sm:$0xff] }
 0x1e2   : > { %v4297_v57 = vpop.eup %4296  ;;  %v1274_v58 = vadd.f32 1e-05, %v1271_v53  ;;  %v3996_v53 = vld [vmem:[%s4533_s14 + $0x30] sm:$0xff] }
 0x1e3   : > { %v1297_v62 = vmul.f32 %v4297_v57, %v1275_v45  ;;  %vm1303_vm3 = vweird.f32 %v4297_v57 }
 0x1e4   : > { %4298 = vrsqrt.f32 %v1274_v58  ;;  %vm1304_vm5 = vmor %vm1302_vm4, %vm1303_vm3  ;;  %vm1292_vm7 = vweird.f32 %v1274_v58 }
 0x1e5   : > { %v1298_v63 = vmul.f32 %v4297_v57, %v1297_v62  ;;  %v4014_v62 = vld [vmem:[%s4513_s25 + $0x50] sm:$0xff] }
 0x1e7   : > { %v1299_v0 = vmul.f32 0.5, %v1298_v63  ;;  %v1263_v1 = vpop.xlane.xlu2 %1262  ;;  %v4013_v63 = vld [vmem:[%s4513_s25 + $0x48] sm:$0xff] }
 0x1e8   : > { %v1270_v2 = vmul.f32 %v1263_v1, %v4718_v27  ;;  %v1229_v1 = vlaneseq }
 0x1e9   : > { %v1300_v3 = vsub.f32 1.5, %v1299_v0  ;;  %v4012_v0 = vld [vmem:[%s4513_s25 + $0x40] sm:$0xff] }
 0x1ea   : > { %v4299_v4 = vpop.eup %4298  ;;  %v1273_v5 = vadd.f32 1e-05, %v1270_v2  ;;  %v1230_v2 = vand.u32 127, %v1229_v1 }
 0x1eb   : > { %v1301_v6 = vmul.f32 %v4297_v57, %v1300_v3  ;;  %v1287_v7 = vmul.f32 %v4299_v4, %v1274_v58  ;;  %vm1293_vm6 = vweird.f32 %v4299_v4  ;;  %v3988_v58 = vld [vmem:[%s4523_s3 + $0x8] sm:$0xff]  ;;  %v4479_v3 = vmov -1e+30  }
 0x1ec   : > { %4300 = vrsqrt.f32 %v1273_v5  ;;  %vm1294_vm8 = vmor %vm1292_vm7, %vm1293_vm6  ;;  %vm1282_vm10 = vweird.f32 %v1273_v5  ;;  %vm1231_vm13 = vcmp.lt.s32.totalorder %v1230_v2, 17 }
 0x1ed   : > { %v1305_v9 = vsel %vm1304_vm5, %v4297_v57, %v1301_v6  ;;  %v1288_v10 = vmul.f32 %v4299_v4, %v1287_v7 }
 0x1ee   : > { %v1308_v13 = vmul.f32 %v1305_v9, %v4722_v30 }
 0x1ef   : > { %v1289_v14 = vmul.f32 0.5, %v1288_v10 }
 0x1f0   : > { %v1314_v15 = vmul.f32 %v4261_v8, %v1308_v13  ;;  %v1537_v13 = vld [vmem:[%s4543_s24] sm:$0xff] }
 0x1f1   : > { %v1290_v17 = vsub.f32 1.5, %v1289_v14 }
 0x1f2   : > { %v4301_v18 = vpop.eup %4300  ;;  %v4759_v20 = vadd.f32 %v4262_v12, %v1314_v15 }
 0x1f3   : > { %v1291_v21 = vmul.f32 %v4299_v4, %v1290_v17  ;;  %v1277_v22 = vmul.f32 %v4301_v18, %v1273_v5  ;;  %vm1283_vm9 = vweird.f32 %v4301_v18 }
 0x1f4   : > { %3964 = vmatpush.xpose.msk.msrb.mxu2 %vm1235_vm1, %v4759_v20  ;;  %vm1284_vm11 = vmor %vm1282_vm10, %vm1283_vm9 }
 0x1f5   : > { %v1295_v23 = vsel %vm1294_vm8, %v4299_v4, %v1291_v21  ;;  %v1278_v24 = vmul.f32 %v4301_v18, %v1277_v22  ;;  %v4827_v4 = vsel %vm1231_vm13, 0.0, %v4479_v3  ;;  %v4266_v22 = vld [vmem:[%s4538_s19 + $0x1] ss:$0 sm:$0xff] }
 0x1f6   : > { %v1307_v26 = vmul.f32 %v1295_v23, %v4730_v37 }
 0x1f7   : > { %v1279_v29 = vmul.f32 0.5, %v1278_v24 }
 0x1f8   : > { %v1313_v30 = vmul.f32 %v4261_v8, %v1307_v26 }
 0x1f9   : > { %v1280_v31 = vsub.f32 1.5, %v1279_v29 }
 0x1fa   : > { %v4765_v32 = vadd.f32 %v4262_v12, %v1313_v30 }
 0x1fb   : > { %v1281_v33 = vmul.f32 %v4301_v18, %v1280_v31 }
 0x1fc   : > { %3965 = vmatpush.xpose.msk.msrb.mxu2 %vm1235_vm1, %v4765_v32 }
 0x1fd   : > { %v1285_v34 = vsel %vm1284_vm11, %v4301_v18, %v1281_v33 }
 0x1fe   : > { %v1306_v35 = vmul.f32 %v1285_v34, %v4735_v39 }
 0x200   : > { %v1312_v36 = vmul.f32 %v4261_v8, %v1306_v35 }
 0x202   : > { %v4770_v37 = vadd.f32 %v4262_v12, %v1312_v36 }
 0x204   : > { %3961 = vmatmul.msk.f32.vlgmr.msra.gmra.mxu1 %vm1235_vm1, %v4770_v37  ;;  %3966 = vmatpush.xpose.msk.msrb.mxu2 %vm1235_vm1, %v4770_v37 }
 0x205   : > { %3968 = vmatmul.msk.f32.vlgmr.msra.gmra.mxu3 %vm1235_vm1, %v4770_v37  ;;  %3985 = vmatmul.msk.f32.vlgmr.msrb.gmra.mxu0 %vm1235_vm1, %v4770_v37 }
 0x207   : > { %3967 = vmatmul.msk.f32.vlgmr.msrb.gmra.mxu2 %vm1235_vm1, %v1368_v38 }
 0x20c   : > { %3962 = vmatmul.msk.f32.gmra.mxu1 %vm1235_vm1, %v4765_v32 }
 0x20d   : > { %3969 = vmatmul.msk.f32.gmra.mxu3 %vm1235_vm1, %v4765_v32  ;;  %3986 = vmatmul.msk.f32.gmra.mxu0 %vm1235_vm1, %v4765_v32 }
 0x214   : > { %3963 = vmatmul.msk.f32.gmra.mxu1 %vm1235_vm1, %v4759_v20 }
 0x215   : > { %3970 = vmatmul.msk.f32.gmra.mxu3 %vm1235_vm1, %v4759_v20  ;;  %3987 = vmatmul.msk.f32.gmra.mxu0 %vm1235_vm1, %v4759_v20 }
 0x281   : > { %v1359_v39 = vpop.f32.mrf.mxu1 }
 0x282   : > { %v1360_v46 = vadd.f32 %v4263_v40, %v1359_v39 }
 0x288   : > { %v1423_v41 = vpop.f32.mrf.mxu3 }
 0x289   : > { %v1362_v43 = vpop.f32.mrf.mxu1  ;;  %v1424_v60 = vadd.f32 %v4265_v52, %v1423_v41 }
 0x28a   : > { %v1395_v44 = vpop.f32.mrf.mxu2  ;;  %v1363_v50 = vadd.f32 %v4263_v40, %v1362_v43 }
 0x28b   : > { %v1396_v45 = vadd.f32 %v1395_v44, %v1373_v42 }
 0x28d   : > { %1457 = vmatpush.msra.mxu2 %v1396_v45  ;;  %4206 = vmatpush.msrb.mxu3 %v1396_v45  ;;  %v3989_v45 = vld [vmem:[%s4528_s8 + $0x8] sm:$0xff] }
 0x28e   : > { %3971 = vmatmul.msk.f32.vlgmr.msra.gmra.mxu2 %vm1432_vm12, %v1360_v46 }
 0x28f   : > { %3990 = vmatpush.xpose.msk.msrb.mxu2 %vm1235_vm1, %v4759_v20  ;;  %1562 = vmatpush.msra.mxu3 %v1537_v13 }
 0x290   : > { %v1426_v47 = vpop.f32.mrf.mxu3 }
 0x291   : > { %v1365_v48 = vpop.f32.mrf.mxu1  ;;  %v1427_v57 = vadd.f32 %v4265_v52, %v1426_v47 }
 0x292   : > { %v1366_v49 = vadd.f32 %v4263_v40, %v1365_v48 }
 0x293   : > { %3991 = vmatpush.xpose.msk.msrb.mxu2 %vm1235_vm1, %v4765_v32 }
 0x294   : > { %3973 = vmatmul.msk.f32.vlgmr.msrb.gmra.mxu3 %vm1432_vm12, %v1366_v49 }
 0x296   : > { %3972 = vmatmul.msk.f32.gmra.mxu2 %vm1432_vm12, %v1363_v50 }
 0x297   : > { %3992 = vmatpush.xpose.msk.msrb.mxu2 %vm1235_vm1, %v4770_v37 }
 0x298   : > { %v1429_v54 = vpop.f32.mrf.mxu3 }
 0x299   : > { %v1430_v55 = vadd.f32 %v4265_v52, %v1429_v54 }
 0x29b   : > { %1666 = vmatpush.msra.mxu2 %v3997_v51  ;;  %1524 = vmatpush.msrb.mxu1 %v1430_v55  ;;  %v1603_v55 = vpop.f32.mrf.mxu0 }
 0x29d   : > { %1667 = vmatpush.msra.mxu2 %v3996_v53  ;;  %1525 = vmatpush.msrb.mxu1 %v1427_v57 }
 0x29e   : > { %3993 = vmatmul.msk.f32.vlgmr.msrb.gmra.mxu2 %vm1235_vm1, %v3988_v58 }
 0x29f   : > { %1668 = vmatpush.msra.mxu2 %v3995_v56  ;;  %1526 = vmatpush.msrb.mxu1 %v1424_v60  ;;  %v4264_v56 = vld [vmem:[%s4518_s29 + $0x1] ss:$0 sm:$0xff] }
 0x2a1   : > { %1669 = vmatpush.msra.mxu2 %v3994_v59  ;;  %v1604_v59 = vadd.f32 %v4264_v56, %v1603_v55  ;;  %v4008_v55 = vld [vmem:[%s4543_s24 + $0x8] sm:$0xff] }
 0x2a2   : > { %1809 = vmatpush.msra.mxu0 %v4008_v55 }
 0x2a3   : > { %1845 = vmatpush.msrb.mxu2 %v4015_v61  ;;  %v1606_v60 = vpop.f32.mrf.mxu0 }
 0x2a4   : > { %v1607_v61 = vadd.f32 %v4264_v56, %v1606_v60 }
 0x2a5   : > { %1846 = vmatpush.msrb.mxu2 %v4014_v62 }
 0x2a6   : > { %3999 = vmatmul.msk.f32.vlgmr.msra.gmra.mxu2 %vm1235_vm1, %v4770_v37 }
 0x2a7   : > { %1847 = vmatpush.msrb.mxu2 %v4013_v63 }
 0x2a9   : > { %1848 = vmatpush.msrb.mxu2 %v4012_v0 }
 0x2ab   : > { %v1609_v62 = vpop.f32.mrf.mxu0 }
 0x2ac   : > { %v1610_v63 = vadd.f32 %v4264_v56, %v1609_v62 }
 0x2ae   : > { %4000 = vmatmul.msk.f32.gmra.mxu2 %vm1235_vm1, %v4765_v32 }
 0x2b6   : > { %4001 = vmatmul.msk.f32.gmra.mxu2 %vm1235_vm1, %v4759_v20 }
 0x2be   : > { %4017 = vmatmul.msk.f32.vlgmr.msrb.gmra.mxu2 %vm1235_vm1, %v4770_v37 }
 0x2c6   : > { %4018 = vmatmul.msk.f32.gmra.mxu2 %vm1235_vm1, %v4765_v32 }
 0x2ce   : > { %4019 = vmatmul.msk.f32.gmra.mxu2 %vm1235_vm1, %v4759_v20 }
 0x311   : > { %v1459_v5 = vpop.f32.mrf.mxu2 }
 0x312   : > { %v1460_v6 = vadd.f32 %v1459_v5, %v4827_v4 }
 0x314   : > { %v1469_v7 = vsel %vm1468_vm14, %v1460_v6, -inf }
 0x315   : > { %1470 = vmax.xlane.f32.xlu1 %v1469_v7 }
 0x317   : > { %v1465_v8 = vpop.f32.mrf.mxu3 }
 0x318   : > { %v1466_v9 = vadd.f32 %v1465_v8, %v4827_v4 }
 0x319   : > { %v1462_v10 = vpop.f32.mrf.mxu2 }
 0x31a   : > { %v1463_v12 = vadd.f32 %v1462_v10, %v4827_v4  ;;  %v1475_v15 = vsel %vm1468_vm14, %v1466_v9, -inf }
 0x31c   : > { %v1472_v14 = vsel %vm1468_vm14, %v1463_v12, -inf }
 0x31d   : > { %1473 = vmax.xlane.f32.xlu2 %v1472_v14  ;;  %1476 = vmax.xlane.f32.xlu1 %v1475_v15  ;;  %v4053_v14 = vld [vmem:[%s4528_s8 + $0x18] sm:$0xff] }
 0x321   : > { %v1641_v17 = vpop.f32.mrf.mxu2 }
 0x329   : > { %v1671_v18 = vpop.f32.mrf.mxu2 }
 0x32a   : > { %v1672_v26 = vadd.f32 %v4266_v22, %v1671_v18 }
 0x331   : > { %v1674_v21 = vpop.f32.mrf.mxu2 }
 0x332   : > { %v1675_v25 = vadd.f32 %v4266_v22, %v1674_v21 }
 0x339   : > { %v1677_v23 = vpop.f32.mrf.mxu2 }
 0x33a   : > { %v1678_v24 = vadd.f32 %v4266_v22, %v1677_v23 }
 0x33c   : > { %1770 = vmatpush.msrb.mxu3 %v1678_v24 }
 0x33e   : > { %1771 = vmatpush.msrb.mxu3 %v1675_v25 }
 0x340   : > { %1772 = vmatpush.msrb.mxu3 %v1672_v26 }
 0x388   : > { %v1471_v28 = vpop.xlane.xlu1 %1470 }
 0x389   : > { %v1478_v29 = vsub.f32 %v1460_v6, %v1471_v28 }
 0x38b   : > { %v1481_v30 = vmul.f32 1.442695, %v1478_v29 }
 0x38d   : > { %4302 = vpow2.f32 %v1481_v30 }
 0x390   : > { %v1474_v31 = vpop.xlane.xlu2 %1473  ;;  %v1477_v33 = vpop.xlane.xlu1 %1476 }
 0x391   : > { %v1479_v34 = vsub.f32 %v1463_v12, %v1474_v31  ;;  %v1480_v35 = vsub.f32 %v1466_v9, %v1477_v33 }
 0x393   : > { %v4303_v36 = vpop.eup %4302  ;;  %v1483_v38 = vmul.f32 1.442695, %v1479_v34  ;;  %v1485_v39 = vmul.f32 1.442695, %v1480_v35  ;;  %v4020_v35 = vld [vmem:[%s4523_s3 + $0x10] sm:$0xff] }
 0x394   : > { %v1487_v40 = vsel %vm1468_vm14, %v4303_v36, 0.0 }
 0x395   : > { %4304 = vpow2.f32 %v1483_v38  ;;  %1488 = vadd.xlane.f32.xlu2 %v1487_v40  ;;  %v4028_v38 = vld [vmem:[%s4533_s14 + $0x50] sm:$0xff]  ;;  %v4026_v40 = vld [vmem:[%s4533_s14 + $0x40] sm:$0xff] }
 0x396   : > { %4306 = vpow2.f32 %v1485_v39  ;;  %v4027_v39 = vld [vmem:[%s4533_s14 + $0x48] sm:$0xff] }
 0x39b   : > { %v4305_v41 = vpop.eup %4304 }
 0x39c   : > { %v4307_v42 = vpop.eup %4306  ;;  %v1490_v43 = vsel %vm1468_vm14, %v4305_v41, 0.0 }
 0x39d   : > { %1491 = vadd.xlane.f32.xlu1 %v1490_v43  ;;  %v1493_v44 = vsel %vm1468_vm14, %v4307_v42, 0.0 }
 0x39e   : > { %1494 = vadd.xlane.f32.xlu2 %v1493_v44 }
 0x3b6   : > { %1618 = vperm.xlu1 %4259, %v3989_v45   ;;  %v4021_v45 = vld [vmem:[%s4528_s8 + $0x10] sm:$0xff] }
 0x408   : > { %v1489_v46 = vpop.xlane.xlu2 %1488 }
 0x409   : > { %4308 = vrcp.f32 %v1489_v46 }
 0x40f   : > { %v4309_v47 = vpop.eup %4308 }
 0x410   : > { %v1492_v48 = vpop.xlane.xlu1 %1491  ;;  %v1499_v49 = vmul.f32 %v4309_v47, %v4303_v36  ;;  %v4029_v36 = vld [vmem:[%s4533_s14 + $0x58] sm:$0xff] }
 0x411   : > { %4310 = vrcp.f32 %v1492_v48  ;;  %v1495_v50 = vpop.xlane.xlu2 %1494 }
 0x412   : > { %3974 = vmatmul.msk.f32.vlgmr.msrb.gmra.mxu1 %vm1468_vm14, %v1499_v49  ;;  %4312 = vrcp.f32 %v1495_v50  ;;  %v4047_v49 = vld [vmem:[%s4513_s25 + $0x78] sm:$0xff]  ;;  %v4046_v50 = vld [vmem:[%s4513_s25 + $0x70] sm:$0xff] }
 0x417   : > { %v4311_v51 = vpop.eup %4310 }
 0x418   : > { %v1500_v52 = vmul.f32 %v4311_v51, %v4305_v41  ;;  %v4313_v53 = vpop.eup %4312  ;;  %v4045_v51 = vld [vmem:[%s4513_s25 + $0x68] sm:$0xff] }
 0x419   : > { %v1501_v54 = vmul.f32 %v4313_v53, %v4307_v42 }
 0x41a   : > { %3975 = vmatmul.msk.f32.gmra.mxu1 %vm1468_vm14, %v1500_v52  ;;  %v4044_v52 = vld [vmem:[%s4513_s25 + $0x60] sm:$0xff] }
 0x422   : > { %3976 = vmatmul.msk.f32.gmra.mxu1 %vm1468_vm14, %v1501_v54 }
 0x428   : > { %v1619_v57 = vpop.permute.xlu1 %1618 }
 0x429   : > { %v1642_v58 = vadd.f32 %v1641_v17, %v1619_v57 }
 0x42b   : > { %1704 = vmatpush.msra.mxu1 %v1642_v58 }
 0x42c   : > { %4002 = vmatmul.msk.f32.vlgmr.msra.gmra.mxu1 %vm1432_vm12, %v1604_v59 }
 0x42d   : > { %4022 = vmatpush.xpose.msk.msrb.mxu1 %vm1235_vm1, %v4759_v20 }
 0x431   : > { %4023 = vmatpush.xpose.msk.msrb.mxu1 %vm1235_vm1, %v4765_v32 }
 0x434   : > { %4003 = vmatmul.msk.f32.gmra.mxu1 %vm1432_vm12, %v1607_v61 }
 0x435   : > { %4024 = vmatpush.xpose.msk.msrb.mxu1 %vm1235_vm1, %v4770_v37 }
 0x43c   : > { %4004 = vmatmul.msk.f32.gmra.mxu1 %vm1432_vm12, %v1610_v63 }
 0x444   : > { %4025 = vmatmul.msk.f32.vlgmr.msrb.gmra.mxu1 %vm1235_vm1, %v4020_v35 }
 0x48f   : > { %v1528_v0 = vpop.f32.mrf.mxu1 }
 0x490   : > { %3977 = vmatmul.msk.f32.vlgmr.msra.gmra.mxu3 %vm1432_vm12, %v1528_v0  ;;  %v1850_v0 = vpop.f32.mrf.mxu2 }
 0x491   : > { %1913 = vmatpush.msra.mxu3 %v4029_v36  ;;  %v4270_v36 = vld [vmem:[%s4518_s29 + $0x3] ss:$0 sm:$0xff] }
 0x493   : > { %1914 = vmatpush.msra.mxu3 %v4028_v38 }
 0x495   : > { %1915 = vmatpush.msra.mxu3 %v4027_v39 }
 0x497   : > { %v1531_v1 = vpop.f32.mrf.mxu1  ;;  %1916 = vmatpush.msra.mxu3 %v4026_v40 }
 0x498   : > { %3978 = vmatmul.msk.f32.gmra.mxu3 %vm1432_vm12, %v1531_v1 }
 0x49f   : > { %v1534_v2 = vpop.f32.mrf.mxu1 }
 0x4a0   : > { %3979 = vmatmul.msk.f32.gmra.mxu3 %vm1432_vm12, %v1534_v2  ;;  %v4267_v2 = vld [vmem:[%s4518_s29 + $0x2] ss:$0 sm:$0xff] }
 0x4a9   : > { %v1706_v3 = vpop.f32.mrf.mxu1 }
 0x4aa   : > { %v1707_v5 = vadd.f32 %v1706_v3, %v4827_v4  ;;  %v1851_v3 = vadd.f32 %v4267_v2, %v1850_v0 }
 0x4ac   : > { %v1715_v6 = vsel %vm1468_vm14, %v1707_v5, -inf }
 0x4ad   : > { %1716 = vmax.xlane.f32.xlu2 %v1715_v6  ;;  %v1853_v6 = vpop.f32.mrf.mxu2 }
 0x4b1   : > { %v1709_v7 = vpop.f32.mrf.mxu1 }
 0x4b2   : > { %v1710_v8 = vadd.f32 %v1709_v7, %v4827_v4  ;;  %v1854_v7 = vadd.f32 %v4267_v2, %v1853_v6 }
 0x4b4   : > { %v1718_v9 = vsel %vm1468_vm14, %v1710_v8, -inf }
 0x4b5   : > { %1719 = vmax.xlane.f32.xlu2 %v1718_v9  ;;  %v1856_v9 = vpop.f32.mrf.mxu2 }
 0x4b9   : > { %v1712_v10 = vpop.f32.mrf.mxu1 }
 0x4ba   : > { %v1713_v12 = vadd.f32 %v1712_v10, %v4827_v4  ;;  %v1857_v10 = vadd.f32 %v4267_v2, %v1856_v9 }
 0x4bc   : > { %v1721_v13 = vsel %vm1468_vm14, %v1713_v12, -inf }
 0x4bd   : > { %1722 = vmax.xlane.f32.xlu0 %v1721_v13 }
 0x4c1   : > { %v1888_v57 = vpop.f32.mrf.mxu1 }
 0x4d1   : > { %2112 = vperm.xlu0 %4258, %v4053_v14  }
 0x513   : > { %v4894_v59 = vpop.f32.mrf.mxu3 }
 0x51b   : > { %v4896_v60 = vpop.f32.mrf.mxu3 }
 0x520   : > { %v1717_v15 = vpop.xlane.xlu2 %1716 }
 0x521   : > { %v1724_v17 = vsub.f32 %v1707_v5, %v1717_v15 }
 0x523   : > { %v1727_v18 = vmul.f32 1.442695, %v1724_v17  ;;  %v4898_v61 = vpop.f32.mrf.mxu3 }
 0x525   : > { %4314 = vpow2.f32 %v1727_v18  ;;  %v4052_v18 = vld [vmem:[%s4523_s3 + $0x18] sm:$0xff] }
 0x528   : > { %v1720_v21 = vpop.xlane.xlu2 %1719 }
 0x529   : > { %v1725_v22 = vsub.f32 %v1710_v8, %v1720_v21 }
 0x52b   : > { %v4315_v23 = vpop.eup %4314  ;;  %v1729_v24 = vmul.f32 1.442695, %v1725_v22 }
 0x52c   : > { %v1733_v25 = vsel %vm1468_vm14, %v4315_v23, 0.0 }
 0x52d   : > { %4316 = vpow2.f32 %v1729_v24  ;;  %1734 = vadd.xlane.f32.xlu2 %v1733_v25 }
 0x530   : > { %v1723_v26 = vpop.xlane.xlu0 %1722 }
 0x531   : > { %v1726_v28 = vsub.f32 %v1713_v12, %v1723_v26  ;;  %v4269_v12 = vld [vmem:[%s4538_s19 + $0x2] ss:$0 sm:$0xff] }
 0x533   : > { %v4317_v29 = vpop.eup %4316  ;;  %v1731_v30 = vmul.f32 1.442695, %v1726_v28 }
 0x534   : > { %v1736_v31 = vsel %vm1468_vm14, %v4317_v29, 0.0 }
 0x535   : > { %4318 = vpow2.f32 %v1731_v30  ;;  %1737 = vadd.xlane.f32.xlu2 %v1736_v31 }
 0x53b   : > { %v4319_v33 = vpop.eup %4318 }
 0x53c   : > { %v1739_v34 = vsel %vm1468_vm14, %v4319_v33, 0.0 }
 0x53d   : > { %1740 = vadd.xlane.f32.xlu1 %v1739_v34 }
 0x543   : > { %v2113_v38 = vpop.permute.xlu0 %2112 }
 0x54d   : > { %1865 = vperm.xlu2 %4260, %v4021_v45  }
 0x5a0   : > { %v1735_v41 = vpop.xlane.xlu2 %1734 }
 0x5a1   : > { %4320 = vrcp.f32 %v1735_v41 }
 0x5a7   : > { %v4321_v42 = vpop.eup %4320 }
 0x5a8   : > { %v1745_v43 = vmul.f32 %v4321_v42, %v4315_v23  ;;  %v1738_v44 = vpop.xlane.xlu2 %1737 }
 0x5a9   : > { %4322 = vrcp.f32 %v1738_v44 }
 0x5aa   : > { %4005 = vmatmul.msk.f32.vlgmr.msrb.gmra.mxu3 %vm1468_vm14, %v1745_v43 }
 0x5ab   : > { %2092 = vmatpush.msrb.mxu3 %v4047_v49 }
 0x5ad   : > { %2093 = vmatpush.msrb.mxu3 %v4046_v50 }
 0x5af   : > { %v4323_v46 = vpop.eup %4322  ;;  %2094 = vmatpush.msrb.mxu3 %v4045_v51 }
 0x5b0   : > { %v1741_v47 = vpop.xlane.xlu1 %1740  ;;  %v1746_v48 = vmul.f32 %v4323_v46, %v4317_v29  ;;  %v1866_v56 = vpop.permute.xlu2 %1865 }
 0x5b1   : > { %4324 = vrcp.f32 %v1741_v47  ;;  %2095 = vmatpush.msrb.mxu3 %v4044_v52  ;;  %v1889_v58 = vadd.f32 %v1888_v57, %v1866_v56 }
 0x5b2   : > { %4006 = vmatmul.msk.f32.gmra.mxu3 %vm1468_vm14, %v1746_v48 }
 0x5b3   : > { %1951 = vmatpush.msrb.mxu0 %v1889_v58 }
 0x5b7   : > { %v4325_v53 = vpop.eup %4324 }
 0x5b8   : > { %v1747_v54 = vmul.f32 %v4325_v53, %v4319_v33 }
 0x5ba   : > { %4007 = vmatmul.msk.f32.gmra.mxu3 %vm1468_vm14, %v1747_v54 }
 0x5c2   : > { %4031 = vmatmul.msk.f32.vlgmr.msra.gmra.mxu3 %vm1235_vm1, %v4770_v37 }
 0x5ca   : > { %4032 = vmatmul.msk.f32.gmra.mxu3 %vm1235_vm1, %v4765_v32 }
 0x5d2   : > { %4033 = vmatmul.msk.f32.gmra.mxu3 %vm1235_vm1, %v4759_v20 }
 0x5da   : > { %4049 = vmatmul.msk.f32.vlgmr.msrb.gmra.mxu3 %vm1235_vm1, %v4770_v37 }
 0x5e2   : > { %4050 = vmatmul.msk.f32.gmra.mxu3 %vm1235_vm1, %v4765_v32 }
 0x5ea   : > { %4051 = vmatmul.msk.f32.gmra.mxu3 %vm1235_vm1, %v4759_v20 }
 0x62d   : > { %v1774_v62 = vpop.f32.mrf.mxu3 }
 0x62e   : > { %4009 = vmatmul.msk.f32.vlgmr.msra.gmra.mxu0 %vm1432_vm12, %v1774_v62 }
 0x62f   : > { %4054 = vmatpush.xpose.msk.msra.mxu0 %vm1235_vm1, %v4759_v20 }
 0x633   : > { %4055 = vmatpush.xpose.msk.msra.mxu0 %vm1235_vm1, %v4765_v32 }
 0x635   : > { %v1777_v63 = vpop.f32.mrf.mxu3 }
 0x636   : > { %4010 = vmatmul.msk.f32.gmra.mxu0 %vm1432_vm12, %v1777_v63 }
 0x637   : > { %4056 = vmatpush.xpose.msk.msra.mxu0 %vm1235_vm1, %v4770_v37 }
 0x63d   : > { %v1780_v1 = vpop.f32.mrf.mxu3 }
 0x63e   : > { %4011 = vmatmul.msk.f32.gmra.mxu0 %vm1432_vm12, %v1780_v1 }
 0x645   : > { %v1918_v5 = vpop.f32.mrf.mxu3 }
 0x646   : > { %4034 = vmatmul.msk.f32.vlgmr.msrb.gmra.mxu0 %vm1432_vm12, %v1851_v3  ;;  %v1919_v17 = vadd.f32 %v4269_v12, %v1918_v5 }
 0x64d   : > { %v1921_v8 = vpop.f32.mrf.mxu3 }
 0x64e   : > { %4035 = vmatmul.msk.f32.gmra.mxu0 %vm1432_vm12, %v1854_v7  ;;  %v1922_v15 = vadd.f32 %v4269_v12, %v1921_v8 }
 0x655   : > { %v1924_v13 = vpop.f32.mrf.mxu3 }
 0x656   : > { %v1925_v14 = vadd.f32 %v4269_v12, %v1924_v13  ;;  %4036 = vmatmul.msk.f32.gmra.mxu0 %vm1432_vm12, %v1857_v10  ;;  %v4061_v10 = vld [vmem:[%s4533_s14 + $0x78] sm:$0xff]  ;;  %v4060_v12 = vld [vmem:[%s4533_s14 + $0x70] sm:$0xff]  ;;  %v4059_v13 = vld [vmem:[%s4533_s14 + $0x68] sm:$0xff] }
 0x658   : > { %2017 = vmatpush.msra.mxu1 %v1925_v14  ;;  %v4058_v14 = vld [vmem:[%s4533_s14 + $0x60] sm:$0xff] }
 0x65a   : > { %2018 = vmatpush.msra.mxu1 %v1922_v15 }
 0x65c   : > { %2019 = vmatpush.msra.mxu1 %v1919_v17 }
 0x65d   : > { %v2097_v34 = vpop.f32.mrf.mxu3 }
 0x65e   : > { %4057 = vmatmul.msk.f32.vlgmr.msra.gmra.mxu0 %vm1235_vm1, %v4052_v18  ;;  %v2098_v41 = vadd.f32 %v4270_v36, %v2097_v34  ;;  %2160 = vmatpush.msrb.mxu1 %v4061_v10 }
 0x660   : > { %2161 = vmatpush.msrb.mxu1 %v4060_v12 }
 0x662   : > { %2162 = vmatpush.msrb.mxu1 %v4059_v13  ;;  %v4268_v13 = vld [vmem:[%s4548_s30] ss:$0 sm:$0xff] }
 0x664   : > { %2163 = vmatpush.msrb.mxu1 %v4058_v14  ;;  %v1573_v14 = vadd.f32 %v4268_v13, %v4894_v59  ;;  %v1575_v59 = vadd.f32 %v4268_v13, %v4898_v61 }
 0x665   : > { %v2100_v42 = vpop.f32.mrf.mxu3 }
 0x666   : > { %v2101_v43 = vadd.f32 %v4270_v36, %v2100_v42 }
 0x66d   : > { %v2103_v44 = vpop.f32.mrf.mxu3 }
 0x66e   : > { %v2104_v45 = vadd.f32 %v4270_v36, %v2103_v44 }
 0x6ab   : > { %v4916_v21 = vpop.f32.mrf.mxu0 }
 0x6b3   : > { %v4918_v22 = vpop.f32.mrf.mxu0 }
 0x6bb   : > { %v4920_v23 = vpop.f32.mrf.mxu0 }
 0x6c3   : > { %v1953_v24 = vpop.f32.mrf.mxu0 }
 0x6c4   : > { %v1954_v25 = vadd.f32 %v1953_v24, %v4827_v4 }
 0x6c6   : > { %v1962_v26 = vsel %vm1468_vm14, %v1954_v25, -inf }
 0x6c7   : > { %1963 = vmax.xlane.f32.xlu2 %v1962_v26 }
 0x6cb   : > { %v1956_v28 = vpop.f32.mrf.mxu0 }
 0x6cc   : > { %v1957_v29 = vadd.f32 %v1956_v28, %v4827_v4 }
 0x6ce   : > { %v1965_v30 = vsel %vm1468_vm14, %v1957_v29, -inf }
 0x6cf   : > { %1966 = vmax.xlane.f32.xlu1 %v1965_v30 }
 0x6d3   : > { %v1959_v31 = vpop.f32.mrf.mxu0 }
 0x6d4   : > { %v1960_v33 = vadd.f32 %v1959_v31, %v4827_v4 }
 0x6d6   : > { %v1968_v35 = vsel %vm1468_vm14, %v1960_v33, -inf }
 0x6d7   : > { %1969 = vmax.xlane.f32.xlu1 %v1968_v35 }
 0x6db   : > { %v2135_v39 = vpop.f32.mrf.mxu0 }
 0x6dc   : > { %v2136_v40 = vadd.f32 %v2135_v39, %v2113_v38 }
 0x6de   : > { %2198 = vmatpush.msrb.mxu0 %v2136_v40 }
 0x6df   : > { %4066 = vmatmul.msk.f32.vlgmr.msrb.gmra.mxu0 %vm1432_vm12, %v2098_v41 }
 0x6e7   : > { %4067 = vmatmul.msk.f32.gmra.mxu0 %vm1432_vm12, %v2101_v43 }
 0x6ef   : > { %4068 = vmatmul.msk.f32.gmra.mxu0 %vm1432_vm12, %v2104_v45 }
 0x73a   : > { %v1964_v46 = vpop.xlane.xlu2 %1963 }
 0x73b   : > { %v1971_v47 = vsub.f32 %v1954_v25, %v1964_v46 }
 0x73d   : > { %v1974_v48 = vmul.f32 1.442695, %v1971_v47  ;;  %v4040_v47 = vld [vmem:[%s4543_s24 + $0x10] sm:$0xff] }
 0x73e   : > { %2056 = vmatpush.msra.mxu2 %v4040_v47 }
 0x73f   : > { %4326 = vpow2.f32 %v1974_v48 }
 0x742   : > { %v1967_v49 = vpop.xlane.xlu1 %1966 }
 0x743   : > { %v1972_v50 = vsub.f32 %v1957_v29, %v1967_v49 }
 0x745   : > { %v4327_v51 = vpop.eup %4326  ;;  %v1976_v52 = vmul.f32 1.442695, %v1972_v50 }
 0x746   : > { %v1980_v53 = vsel %vm1468_vm14, %v4327_v51, 0.0 }
 0x747   : > { %4328 = vpow2.f32 %v1976_v52  ;;  %1981 = vadd.xlane.f32.xlu0 %v1980_v53 }
 0x74a   : > { %v1970_v54 = vpop.xlane.xlu1 %1969 }
 0x74b   : > { %v1973_v55 = vsub.f32 %v1960_v33, %v1970_v54 }
 0x74d   : > { %v4329_v56 = vpop.eup %4328  ;;  %v1978_v57 = vmul.f32 1.442695, %v1973_v55 }
 0x74e   : > { %v1983_v58 = vsel %vm1468_vm14, %v4329_v56, 0.0 }
 0x74f   : > { %4330 = vpow2.f32 %v1978_v57  ;;  %1984 = vadd.xlane.f32.xlu1 %v1983_v58 }
 0x755   : > { %v4331_v62 = vpop.eup %4330 }
 0x756   : > { %v1986_v63 = vsel %vm1468_vm14, %v4331_v62, 0.0 }
 0x757   : > { %1987 = vadd.xlane.f32.xlu1 %v1986_v63 }
 0x75c   : > { %v2200_v0 = vpop.f32.mrf.mxu0 }
 0x75d   : > { %v2201_v1 = vadd.f32 %v2200_v0, %v4827_v4 }
 0x75f   : > { %v2209_v2 = vsel %vm1468_vm14, %v2201_v1, -inf }
 0x760   : > { %2210 = vmax.xlane.f32.xlu2 %v2209_v2 }
 0x764   : > { %v2203_v3 = vpop.f32.mrf.mxu0 }
 0x765   : > { %v2204_v5 = vadd.f32 %v2203_v3, %v4827_v4 }
 0x767   : > { %v2212_v6 = vsel %vm1468_vm14, %v2204_v5, -inf }
 0x768   : > { %2213 = vmax.xlane.f32.xlu1 %v2212_v6 }
 0x76c   : > { %v2206_v7 = vpop.f32.mrf.mxu0 }
 0x76d   : > { %v2207_v8 = vadd.f32 %v2206_v7, %v4827_v4 }
 0x76f   : > { %v2215_v9 = vsel %vm1468_vm14, %v2207_v8, -inf }
 0x770   : > { %2216 = vmax.xlane.f32.xlu2 %v2215_v9 }
 0x7ba   : > { %v1982_v15 = vpop.xlane.xlu0 %1981 }
 0x7bb   : > { %4332 = vrcp.f32 %v1982_v15  ;;  %v1820_v15 = vadd.f32 %v4916_v21, %v1573_v14 }
 0x7c1   : > { %v4333_v17 = vpop.eup %4332 }
 0x7c2   : > { %v1992_v18 = vmul.f32 %v4333_v17, %v4327_v51  ;;  %v1985_v24 = vpop.xlane.xlu1 %1984 }
 0x7c3   : > { %4334 = vrcp.f32 %v1985_v24 }
 0x7c4   : > { %4037 = vmatmul.msk.f32.vlgmr.msra.gmra.mxu1 %vm1468_vm14, %v1992_v18 }
 0x7c9   : > { %v4335_v25 = vpop.eup %4334 }
 0x7ca   : > { %v1988_v26 = vpop.xlane.xlu1 %1987  ;;  %v1993_v28 = vmul.f32 %v4335_v25, %v4329_v56  ;;  %v1574_v25 = vadd.f32 %v4268_v13, %v4896_v60  ;;  %v4272_v13 = vld [vmem:[%s5434_s1] ss:$0 sm:$0xff]  ;;  %s5444_s1 = sld [smem:[#allocation14_spill]] }
 0x7cb   : > { %4336 = vrcp.f32 %v1988_v26 }
 0x7cc   : > { %4038 = vmatmul.msk.f32.gmra.mxu1 %vm1468_vm14, %v1993_v28  ;;  %v1821_v28 = vadd.f32 %v4918_v22, %v1574_v25 }
 0x7d1   : > { %v4337_v29 = vpop.eup %4336 }
 0x7d2   : > { %v1994_v30 = vmul.f32 %v4337_v29, %v4331_v62 }
 0x7d3   : > { %v2211_v31 = vpop.xlane.xlu2 %2210 }
 0x7d4   : > { %v2218_v33 = vsub.f32 %v2201_v1, %v2211_v31  ;;  %4039 = vmatmul.msk.f32.gmra.mxu1 %vm1468_vm14, %v1994_v30 }
 0x7d6   : > { %v2221_v34 = vmul.f32 1.442695, %v2218_v33 }
 0x7d8   : > { %4338 = vpow2.f32 %v2221_v34  ;;  %v1822_v34 = vadd.f32 %v4920_v23, %v1575_v59 }
 0x7db   : > { %v2214_v35 = vpop.xlane.xlu1 %2213 }
 0x7dc   : > { %v2219_v36 = vsub.f32 %v2204_v5, %v2214_v35  ;;  %4063 = vmatmul.msk.f32.vlgmr.msrb.gmra.mxu1 %vm1235_vm1, %v4770_v37  ;;  %v4072_v5 = vld [vmem:[%s4543_s24 + $0x18] sm:$0xff] }
 0x7dd   : > { %2303 = vmatpush.msra.mxu3 %v4072_v5 }
 0x7de   : > { %v4339_v38 = vpop.eup %4338  ;;  %v2223_v39 = vmul.f32 1.442695, %v2219_v36 }
 0x7df   : > { %v2227_v40 = vsel %vm1468_vm14, %v4339_v38, 0.0 }
 0x7e0   : > { %4340 = vpow2.f32 %v2223_v39  ;;  %2228 = vadd.xlane.f32.xlu1 %v2227_v40 }
 0x7e3   : > { %v2217_v41 = vpop.xlane.xlu2 %2216 }
 0x7e4   : > { %v2220_v42 = vsub.f32 %v2207_v8, %v2217_v41  ;;  %4064 = vmatmul.msk.f32.gmra.mxu1 %vm1235_vm1, %v4765_v32 }
 0x7e6   : > { %v4341_v43 = vpop.eup %4340  ;;  %v2225_v44 = vmul.f32 1.442695, %v2220_v42 }
 0x7e7   : > { %v2230_v45 = vsel %vm1468_vm14, %v4341_v43, 0.0 }
 0x7e8   : > { %4342 = vpow2.f32 %v2225_v44  ;;  %2231 = vadd.xlane.f32.xlu2 %v2230_v45 }
 0x7ec   : > { %4065 = vmatmul.msk.f32.gmra.mxu1 %vm1235_vm1, %v4759_v20  ;;  %v4271_v20 = vld [vmem:[%s4538_s19 + $0x3] ss:$0 sm:$0xff] }
 0x7ee   : > { %v4343_v37 = vpop.eup %4342 }
 0x7ef   : > { %v2233_v46 = vsel %vm1468_vm14, %v4343_v37, 0.0 }
 0x7f0   : > { %2234 = vadd.xlane.f32.xlu1 %v2233_v46 }
 0x841   : > { %v2021_v48 = vpop.f32.mrf.mxu1 }
 0x842   : > { %4041 = vmatmul.msk.f32.vlgmr.msra.gmra.mxu2 %vm1432_vm12, %v2021_v48 }
 0x849   : > { %v2024_v32 = vpop.f32.mrf.mxu1 }
 0x84a   : > { %4042 = vmatmul.msk.f32.gmra.mxu2 %vm1432_vm12, %v2024_v32  ;;  %v2403_v32 = vld [vmem:[%s4563_s20 + $0x18] sm:$0xff] }
 0x84b   : > { %2429 = vmatpush.msra.mxu1 %v2403_v32  ;;  %v2471_v32 = vld [vmem:[%s5433_s28 + $0x8] sm:$0xff] }
 0x851   : > { %v2027_v49 = vpop.f32.mrf.mxu1 }
 0x852   : > { %4043 = vmatmul.msk.f32.gmra.mxu2 %vm1432_vm12, %v2027_v49  ;;  %v2402_v49 = vld [vmem:[%s4563_s20 + $0x10] sm:$0xff] }
 0x853   : > { %v2229_v52 = vpop.xlane.xlu1 %2228  ;;  %2430 = vmatpush.msra.mxu1 %v2402_v49  ;;  %v2470_v49 = vld [vmem:[%s5433_s28] sm:$0xff] }
 0x854   : > { %4344 = vrcp.f32 %v2229_v52 }
 0x859   : > { %v2165_v50 = vpop.f32.mrf.mxu1 }
 0x85a   : > { %v4345_v56 = vpop.eup %4344  ;;  %v2166_v58 = vadd.f32 %v4271_v20, %v2165_v50  ;;  %v2401_v50 = vld [vmem:[%s4563_s20 + $0x8] sm:$0xff] }
 0x85b   : > { %v2232_v55 = vpop.xlane.xlu2 %2231  ;;  %v2239_v62 = vmul.f32 %v4345_v56, %v4339_v38  ;;  %2431 = vmatpush.msra.mxu1 %v2401_v50  ;;  %v4274_v50 = vld [vmem:[%s5436_s7] ss:$0 sm:$0xff]  ;;  %s5446_s7 = sld [smem:[#allocation15_spill]] }
 0x85c   : > { %4346 = vrcp.f32 %v2232_v55 }
 0x861   : > { %v2168_v51 = vpop.f32.mrf.mxu1 }
 0x862   : > { %v2169_v57 = vadd.f32 %v4271_v20, %v2168_v51  ;;  %v4347_v0 = vpop.eup %4346  ;;  %v2400_v51 = vld [vmem:[%s4563_s20] sm:$0xff] }
 0x863   : > { %v2235_v63 = vpop.xlane.xlu1 %2234  ;;  %v2240_v1 = vmul.f32 %v4347_v0, %v4341_v43  ;;  %2432 = vmatpush.msra.mxu1 %v2400_v51 }
 0x864   : > { %4348 = vrcp.f32 %v2235_v63  ;;  %v2484_v63 = vld [vmem:[%s5433_s28 + $0x70] sm:$0xff] }
 0x869   : > { %v2171_v53 = vpop.f32.mrf.mxu1 }
 0x86a   : > { %v2172_v54 = vadd.f32 %v4271_v20, %v2171_v53  ;;  %v4349_v2 = vpop.eup %4348 }
 0x86b   : > { %v2241_v3 = vmul.f32 %v4349_v2, %v4343_v37 }
 0x86c   : > { %2264 = vmatpush.msrb.mxu2 %v2172_v54 }
 0x86e   : > { %2265 = vmatpush.msrb.mxu2 %v2169_v57 }
 0x870   : > { %2266 = vmatpush.msrb.mxu2 %v2166_v58 }
 0x871   : > { %4069 = vmatmul.msk.f32.vlgmr.msrb.gmra.mxu2 %vm1468_vm14, %v2239_v62  ;;  %v2485_v62 = vld [vmem:[%s5433_s28 + $0x78] sm:$0xff] }
 0x872   : > { %2486 = vmatpush.msra.mxu0 %v2485_v62 }
 0x874   : > { %2487 = vmatpush.msra.mxu0 %v2484_v63 }
 0x879   : > { %4070 = vmatmul.msk.f32.gmra.mxu2 %vm1468_vm14, %v2240_v1  ;;  %v2483_v1 = vld [vmem:[%s5433_s28 + $0x68] sm:$0xff] }
 0x87a   : > { %2488 = vmatpush.msra.mxu0 %v2483_v1 }
 0x881   : > { %4071 = vmatmul.msk.f32.gmra.mxu2 %vm1468_vm14, %v2241_v3 }
 0x8c5   : > { %v2058_v6 = vpop.f32.mrf.mxu2 }
 0x8c6   : > { %v2067_v17 = vadd.f32 %v2058_v6, %v1820_v15  ;;  %v2482_v6 = vld [vmem:[%s5433_s28 + $0x60] sm:$0xff] }
 0x8c7   : > { %2489 = vmatpush.msra.mxu0 %v2482_v6 }
 0x8cd   : > { %v2061_v7 = vpop.f32.mrf.mxu2 }
 0x8ce   : > { %v2068_v30 = vadd.f32 %v2061_v7, %v1821_v28 }
 0x8d5   : > { %v2064_v8 = vpop.f32.mrf.mxu2 }
 0x8d6   : > { %v2069_v60 = vadd.f32 %v2064_v8, %v1822_v34 }
 0x8f4   : > { %v2268_v9 = vpop.f32.mrf.mxu2 }
 0x8f5   : > { %4073 = vmatmul.msk.f32.vlgmr.msra.gmra.mxu3 %vm1432_vm12, %v2268_v9 }
 0x8fc   : > { %v2271_v10 = vpop.f32.mrf.mxu2 }
 0x8fd   : > { %4074 = vmatmul.msk.f32.gmra.mxu3 %vm1432_vm12, %v2271_v10 }
 0x904   : > { %v2274_v12 = vpop.f32.mrf.mxu2 }
 0x905   : > { %4075 = vmatmul.msk.f32.gmra.mxu3 %vm1432_vm12, %v2274_v12 }
 0x978   : > { %v2305_v18 = vpop.f32.mrf.mxu3 }
 0x979   : > { %v2314_v24 = vadd.f32 %v2305_v18, %v2067_v17  ;;  %v4273_v18 = vld [vmem:[%s5435_s2] ss:$0 sm:$0xff]  ;;  %s5445_s2 = sld [smem:[#allocation10_spill]] }
 0x97b   : > { %v4974_v26 = vadd.f32 %v2314_v24, %v4704_v11 }
 0x97d   : > { %v2322_v29 = vsel %vm1235_vm1, %v4974_v26, 0.0 }
 0x97e   : > { %2323 = vadd.xlane.f32.xlu0 %v2322_v29 }
 0x980   : > { %v2308_v31 = vpop.f32.mrf.mxu3 }
 0x981   : > { %v2315_v33 = vadd.f32 %v2308_v31, %v2068_v30 }
 0x983   : > { %v4981_v21 = vadd.f32 %v2315_v33, %v4714_v19 }
 0x985   : > { %v2325_v11 = vsel %vm1235_vm1, %v4981_v21, 0.0 }
 0x986   : > { %2326 = vadd.xlane.f32.xlu2 %v2325_v11 }
 0x988   : > { %v2311_v22 = vpop.f32.mrf.mxu3 }
 0x989   : > { %v2316_v35 = vadd.f32 %v2311_v22, %v2069_v60 }
 0x98b   : > { %v4987_v36 = vadd.f32 %v2316_v35, %v4709_v16 }
 0x98d   : > { %v2328_v38 = vsel %vm1235_vm1, %v4987_v36, 0.0 }
 0x98e   : > { %2329 = vadd.xlane.f32.xlu1 %v2328_v38 }
 0x9f1   : > { %v2324_v61 = vpop.xlane.xlu0 %2323 }
 0x9f2   : > { %v2331_v19 = vmul.f32 %v2324_v61, %v4718_v27 }
 0x9f4   : > { %v2334_v39 = vsub.f32 %v4974_v26, %v2331_v19 }
 0x9f6   : > { %v2337_v23 = vmul.f32 %v2334_v39, %v2334_v39 }
 0x9f8   : > { %v2340_v40 = vsel %vm1235_vm1, %v2337_v23, 0.0 }
 0x9f9   : > { %2341 = vadd.xlane.f32.xlu0 %v2340_v40  ;;  %v2327_v41 = vpop.xlane.xlu2 %2326 }
 0x9fa   : > { %v2332_v16 = vmul.f32 %v2327_v41, %v4718_v27  ;;  %v2481_v41 = vld [vmem:[%s5433_s28 + $0x58] sm:$0xff] }
 0x9fb   : > { %2490 = vmatpush.msra.mxu0 %v2481_v41 }
 0x9fc   : > { %v4996_v42 = vsub.f32 %v4981_v21, %v2332_v16  ;;  %v2480_v16 = vld [vmem:[%s5433_s28 + $0x50] sm:$0xff] }
 0x9fd   : > { %2491 = vmatpush.msra.mxu0 %v2480_v16 }
 0x9fe   : > { %v2338_v43 = vmul.f32 %v4996_v42, %v4996_v42 }
 0xa00   : > { %v2343_v44 = vsel %vm1235_vm1, %v2338_v43, 0.0  ;;  %v2478_v43 = vld [vmem:[%s5433_s28 + $0x40] sm:$0xff] }
 0xa01   : > { %2344 = vadd.xlane.f32.xlu2 %v2343_v44  ;;  %v2330_v45 = vpop.xlane.xlu1 %2329  ;;  %v2477_v44 = vld [vmem:[%s5433_s28 + $0x38] sm:$0xff] }
 0xa02   : > { %v2333_v37 = vmul.f32 %v2330_v45, %v4718_v27  ;;  %v2476_v45 = vld [vmem:[%s5433_s28 + $0x30] sm:$0xff] }
 0xa04   : > { %v5003_v46 = vsub.f32 %v4987_v36, %v2333_v37  ;;  %v2475_v37 = vld [vmem:[%s5433_s28 + $0x28] sm:$0xff] }
 0xa06   : > { %v2339_v47 = vmul.f32 %v5003_v46, %v5003_v46 }
 0xa08   : > { %v2346_v48 = vsel %vm1235_vm1, %v2339_v47, 0.0  ;;  %v2473_v47 = vld [vmem:[%s5433_s28 + $0x18] sm:$0xff] }
 0xa09   : > { %2347 = vadd.xlane.f32.xlu1 %v2346_v48  ;;  %v2472_v48 = vld [vmem:[%s5433_s28 + $0x10] sm:$0xff] }
 0xa6c   : > { %v2342_v52 = vpop.xlane.xlu0 %2341 }
 0xa6d   : > { %v2349_v20 = vmul.f32 %v2342_v52, %v4718_v27 }
 0xa6f   : > { %v2352_v53 = vadd.f32 1e-05, %v2349_v20 }
 0xa71   : > { %4350 = vrsqrt.f32 %v2352_v53  ;;  %vm2361_vm0 = vweird.f32 %v2352_v53 }
 0xa74   : > { %v2345_v54 = vpop.xlane.xlu2 %2344 }
 0xa75   : > { %v2350_v55 = vmul.f32 %v2345_v54, %v4718_v27 }
 0xa77   : > { %v4351_v56 = vpop.eup %4350  ;;  %v2353_v57 = vadd.f32 1e-05, %v2350_v55 }
 0xa78   : > { %v2356_v58 = vmul.f32 %v4351_v56, %v2352_v53  ;;  %vm2362_vm15 = vweird.f32 %v4351_v56 }
 0xa79   : > { %4352 = vrsqrt.f32 %v2353_v57  ;;  %vm2363_vm2 = vmor %vm2361_vm0, %vm2362_vm15  ;;  %vm2371_vm4 = vweird.f32 %v2353_v57 }
 0xa7a   : > { %v2357_v0 = vmul.f32 %v4351_v56, %v2356_v58 }
 0xa7c   : > { %v2358_v2 = vmul.f32 0.5, %v2357_v0  ;;  %v2348_v3 = vpop.xlane.xlu1 %2347 }
 0xa7d   : > { %v2351_v5 = vmul.f32 %v2348_v3, %v4718_v27 }
 0xa7e   : > { %v2359_v7 = vsub.f32 1.5, %v2358_v2 }
 0xa7f   : > { %v4353_v8 = vpop.eup %4352  ;;  %v2354_v9 = vadd.f32 1e-05, %v2351_v5 }
 0xa80   : > { %v2360_v10 = vmul.f32 %v4351_v56, %v2359_v7  ;;  %v2366_v12 = vmul.f32 %v4353_v8, %v2353_v57  ;;  %vm2372_vm3 = vweird.f32 %v4353_v8 }
 0xa81   : > { %4354 = vrsqrt.f32 %v2354_v9  ;;  %vm2373_vm5 = vmor %vm2371_vm4, %vm2372_vm3  ;;  %vm2381_vm7 = vweird.f32 %v2354_v9 }
 0xa82   : > { %v2364_v14 = vsel %vm2363_vm2, %v4351_v56, %v2360_v10  ;;  %v2367_v15 = vmul.f32 %v4353_v8, %v2366_v12 }
 0xa83   : > { %v2385_v17 = vmul.f32 %v2364_v14, %v2334_v39 }
 0xa84   : > { %v2368_v24 = vmul.f32 0.5, %v2367_v15 }
 0xa85   : > { %v2391_v25 = vmul.f32 %v4272_v13, %v2385_v17 }
 0xa86   : > { %v2369_v28 = vsub.f32 1.5, %v2368_v24 }
 0xa87   : > { %v4355_v29 = vpop.eup %4354  ;;  %v2397_v30 = vadd.f32 %v4273_v18, %v2391_v25 }
 0xa88   : > { %v2370_v31 = vmul.f32 %v4353_v8, %v2369_v28  ;;  %v2376_v33 = vmul.f32 %v4355_v29, %v2354_v9  ;;  %vm2382_vm6 = vweird.f32 %v4355_v29 }
 0xa89   : > { %4076 = vmatmul.msk.f32.vlgmr.msra.gmra.mxu1 %vm1235_vm1, %v2397_v30  ;;  %vm2383_vm8 = vmor %vm2381_vm7, %vm2382_vm6 }
 0xa8a   : > { %v2374_v59 = vsel %vm2373_vm5, %v4353_v8, %v2370_v31  ;;  %v2377_v34 = vmul.f32 %v4355_v29, %v2376_v33  ;;  %v4275_v33 = vld [vmem:[%s5437_s10] ss:$0 sm:$0xff]  ;;  %s5447_s10 = sld [smem:[#allocation16_spill]] }
 0xa8b   : > { %v2386_v11 = vmul.f32 %v2374_v59, %v4996_v42  ;;  %v2479_v42 = vld [vmem:[%s5433_s28 + $0x48] sm:$0xff] }
 0xa8c   : > { %v2378_v60 = vmul.f32 0.5, %v2377_v34  ;;  %2492 = vmatpush.msra.mxu0 %v2479_v42 }
 0xa8d   : > { %v2392_v22 = vmul.f32 %v4272_v13, %v2386_v11 }
 0xa8e   : > { %v2379_v35 = vsub.f32 1.5, %v2378_v60  ;;  %2493 = vmatpush.msra.mxu0 %v2478_v43 }
 0xa8f   : > { %v2398_v38 = vadd.f32 %v4273_v18, %v2392_v22 }
 0xa90   : > { %v2380_v61 = vmul.f32 %v4355_v29, %v2379_v35  ;;  %2494 = vmatpush.msra.mxu0 %v2477_v44 }
 0xa91   : > { %4077 = vmatmul.msk.f32.gmra.mxu1 %vm1235_vm1, %v2398_v38 }
 0xa92   : > { %v2384_v19 = vsel %vm2383_vm8, %v4355_v29, %v2380_v61  ;;  %2495 = vmatpush.msra.mxu0 %v2476_v45 }
 0xa93   : > { %v2387_v39 = vmul.f32 %v2384_v19, %v5003_v46  ;;  %v2474_v46 = vld [vmem:[%s5433_s28 + $0x20] sm:$0xff] }
 0xa94   : > { %2496 = vmatpush.msra.mxu0 %v2475_v37 }
 0xa95   : > { %v2393_v23 = vmul.f32 %v4272_v13, %v2387_v39 }
 0xa96   : > { %2497 = vmatpush.msra.mxu0 %v2474_v46 }
 0xa97   : > { %v2399_v40 = vadd.f32 %v4273_v18, %v2393_v23 }
 0xa98   : > { %2498 = vmatpush.msra.mxu0 %v2473_v47 }
 0xa99   : > { %4078 = vmatmul.msk.f32.gmra.mxu1 %vm1235_vm1, %v2399_v40 }
 0xa9a   : > { %2499 = vmatpush.msra.mxu0 %v2472_v48 }
 0xa9c   : > { %2500 = vmatpush.msra.mxu0 %v2471_v32 }
 0xa9e   : > { %2501 = vmatpush.msra.mxu0 %v2470_v49 }
 0xb06   : > { %v2434_v51 = vpop.f32.mrf.mxu1 }
 0xb07   : > { %v2435_v52 = vadd.f32 %v4274_v50, %v2434_v51  ;;  %v4107_v51 = vld [vmem:[%s5438_s11 + $0x8] sm:$0xff] }
 0xb09   : > { %v2446_v20 = vmul.f32 0.044715, %v2435_v52  ;;  %v2443_v8 = vmul.f32 0.5, %v2435_v52 }
 0xb0b   : > { %v2449_v53 = vmul.f32 %v2446_v20, %v2435_v52  ;;  %v2682_v20 = vld [vmem:[%s5440_s16 + $0x18] sm:$0xff] }
 0xb0c   : > { %2699 = vmatpush.msrb.mxu1 %v2682_v20 }
 0xb0d   : > { %v2452_v54 = vmul.f32 %v2449_v53, %v2435_v52  ;;  %v2608_v53 = vld [vmem:[%s5439_s15 + $0x10] sm:$0xff] }
 0xb0e   : > { %v2437_v55 = vpop.f32.mrf.mxu1 }
 0xb0f   : > { %v2438_v56 = vadd.f32 %v4274_v50, %v2437_v55  ;;  %v2455_v57 = vadd.f32 %v2452_v54, %v2435_v52  ;;  %v2609_v52 = vld [vmem:[%s5439_s15 + $0x18] sm:$0xff]  ;;  %v2681_v54 = vld [vmem:[%s5440_s16 + $0x10] sm:$0xff]  ;;  %v2607_v55 = vld [vmem:[%s5439_s15 + $0x8] sm:$0xff] }
 0xb10   : > { %2635 = vmatpush.msra.mxu2 %v2609_v52  ;;  %2700 = vmatpush.msrb.mxu1 %v2681_v54  ;;  %v4279_v54 = vld [vmem:[%s5445_s2] ss:$0 sm:$0xff] }
 0xb11   : > { %v2458_v58 = vmul.f32 0.7978846, %v2455_v57  ;;  %v2447_v62 = vmul.f32 0.044715, %v2438_v56  ;;  %v2444_v18 = vmul.f32 0.5, %v2438_v56  ;;  %v2606_v57 = vld [vmem:[%s5439_s15] sm:$0xff] }
 0xb12   : > { %2636 = vmatpush.msra.mxu2 %v2608_v53 }
 0xb13   : > { %4356 = vtanh.f32 %v2458_v58  ;;  %v2450_v63 = vmul.f32 %v2447_v62, %v2438_v56  ;;  %v2679_v58 = vld [vmem:[%s5440_s16] sm:$0xff] }
 0xb14   : > { %2637 = vmatpush.msra.mxu2 %v2607_v55 }
 0xb15   : > { %v2453_v0 = vmul.f32 %v2450_v63, %v2438_v56 }
 0xb16   : > { %v2440_v1 = vpop.f32.mrf.mxu1  ;;  %2638 = vmatpush.msra.mxu2 %v2606_v57 }
 0xb17   : > { %v2441_v2 = vadd.f32 %v4274_v50, %v2440_v1  ;;  %v2456_v3 = vadd.f32 %v2453_v0, %v2438_v56  ;;  %v2650_v50 = vld [vmem:[%s5438_s11] sm:$0xff]  ;;  %v2680_v56 = vld [vmem:[%s5440_s16 + $0x8] sm:$0xff] }
 0xb18   : > { %2701 = vmatpush.msrb.mxu1 %v2680_v56 }
 0xb19   : > { %v4357_v5 = vpop.eup %4356  ;;  %v2459_v6 = vmul.f32 0.7978846, %v2456_v3  ;;  %v2448_v7 = vmul.f32 0.044715, %v2441_v2  ;;  %v2445_v29 = vmul.f32 0.5, %v2441_v2 }
 0xb1a   : > { %v2464_v9 = vadd.f32 1.0, %v4357_v5  ;;  %2702 = vmatpush.msrb.mxu1 %v2679_v58 }
 0xb1b   : > { %4358 = vtanh.f32 %v2459_v6  ;;  %v2451_v10 = vmul.f32 %v2448_v7, %v2441_v2 }
 0xb1c   : > { %v2467_v12 = vmul.f32 %v2464_v9, %v2443_v8  ;;  %v4101_v8 = vld [vmem:[%s5439_s15 + $0x38] sm:$0xff]  ;;  %v4100_v9 = vld [vmem:[%s5439_s15 + $0x30] sm:$0xff] }
 0xb1d   : > { %v2454_v13 = vmul.f32 %v2451_v10, %v2441_v2  ;;  %2877 = vmatpush.msra.mxu1 %v4101_v8  ;;  %v4133_v8 = vld [vmem:[%s5439_s15 + $0x58] sm:$0xff] }
 0xb1e   : > { %2502 = vmatmul.f32.vlgmr.msra.gmra.mxu0 %v2467_v12 }
 0xb1f   : > { %v2457_v14 = vadd.f32 %v2454_v13, %v2441_v2  ;;  %2878 = vmatpush.msra.mxu1 %v4100_v9  ;;  %v4132_v9 = vld [vmem:[%s5439_s15 + $0x50] sm:$0xff] }
 0xb21   : > { %v4359_v15 = vpop.eup %4358  ;;  %v2460_v17 = vmul.f32 0.7978846, %v2457_v14  ;;  %v4099_v14 = vld [vmem:[%s5439_s15 + $0x28] sm:$0xff] }
 0xb22   : > { %v2465_v24 = vadd.f32 1.0, %v4359_v15  ;;  %2879 = vmatpush.msra.mxu1 %v4099_v14 }
 0xb23   : > { %4360 = vtanh.f32 %v2460_v17  ;;  %v4098_v17 = vld [vmem:[%s5439_s15 + $0x20] sm:$0xff] }
 0xb24   : > { %v2468_v25 = vmul.f32 %v2465_v24, %v2444_v18  ;;  %2880 = vmatpush.msra.mxu1 %v4098_v17 }
 0xb26   : > { %2505 = vmatmul.f32.gmra.mxu0 %v2468_v25 }
 0xb29   : > { %v4361_v28 = vpop.eup %4360 }
 0xb2a   : > { %v2466_v30 = vadd.f32 1.0, %v4361_v28 }
 0xb2c   : > { %v2469_v31 = vmul.f32 %v2466_v30, %v2445_v29  ;;  %v4276_v29 = vld [vmem:[%s5441_s18] ss:$0 sm:$0xff]  ;;  %s5448_s18 = sld [smem:[#allocation19_spill]] }
 0xb2e   : > { %2508 = vmatmul.f32.gmra.mxu0 %v2469_v31 }
 0xb9b   : > { %v2503_v59 = vpop.f32.mrf.mxu0 }
 0xb9c   : > { %v2512_v34 = vadd.f32 %v2503_v59, %v4974_v26 }
 0xb9e   : > { %v5041_v11 = vadd.f32 %v4275_v33, %v2512_v34 }
 0xba0   : > { %v2524_v60 = vsel %vm1235_vm1, %v5041_v11, 0.0 }
 0xba1   : > { %2525 = vadd.xlane.f32.xlu1 %v2524_v60 }
 0xba3   : > { %v2506_v22 = vpop.f32.mrf.mxu0 }
 0xba4   : > { %v2513_v35 = vadd.f32 %v2506_v22, %v4981_v21 }
 0xba6   : > { %v5046_v38 = vadd.f32 %v4275_v33, %v2513_v35 }
 0xba8   : > { %v2527_v61 = vsel %vm1235_vm1, %v5046_v38, 0.0 }
 0xba9   : > { %2528 = vadd.xlane.f32.xlu2 %v2527_v61 }
 0xbab   : > { %v2509_v19 = vpop.f32.mrf.mxu0 }
 0xbac   : > { %v2514_v39 = vadd.f32 %v2509_v19, %v4987_v36 }
 0xbae   : > { %v5051_v23 = vadd.f32 %v4275_v33, %v2514_v39  ;;  %v4277_v33 = vld [vmem:[%s5442_s0] ss:$0 sm:$0xff]  ;;  %s5449_s0 = sld [smem:[#allocation17_spill]] }
 0xbb0   : > { %v2530_v26 = vsel %vm1235_vm1, %v5051_v23, 0.0 }
 0xbb1   : > { %2531 = vadd.xlane.f32.xlu0 %v2530_v26 }
 0xc14   : > { %v2526_v40 = vpop.xlane.xlu1 %2525 }
 0xc15   : > { %v2533_v41 = vmul.f32 %v2526_v40, %v4718_v27 }
 0xc17   : > { %v5057_v21 = vsub.f32 %v5041_v11, %v2533_v41 }
 0xc19   : > { %v2539_v16 = vmul.f32 %v5057_v21, %v5057_v21 }
 0xc1b   : > { %v2542_v42 = vsel %vm1235_vm1, %v2539_v16, 0.0 }
 0xc1c   : > { %v2529_v36 = vpop.xlane.xlu2 %2528  ;;  %2543 = vadd.xlane.f32.xlu1 %v2542_v42 }
 0xc1d   : > { %v2534_v43 = vmul.f32 %v2529_v36, %v4718_v27 }
 0xc1f   : > { %v5064_v44 = vsub.f32 %v5046_v38, %v2534_v43 }
 0xc21   : > { %v2540_v45 = vmul.f32 %v5064_v44, %v5064_v44 }
 0xc23   : > { %v2545_v37 = vsel %vm1235_vm1, %v2540_v45, 0.0 }
 0xc24   : > { %2546 = vadd.xlane.f32.xlu2 %v2545_v37  ;;  %v2532_v46 = vpop.xlane.xlu0 %2531 }
 0xc25   : > { %v2535_v47 = vmul.f32 %v2532_v46, %v4718_v27 }
 0xc27   : > { %v5071_v48 = vsub.f32 %v5051_v23, %v2535_v47  ;;  %v2649_v47 = vld [vmem:[%s5443_s26] sm:$0xff] }
 0xc29   : > { %v2541_v32 = vmul.f32 %v5071_v48, %v5071_v48 }
 0xc2b   : > { %v2548_v49 = vsel %vm1235_vm1, %v2541_v32, 0.0 }
 0xc2c   : > { %2549 = vadd.xlane.f32.xlu0 %v2548_v49  ;;  %v4278_v49 = vld [vmem:[%s5444_s1] ss:$0 sm:$0xff] }
 0xc40   : > { %2653 = vperm.xlu0 %4258, %v2650_v50  }
 0xc48   : > { %2897 = vperm.xlu0 %4258, %v4107_v51  }
 0xc8f   : > { %v2544_v62 = vpop.xlane.xlu1 %2543 }
 0xc90   : > { %v2551_v63 = vmul.f32 %v2544_v62, %v4718_v27 }
 0xc92   : > { %v2554_v0 = vadd.f32 1e-05, %v2551_v63 }
 0xc94   : > { %4362 = vrsqrt.f32 %v2554_v0  ;;  %vm2563_vm10 = vweird.f32 %v2554_v0 }
 0xc97   : > { %v2547_v1 = vpop.xlane.xlu2 %2546 }
 0xc98   : > { %v2552_v2 = vmul.f32 %v2547_v1, %v4718_v27  ;;  %v4114_v1 = vld [vmem:[%s5440_s16 + $0x30] sm:$0xff] }
 0xc9a   : > { %v4363_v3 = vpop.eup %4362  ;;  %v2555_v5 = vadd.f32 1e-05, %v2552_v2 }
 0xc9b   : > { %v2558_v6 = vmul.f32 %v4363_v3, %v2554_v0  ;;  %vm2564_vm9 = vweird.f32 %v4363_v3  ;;  %v4115_v0 = vld [vmem:[%s5440_s16 + $0x38] sm:$0xff] }
 0xc9c   : > { %4364 = vrsqrt.f32 %v2555_v5  ;;  %vm2565_vm11 = vmor %vm2563_vm10, %vm2564_vm9  ;;  %vm2573_vm15 = vweird.f32 %v2555_v5 }
 0xc9d   : > { %v2559_v7 = vmul.f32 %v4363_v3, %v2558_v6  ;;  %v4112_v6 = vld [vmem:[%s5440_s16 + $0x20] sm:$0xff] }
 0xc9f   : > { %v2560_v10 = vmul.f32 0.5, %v2559_v7  ;;  %v2550_v12 = vpop.xlane.xlu0 %2549  ;;  %v4106_v7 = vld [vmem:[%s5443_s26 + $0x8] sm:$0xff] }
 0xca0   : > { %v2553_v13 = vmul.f32 %v2550_v12, %v4718_v27  ;;  %v4130_v12 = vld [vmem:[%s5439_s15 + $0x40] sm:$0xff] }
 0xca1   : > { %v2561_v15 = vsub.f32 1.5, %v2560_v10  ;;  %v4131_v10 = vld [vmem:[%s5439_s15 + $0x48] sm:$0xff] }
 0xca2   : > { %v4365_v18 = vpop.eup %4364  ;;  %v2556_v24 = vadd.f32 1e-05, %v2553_v13 }
 0xca3   : > { %v2562_v25 = vmul.f32 %v4363_v3, %v2561_v15  ;;  %v2568_v28 = vmul.f32 %v4365_v18, %v2555_v5  ;;  %vm2574_vm13 = vweird.f32 %v4365_v18 }
 0xca4   : > { %4366 = vrsqrt.f32 %v2556_v24  ;;  %vm2575_vm0 = vmor %vm2573_vm15, %vm2574_vm13  ;;  %vm2583_vm3 = vweird.f32 %v2556_v24 }
 0xca5   : > { %v2566_v30 = vsel %vm2565_vm11, %v4363_v3, %v2562_v25  ;;  %v2569_v31 = vmul.f32 %v4365_v18, %v2568_v28  ;;  %v4113_v3 = vld [vmem:[%s5440_s16 + $0x28] sm:$0xff] }
 0xca6   : > { %v2587_v59 = vmul.f32 %v2566_v30, %v5057_v21 }
 0xca7   : > { %v2570_v34 = vmul.f32 0.5, %v2569_v31 }
 0xca8   : > { %v2593_v60 = vmul.f32 %v4276_v29, %v2587_v59 }
 0xca9   : > { %v2571_v22 = vsub.f32 1.5, %v2570_v34 }
 0xcaa   : > { %v4367_v35 = vpop.eup %4366  ;;  %v5096_v61 = vadd.f32 %v4277_v33, %v2593_v60 }
 0xcab   : > { %v2572_v19 = vmul.f32 %v4365_v18, %v2571_v22  ;;  %v2578_v39 = vmul.f32 %v4367_v35, %v2556_v24  ;;  %vm2584_vm2 = vweird.f32 %v4367_v35  ;;  %v4281_v22 = vld [vmem:[%s5444_s1 + $0x1] ss:$0 sm:$0xff] }
 0xcac   : > { %4079 = vmatmul.msk.f32.vlgmr.msra.gmra.mxu2 %vm1235_vm1, %v5096_v61  ;;  %4086 = vmatmul.msk.f32.vlgmr.msrb.gmra.mxu1 %vm1235_vm1, %v5096_v61  ;;  %vm2585_vm4 = vmor %vm2583_vm3, %vm2584_vm2 }
 0xcad   : > { %v2576_v26 = vsel %vm2575_vm0, %v4365_v18, %v2572_v19  ;;  %v2579_v40 = vmul.f32 %v4367_v35, %v2578_v39 }
 0xcae   : > { %v2588_v41 = vmul.f32 %v2576_v26, %v5064_v44 }
 0xcaf   : > { %v2580_v21 = vmul.f32 0.5, %v2579_v40 }
 0xcb0   : > { %v2594_v16 = vmul.f32 %v4276_v29, %v2588_v41 }
 0xcb1   : > { %v2581_v42 = vsub.f32 1.5, %v2580_v21 }
 0xcb2   : > { %v5103_v36 = vadd.f32 %v4277_v33, %v2594_v16  ;;  %v2654_v55 = vpop.permute.xlu0 %2653 }
 0xcb3   : > { %v2582_v43 = vmul.f32 %v4367_v35, %v2581_v42 }
 0xcb4   : > { %4080 = vmatmul.msk.f32.gmra.mxu2 %vm1235_vm1, %v5103_v36  ;;  %4087 = vmatmul.msk.f32.gmra.mxu1 %vm1235_vm1, %v5103_v36 }
 0xcb5   : > { %v2586_v45 = vsel %vm2585_vm4, %v4367_v35, %v2582_v43 }
 0xcb6   : > { %v2589_v44 = vmul.f32 %v2586_v45, %v5071_v48 }
 0xcb8   : > { %v2595_v37 = vmul.f32 %v4276_v29, %v2589_v44  ;;  %v2816_v29 = vld [vmem:[%s5446_s7] sm:$0xff] }
 0xcb9   : > { %2841 = vmatpush.msrb.mxu2 %v2816_v29  ;;  %v5199_v29 = vld [vmem:[%s5447_s10] ss:$0 sm:$0xff]  ;;  %s5450_s10 = sld [smem:[#allocation18_spill]] }
 0xcba   : > { %v5110_v46 = vadd.f32 %v4277_v33, %v2595_v37  ;;  %v2898_v31 = vpop.permute.xlu0 %2897 }
 0xcbc   : > { %4081 = vmatmul.msk.f32.gmra.mxu2 %vm1235_vm1, %v5110_v46  ;;  %4082 = vmatpush.xpose.msk.msrb.mxu3 %vm1235_vm1, %v5110_v46 }
 0xcbd   : > { %4088 = vmatmul.msk.f32.gmra.mxu1 %vm1235_vm1, %v5110_v46 }
 0xcc0   : > { %4083 = vmatpush.xpose.msk.msrb.mxu3 %vm1235_vm1, %v5103_v36 }
 0xcc4   : > { %4084 = vmatpush.xpose.msk.msrb.mxu3 %vm1235_vm1, %v5096_v61 }
 0xcc5   : > { %4103 = vmatmul.msk.f32.vlgmr.msra.gmra.mxu1 %vm1235_vm1, %v5096_v61 }
 0xcc7   : > { %4085 = vmatmul.msk.f32.vlgmr.msrb.gmra.mxu3 %vm1235_vm1, %v2649_v47 }
 0xccd   : > { %4104 = vmatmul.msk.f32.gmra.mxu1 %vm1235_vm1, %v5103_v36 }
 0xcd5   : > { %4105 = vmatmul.msk.f32.gmra.mxu1 %vm1235_vm1, %v5110_v46 }
 0xd29   : > { %v2704_v48 = vpop.f32.mrf.mxu1 }
 0xd2a   : > { %v2705_v20 = vadd.f32 %v4278_v49, %v2704_v48 }
 0xd2f   : > { %v2640_v53 = vpop.f32.mrf.mxu2 }
 0xd30   : > { %v2641_v58 = vadd.f32 %v4279_v54, %v2640_v53 }
 0xd31   : > { %v2707_v32 = vpop.f32.mrf.mxu1 }
 0xd32   : > { %v2708_v52 = vadd.f32 %v4278_v49, %v2707_v32 }
 0xd37   : > { %v2643_v62 = vpop.f32.mrf.mxu2 }
 0xd38   : > { %v2644_v63 = vadd.f32 %v4279_v54, %v2643_v62 }
 0xd3a   : > { %v2710_v50 = vpop.f32.mrf.mxu1 }
 0xd3b   : > { %v2711_v51 = vadd.f32 %v4278_v49, %v2710_v50 }
 0xd3d   : > { %2803 = vmatpush.msrb.mxu0 %v2711_v51 }
 0xd3f   : > { %2804 = vmatpush.msrb.mxu0 %v2708_v52  ;;  %v2646_v2 = vpop.f32.mrf.mxu2 }
 0xd40   : > { %v2647_v5 = vadd.f32 %v4279_v54, %v2646_v2 }
 0xd41   : > { %2805 = vmatpush.msrb.mxu0 %v2705_v20 }
 0xd4a   : > { %v2676_v56 = vpop.f32.mrf.mxu3 }
 0xd4b   : > { %v2677_v57 = vadd.f32 %v2676_v56, %v2654_v55 }
 0xd4d   : > { %2737 = vmatpush.msra.mxu3 %v2677_v57 }
 0xd4e   : > { %4089 = vmatmul.msk.f32.vlgmr.msra.gmra.mxu3 %vm1432_vm12, %v2641_v58 }
 0xd4f   : > { %4108 = vmatpush.xpose.msk.msrb.mxu3 %vm1235_vm1, %v5110_v46 }
 0xd53   : > { %4109 = vmatpush.xpose.msk.msrb.mxu3 %vm1235_vm1, %v5103_v36 }
 0xd56   : > { %4090 = vmatmul.msk.f32.gmra.mxu3 %vm1432_vm12, %v2644_v63  ;;  %v2882_v63 = vpop.f32.mrf.mxu1 }
 0xd57   : > { %4110 = vmatpush.xpose.msk.msrb.mxu3 %vm1235_vm1, %v5096_v61 }
 0xd5b   : > { %2945 = vmatpush.msra.mxu3 %v4115_v0  ;;  %v4280_v0 = vld [vmem:[%s5445_s2 + $0x1] ss:$0 sm:$0xff] }
 0xd5d   : > { %2946 = vmatpush.msra.mxu3 %v4114_v1  ;;  %v2883_v1 = vadd.f32 %v4280_v0, %v2882_v63 }
 0xd5e   : > { %4091 = vmatmul.msk.f32.gmra.mxu3 %vm1432_vm12, %v2647_v5  ;;  %v2885_v2 = vpop.f32.mrf.mxu1 }
 0xd5f   : > { %2947 = vmatpush.msra.mxu3 %v4113_v3  ;;  %v2886_v3 = vadd.f32 %v4280_v0, %v2885_v2 }
 0xd61   : > { %2948 = vmatpush.msra.mxu3 %v4112_v6 }
 0xd66   : > { %4111 = vmatmul.msk.f32.vlgmr.msrb.gmra.mxu3 %vm1235_vm1, %v4106_v7  ;;  %v2888_v5 = vpop.f32.mrf.mxu1 }
 0xd67   : > { %3124 = vmatpush.msrb.mxu3 %v4133_v8  ;;  %v2889_v6 = vadd.f32 %v4280_v0, %v2888_v5 }
 0xd69   : > { %3125 = vmatpush.msrb.mxu3 %v4132_v9 }
 0xd6b   : > { %3126 = vmatpush.msrb.mxu3 %v4131_v10 }
 0xd6d   : > { %3127 = vmatpush.msrb.mxu3 %v4130_v12 }
 0xd6e   : > { %4117 = vmatmul.msk.f32.vlgmr.msra.gmra.mxu3 %vm1235_vm1, %v5096_v61 }
 0xd76   : > { %4118 = vmatmul.msk.f32.gmra.mxu3 %vm1235_vm1, %v5103_v36 }
 0xd7e   : > { %4119 = vmatmul.msk.f32.gmra.mxu3 %vm1235_vm1, %v5110_v46 }
 0xd86   : > { %4135 = vmatmul.msk.f32.vlgmr.msrb.gmra.mxu3 %vm1235_vm1, %v5096_v61 }
 0xd8e   : > { %4136 = vmatmul.msk.f32.gmra.mxu3 %vm1235_vm1, %v5103_v36 }
 0xd96   : > { %4137 = vmatmul.msk.f32.gmra.mxu3 %vm1235_vm1, %v5110_v46 }
 0xdd1   : > { %v2739_v13 = vpop.f32.mrf.mxu3 }
 0xdd2   : > { %v2740_v14 = vadd.f32 %v2739_v13, %v4827_v4 }
 0xdd4   : > { %v2748_v15 = vsel %vm1468_vm14, %v2740_v14, -inf }
 0xdd5   : > { %2749 = vmax.xlane.f32.xlu2 %v2748_v15 }
 0xdd9   : > { %v2742_v17 = vpop.f32.mrf.mxu3 }
 0xdda   : > { %v2743_v18 = vadd.f32 %v2742_v17, %v4827_v4 }
 0xddc   : > { %v2751_v24 = vsel %vm1468_vm14, %v2743_v18, -inf }
 0xddd   : > { %2752 = vmax.xlane.f32.xlu1 %v2751_v24 }
 0xde1   : > { %v2745_v25 = vpop.f32.mrf.mxu3 }
 0xde2   : > { %v2746_v28 = vadd.f32 %v2745_v25, %v4827_v4 }
 0xde4   : > { %v2754_v30 = vsel %vm1468_vm14, %v2746_v28, -inf }
 0xde5   : > { %2755 = vmax.xlane.f32.xlu2 %v2754_v30 }
 0xde9   : > { %v2920_v33 = vpop.f32.mrf.mxu3 }
 0xdea   : > { %v2921_v59 = vadd.f32 %v2920_v33, %v2898_v31  ;;  %v4138_v31 = vld [vmem:[%s5443_s26 + $0x10] sm:$0xff] }
 0xdec   : > { %2983 = vmatpush.msra.mxu0 %v2921_v59 }
 0xdf1   : > { %v2950_v34 = vpop.f32.mrf.mxu3 }
 0xdf2   : > { %v2951_v26 = vadd.f32 %v4281_v22, %v2950_v34 }
 0xdf9   : > { %v2953_v60 = vpop.f32.mrf.mxu3 }
 0xdfa   : > { %v2954_v39 = vadd.f32 %v4281_v22, %v2953_v60 }
 0xe01   : > { %v2956_v35 = vpop.f32.mrf.mxu3 }
 0xe02   : > { %v2957_v19 = vadd.f32 %v4281_v22, %v2956_v35 }
 0xe04   : > { %3049 = vmatpush.msra.mxu2 %v2957_v19 }
 0xe06   : > { %3050 = vmatpush.msra.mxu2 %v2954_v39 }
 0xe08   : > { %3051 = vmatpush.msra.mxu2 %v2951_v26 }
 0xe09   : > { %v3129_v0 = vpop.f32.mrf.mxu3 }
 0xe48   : > { %v2750_v40 = vpop.xlane.xlu2 %2749 }
 0xe49   : > { %v2757_v41 = vsub.f32 %v2740_v14, %v2750_v40 }
 0xe4b   : > { %v2760_v21 = vmul.f32 1.442695, %v2757_v41 }
 0xe4d   : > { %4368 = vpow2.f32 %v2760_v21 }
 0xe50   : > { %v2753_v16 = vpop.xlane.xlu1 %2752 }
 0xe51   : > { %v2758_v42 = vsub.f32 %v2743_v18, %v2753_v16 }
 0xe53   : > { %v4369_v43 = vpop.eup %4368  ;;  %v2762_v45 = vmul.f32 1.442695, %v2758_v42 }
 0xe54   : > { %v2766_v44 = vsel %vm1468_vm14, %v4369_v43, 0.0 }
 0xe55   : > { %4370 = vpow2.f32 %v2762_v45  ;;  %2767 = vadd.xlane.f32.xlu1 %v2766_v44  ;;  %v4139_v44 = vld [vmem:[%s5438_s11 + $0x10] sm:$0xff] }
 0xe58   : > { %v2756_v37 = vpop.xlane.xlu2 %2755 }
 0xe59   : > { %v2759_v47 = vsub.f32 %v2746_v28, %v2756_v37  ;;  %v4147_v37 = vld [vmem:[%s5440_s16 + $0x58] sm:$0xff] }
 0xe5b   : > { %v4371_v48 = vpop.eup %4370  ;;  %v2764_v32 = vmul.f32 1.442695, %v2759_v47  ;;  %v4146_v47 = vld [vmem:[%s5440_s16 + $0x50] sm:$0xff] }
 0xe5c   : > { %v2769_v49 = vsel %vm1468_vm14, %v4371_v48, 0.0 }
 0xe5d   : > { %4372 = vpow2.f32 %v2764_v32  ;;  %2770 = vadd.xlane.f32.xlu2 %v2769_v49  ;;  %v4144_v49 = vld [vmem:[%s5440_s16 + $0x40] sm:$0xff] }
 0xe63   : > { %v4373_v50 = vpop.eup %4372 }
 0xe64   : > { %v2772_v51 = vsel %vm1468_vm14, %v4373_v50, 0.0 }
 0xe65   : > { %2773 = vadd.xlane.f32.xlu1 %v2772_v51 }
 0xec8   : > { %v2768_v52 = vpop.xlane.xlu1 %2767 }
 0xec9   : > { %4374 = vrcp.f32 %v2768_v52 }
 0xecf   : > { %v4375_v20 = vpop.eup %4374 }
 0xed0   : > { %v2778_v53 = vmul.f32 %v4375_v20, %v4369_v43  ;;  %v2771_v54 = vpop.xlane.xlu2 %2770 }
 0xed1   : > { %4376 = vrcp.f32 %v2771_v54 }
 0xed2   : > { %4092 = vmatmul.msk.f32.vlgmr.msrb.gmra.mxu0 %vm1468_vm14, %v2778_v53 }
 0xed3   : > { %4140 = vmatpush.xpose.msk.msrb.mxu0 %vm1235_vm1, %v5110_v46 }
 0xed7   : > { %v4377_v55 = vpop.eup %4376  ;;  %4141 = vmatpush.xpose.msk.msrb.mxu0 %vm1235_vm1, %v5103_v36 }
 0xed8   : > { %v2774_v56 = vpop.xlane.xlu1 %2773  ;;  %v2779_v57 = vmul.f32 %v4377_v55, %v4371_v48  ;;  %v4145_v48 = vld [vmem:[%s5440_s16 + $0x48] sm:$0xff]  ;;  %v4165_v55 = vld [vmem:[%s5439_s15 + $0x78] sm:$0xff] }
 0xed9   : > { %4378 = vrcp.f32 %v2774_v56  ;;  %v4164_v56 = vld [vmem:[%s5439_s15 + $0x70] sm:$0xff] }
 0xeda   : > { %4093 = vmatmul.msk.f32.gmra.mxu0 %vm1468_vm14, %v2779_v57  ;;  %v4163_v57 = vld [vmem:[%s5439_s15 + $0x68] sm:$0xff] }
 0xedb   : > { %4142 = vmatpush.xpose.msk.msrb.mxu0 %vm1235_vm1, %v5096_v61 }
 0xedf   : > { %v4379_v58 = vpop.eup %4378 }
 0xee0   : > { %v2780_v62 = vmul.f32 %v4379_v58, %v4373_v50  ;;  %v4162_v58 = vld [vmem:[%s5439_s15 + $0x60] sm:$0xff] }
 0xee2   : > { %4094 = vmatmul.msk.f32.gmra.mxu0 %vm1468_vm14, %v2780_v62 }
 0xeea   : > { %4120 = vmatmul.msk.f32.vlgmr.msra.gmra.mxu0 %vm1432_vm12, %v2883_v1  ;;  %v4282_v1 = vld [vmem:[%s5445_s2 + $0x2] ss:$0 sm:$0xff] }
 0xef2   : > { %4121 = vmatmul.msk.f32.gmra.mxu0 %vm1432_vm12, %v2886_v3 }
 0xefa   : > { %4122 = vmatmul.msk.f32.gmra.mxu0 %vm1432_vm12, %v2889_v6  ;;  %v3130_v6 = vadd.f32 %v4282_v1, %v3129_v0 }
 0xf02   : > { %4143 = vmatmul.msk.f32.vlgmr.msrb.gmra.mxu0 %vm1235_vm1, %v4138_v31 }
 0xf4f   : > { %v2807_v7 = vpop.f32.mrf.mxu0 }
 0xf50   : > { %4095 = vmatmul.msk.f32.vlgmr.msrb.gmra.mxu2 %vm1432_vm12, %v2807_v7  ;;  %v3132_v7 = vpop.f32.mrf.mxu3 }
 0xf51   : > { %3192 = vmatpush.msrb.mxu2 %v4147_v37 }
 0xf53   : > { %3193 = vmatpush.msrb.mxu2 %v4146_v47 }
 0xf55   : > { %3194 = vmatpush.msrb.mxu2 %v4145_v48 }
 0xf57   : > { %v2810_v8 = vpop.f32.mrf.mxu0  ;;  %3195 = vmatpush.msrb.mxu2 %v4144_v49 }
 0xf58   : > { %4096 = vmatmul.msk.f32.gmra.mxu2 %vm1432_vm12, %v2810_v8  ;;  %v3133_v8 = vadd.f32 %v4282_v1, %v3132_v7 }
 0xf5f   : > { %v2813_v9 = vpop.f32.mrf.mxu0 }
 0xf60   : > { %4097 = vmatmul.msk.f32.gmra.mxu2 %vm1432_vm12, %v2813_v9  ;;  %v3135_v9 = vpop.f32.mrf.mxu3 }
 0xf67   : > { %v2985_v10 = vpop.f32.mrf.mxu0 }
 0xf68   : > { %v2986_v12 = vadd.f32 %v2985_v10, %v4827_v4  ;;  %v3136_v10 = vadd.f32 %v4282_v1, %v3135_v9  ;;  %v4179_v9 = vld [vmem:[%s5440_s16 + $0x78] sm:$0xff] }
 0xf6a   : > { %v2994_v13 = vsel %vm1468_vm14, %v2986_v12, -inf }
 0xf6b   : > { %2995 = vmax.xlane.f32.xlu2 %v2994_v13  ;;  %v4170_v13 = vld [vmem:[%s5443_s26 + $0x18] sm:$0xff] }
 0xf6f   : > { %v2988_v14 = vpop.f32.mrf.mxu0 }
 0xf70   : > { %v2989_v15 = vadd.f32 %v2988_v14, %v4827_v4 }
 0xf72   : > { %v2997_v17 = vsel %vm1468_vm14, %v2989_v15, -inf }
 0xf73   : > { %2998 = vmax.xlane.f32.xlu1 %v2997_v17 }
 0xf77   : > { %v2991_v18 = vpop.f32.mrf.mxu0 }
 0xf78   : > { %v2992_v24 = vadd.f32 %v2991_v18, %v4827_v4 }
 0xf7a   : > { %v3000_v25 = vsel %vm1468_vm14, %v2992_v24, -inf }
 0xf7b   : > { %3001 = vmax.xlane.f32.xlu0 %v3000_v25 }
 0xf7f   : > { %v3167_v2 = vpop.f32.mrf.mxu0 }
 0xfd3   : > { %v5196_v28 = vpop.f32.mrf.mxu2 }
 0xfdb   : > { %v2846_v30 = vpop.f32.mrf.mxu2 }
 0xfdc   : > { %v5203_v33 = vadd.f32 %v5199_v29, %v2846_v30 }
 0xfde   : > { %v2996_v59 = vpop.xlane.xlu2 %2995 }
 0xfdf   : > { %v3003_v34 = vsub.f32 %v2986_v12, %v2996_v59  ;;  %v4126_v12 = vld [vmem:[%s5446_s7 + $0x8] sm:$0xff] }
 0xfe0   : > { %3088 = vmatpush.msrb.mxu1 %v4126_v12  ;;  %v4177_v12 = vld [vmem:[%s5440_s16 + $0x68] sm:$0xff] }
 0xfe1   : > { %v3006_v60 = vmul.f32 1.442695, %v3003_v34 }
 0xfe3   : > { %4380 = vpow2.f32 %v3006_v60  ;;  %v5246_v14 = vpop.f32.mrf.mxu2 }
 0xfe6   : > { %v2999_v22 = vpop.xlane.xlu1 %2998 }
 0xfe7   : > { %v3004_v35 = vsub.f32 %v2989_v15, %v2999_v22 }
 0xfe9   : > { %v4381_v19 = vpop.eup %4380  ;;  %v3008_v39 = vmul.f32 1.442695, %v3004_v35 }
 0xfea   : > { %v3012_v26 = vsel %vm1468_vm14, %v4381_v19, 0.0 }
 0xfeb   : > { %4382 = vpow2.f32 %v3008_v39  ;;  %3013 = vadd.xlane.f32.xlu2 %v3012_v26  ;;  %v4284_v39 = vld [vmem:[%s5444_s1 + $0x2] ss:$0 sm:$0xff] }
 0xfee   : > { %v3002_v40 = vpop.xlane.xlu0 %3001 }
 0xfef   : > { %v3005_v41 = vsub.f32 %v2992_v24, %v3002_v40 }
 0xff1   : > { %v4383_v21 = vpop.eup %4382  ;;  %v3010_v16 = vmul.f32 1.442695, %v3005_v41 }
 0xff2   : > { %v3015_v42 = vsel %vm1468_vm14, %v4383_v21, 0.0 }
 0xff3   : > { %4384 = vpow2.f32 %v3010_v16  ;;  %3016 = vadd.xlane.f32.xlu1 %v3015_v42  ;;  %v4171_v42 = vld [vmem:[%s5438_s11 + $0x18] sm:$0xff] }
 0xff9   : > { %v4385_v43 = vpop.eup %4384 }
 0xffa   : > { %v3018_v45 = vsel %vm1468_vm14, %v4385_v43, 0.0 }
 0xffb   : > { %3019 = vadd.xlane.f32.xlu2 %v3018_v45 }
0x100c   : > { %3144 = vperm.xlu1 %4259, %v4139_v44  }
0x105e   : > { %v3014_v32 = vpop.xlane.xlu2 %3013 }
0x105f   : > { %4386 = vrcp.f32 %v3014_v32 }
0x1065   : > { %v4387_v50 = vpop.eup %4386 }
0x1066   : > { %v3024_v51 = vmul.f32 %v4387_v50, %v4381_v19  ;;  %v3017_v52 = vpop.xlane.xlu1 %3016 }
0x1067   : > { %4388 = vrcp.f32 %v3017_v52 }
0x1068   : > { %4123 = vmatmul.msk.f32.vlgmr.msra.gmra.mxu2 %vm1468_vm14, %v3024_v51  ;;  %v4285_v51 = vld [vmem:[%s5445_s2 + $0x3] ss:$0 sm:$0xff] }
0x1069   : > { %3371 = vmatpush.msra.mxu2 %v4165_v55 }
0x106b   : > { %3372 = vmatpush.msra.mxu2 %v4164_v56 }
0x106d   : > { %v4389_v20 = vpop.eup %4388  ;;  %3373 = vmatpush.msra.mxu2 %v4163_v57 }
0x106e   : > { %v3020_v53 = vpop.xlane.xlu2 %3019  ;;  %v3025_v54 = vmul.f32 %v4389_v20, %v4383_v21 }
0x106f   : > { %4390 = vrcp.f32 %v3020_v53  ;;  %3374 = vmatpush.msra.mxu2 %v4162_v58 }
0x1070   : > { %4124 = vmatmul.msk.f32.gmra.mxu2 %vm1468_vm14, %v3025_v54 }
0x1075   : > { %v4391_v62 = vpop.eup %4390 }
0x1076   : > { %v3026_v63 = vmul.f32 %v4391_v62, %v4385_v43  ;;  %v2852_v43 = vadd.f32 %v5199_v29, %v5196_v28 }
0x1078   : > { %4125 = vmatmul.msk.f32.gmra.mxu2 %vm1468_vm14, %v3026_v63 }
0x107e   : > { %v3145_v3 = vpop.permute.xlu1 %3144 }
0x107f   : > { %v3168_v5 = vadd.f32 %v3167_v2, %v3145_v3 }
0x1080   : > { %4149 = vmatmul.msk.f32.vlgmr.msrb.gmra.mxu2 %vm1235_vm1, %v5096_v61 }
0x1081   : > { %3230 = vmatpush.msra.mxu0 %v3168_v5 }
0x1082   : > { %4152 = vmatmul.msk.f32.vlgmr.msra.gmra.mxu0 %vm1432_vm12, %v3130_v6 }
0x1083   : > { %4172 = vmatpush.xpose.msk.msrb.mxu0 %vm1235_vm1, %v5110_v46 }
0x1087   : > { %4173 = vmatpush.xpose.msk.msrb.mxu0 %vm1235_vm1, %v5103_v36 }
0x1088   : > { %4150 = vmatmul.msk.f32.gmra.mxu2 %vm1235_vm1, %v5103_v36 }
0x108a   : > { %4153 = vmatmul.msk.f32.gmra.mxu0 %vm1432_vm12, %v3133_v8 }
0x108b   : > { %4174 = vmatpush.xpose.msk.msrb.mxu0 %vm1235_vm1, %v5096_v61 }
0x1090   : > { %4151 = vmatmul.msk.f32.gmra.mxu2 %vm1235_vm1, %v5110_v46 }
0x1092   : > { %4154 = vmatmul.msk.f32.gmra.mxu0 %vm1432_vm12, %v3136_v10  ;;  %v4178_v10 = vld [vmem:[%s5440_s16 + $0x70] sm:$0xff] }
0x1098   : > { %4167 = vmatmul.msk.f32.vlgmr.msra.gmra.mxu2 %vm1235_vm1, %v5096_v61 }
0x109a   : > { %4175 = vmatmul.msk.f32.vlgmr.msrb.gmra.mxu0 %vm1235_vm1, %v4170_v13  ;;  %v4176_v13 = vld [vmem:[%s5440_s16 + $0x60] sm:$0xff] }
0x10a0   : > { %4168 = vmatmul.msk.f32.gmra.mxu2 %vm1235_vm1, %v5103_v36 }
0x10a8   : > { %4169 = vmatmul.msk.f32.gmra.mxu2 %vm1235_vm1, %v5110_v46 }
0x10eb   : > { %v3053_v15 = vpop.f32.mrf.mxu2 }
0x10ec   : > { %4127 = vmatmul.msk.f32.vlgmr.msrb.gmra.mxu1 %vm1432_vm12, %v3053_v15 }
0x10f3   : > { %v3056_v17 = vpop.f32.mrf.mxu2 }
0x10f4   : > { %4128 = vmatmul.msk.f32.gmra.mxu1 %vm1432_vm12, %v3056_v17 }
0x10fb   : > { %v3059_v18 = vpop.f32.mrf.mxu2 }
0x10fc   : > { %4129 = vmatmul.msk.f32.gmra.mxu1 %vm1432_vm12, %v3059_v18 }
0x10ff   : > { %v3232_v24 = vpop.f32.mrf.mxu0 }
0x1100   : > { %v3233_v25 = vadd.f32 %v3232_v24, %v4827_v4 }
0x1102   : > { %v3241_v30 = vsel %vm1468_vm14, %v3233_v25, -inf }
0x1103   : > { %3242 = vmax.xlane.f32.xlu2 %v3241_v30  ;;  %v3197_v31 = vpop.f32.mrf.mxu2 }
0x1104   : > { %v3198_v16 = vadd.f32 %v4284_v39, %v3197_v31 }
0x1107   : > { %v3235_v59 = vpop.f32.mrf.mxu0 }
0x1108   : > { %v3236_v34 = vadd.f32 %v3235_v59, %v4827_v4 }
0x110a   : > { %v3244_v60 = vsel %vm1468_vm14, %v3236_v34, -inf }
0x110b   : > { %3245 = vmax.xlane.f32.xlu1 %v3244_v60  ;;  %v3200_v22 = vpop.f32.mrf.mxu2 }
0x110c   : > { %v3201_v21 = vadd.f32 %v4284_v39, %v3200_v22 }
0x110f   : > { %v3238_v35 = vpop.f32.mrf.mxu0 }
0x1110   : > { %v3239_v19 = vadd.f32 %v3238_v35, %v4827_v4 }
0x1112   : > { %v3247_v26 = vsel %vm1468_vm14, %v3239_v19, -inf }
0x1113   : > { %3248 = vmax.xlane.f32.xlu0 %v3247_v26  ;;  %v3203_v40 = vpop.f32.mrf.mxu2 }
0x1114   : > { %v3204_v41 = vadd.f32 %v4284_v39, %v3203_v40 }
0x1116   : > { %3296 = vmatpush.msra.mxu1 %v3204_v41  ;;  %v4158_v41 = vld [vmem:[%s5446_s7 + $0x10] sm:$0xff] }
0x1117   : > { %v3414_v52 = vpop.f32.mrf.mxu0  ;;  %3335 = vmatpush.msra.mxu3 %v4158_v41 }
0x1118   : > { %3297 = vmatpush.msra.mxu1 %v3201_v21 }
0x111a   : > { %3298 = vmatpush.msra.mxu1 %v3198_v16 }
0x111b   : > { %3391 = vperm.xlu2 %4260, %v4171_v42   ;;  %v3376_v49 = vpop.f32.mrf.mxu2 }
0x111c   : > { %v3377_v56 = vadd.f32 %v4285_v51, %v3376_v49  ;;  %3439 = vmatpush.msrb.mxu1 %v4179_v9  ;;  %v4190_v9 = vld [vmem:[%s5446_s7 + $0x18] sm:$0xff] }
0x111d   : > { %3582 = vmatpush.msrb.mxu2 %v4190_v9 }
0x111e   : > { %3440 = vmatpush.msrb.mxu1 %v4178_v10 }
0x1120   : > { %3441 = vmatpush.msrb.mxu1 %v4177_v12 }
0x1122   : > { %3442 = vmatpush.msrb.mxu1 %v4176_v13 }
0x1123   : > { %v3379_v58 = vpop.f32.mrf.mxu2 }
0x1124   : > { %v3380_v0 = vadd.f32 %v4285_v51, %v3379_v58 }
0x112b   : > { %v3382_v5 = vpop.f32.mrf.mxu2 }
0x112c   : > { %v3383_v6 = vadd.f32 %v4285_v51, %v3382_v5 }
0x1169   : > { %v3090_v45 = vpop.f32.mrf.mxu1 }
0x116a   : > { %v5261_v44 = vadd.f32 %v3090_v45, %v2852_v43 }
0x1171   : > { %v3093_v37 = vpop.f32.mrf.mxu1 }
0x1172   : > { %v5264_v47 = vadd.f32 %v3093_v37, %v5203_v33 }
0x1176   : > { %v3243_v48 = vpop.xlane.xlu2 %3242 }
0x1177   : > { %v3250_v32 = vsub.f32 %v3233_v25, %v3243_v48 }
0x1179   : > { %v3253_v50 = vmul.f32 1.442695, %v3250_v32  ;;  %v5291_v21 = vpop.f32.mrf.mxu1 }
0x117b   : > { %4392 = vpow2.f32 %v3253_v50 }
0x117e   : > { %v3246_v20 = vpop.xlane.xlu1 %3245  ;;  %v3392_v53 = vpop.permute.xlu2 %3391 }
0x117f   : > { %v3251_v54 = vsub.f32 %v3236_v34, %v3246_v20  ;;  %v3415_v55 = vadd.f32 %v3414_v52, %v3392_v53 }
0x1181   : > { %v4393_v28 = vpop.eup %4392  ;;  %v3255_v57 = vmul.f32 1.442695, %v3251_v54  ;;  %3477 = vmatpush.msra.mxu0 %v3415_v55  ;;  %v4286_v55 = vld [vmem:[%s5444_s1 + $0x3] ss:$0 sm:$0xff]  ;;  %s5451_s1 = sld [smem:[#allocation21_spill]] }
0x1182   : > { %4184 = vmatmul.msk.f32.vlgmr.msra.gmra.mxu0 %vm1432_vm12, %v3377_v56  ;;  %v3259_v33 = vsel %vm1468_vm14, %v4393_v28, 0.0 }
0x1183   : > { %4394 = vpow2.f32 %v3255_v57  ;;  %3260 = vadd.xlane.f32.xlu0 %v3259_v33 }
0x1186   : > { %v3249_v62 = vpop.xlane.xlu0 %3248 }
0x1187   : > { %v3252_v63 = vsub.f32 %v3239_v19, %v3249_v62  ;;  %v3761_v9 = vld [vmem:[%s5451_s1 + $0x60] sm:$0xff] }
0x1189   : > { %v4395_v1 = vpop.eup %4394  ;;  %v3257_v2 = vmul.f32 1.442695, %v3252_v63 }
0x118a   : > { %4185 = vmatmul.msk.f32.gmra.mxu0 %vm1432_vm12, %v3380_v0  ;;  %v3262_v3 = vsel %vm1468_vm14, %v4395_v1, 0.0 }
0x118b   : > { %4396 = vpow2.f32 %v3257_v2  ;;  %3263 = vadd.xlane.f32.xlu2 %v3262_v3 }
0x1191   : > { %v4397_v7 = vpop.eup %4396 }
0x1192   : > { %4186 = vmatmul.msk.f32.gmra.mxu0 %vm1432_vm12, %v3383_v6  ;;  %v3265_v8 = vsel %vm1468_vm14, %v4397_v7, 0.0 }
0x1193   : > { %3266 = vadd.xlane.f32.xlu0 %v3265_v8 }
0x11f6   : > { %v3261_v15 = vpop.xlane.xlu0 %3260 }
0x11f7   : > { %4398 = vrcp.f32 %v3261_v15 }
0x11fd   : > { %v4399_v17 = vpop.eup %4398 }
0x11fe   : > { %v3271_v18 = vmul.f32 %v4399_v17, %v4393_v28  ;;  %v3264_v24 = vpop.xlane.xlu2 %3263 }
0x11ff   : > { %4400 = vrcp.f32 %v3264_v24  ;;  %v3479_v25 = vpop.f32.mrf.mxu0 }
0x1200   : > { %v3480_v30 = vadd.f32 %v3479_v25, %v4827_v4  ;;  %4155 = vmatmul.msk.f32.vlgmr.msra.gmra.mxu1 %vm1468_vm14, %v3271_v18 }
0x1202   : > { %v3488_v31 = vsel %vm1468_vm14, %v3480_v30, -inf }
0x1203   : > { %3489 = vmax.xlane.f32.xlu0 %v3488_v31 }
0x1205   : > { %v4401_v59 = vpop.eup %4400 }
0x1206   : > { %v3267_v34 = vpop.xlane.xlu0 %3266  ;;  %v3272_v60 = vmul.f32 %v4401_v59, %v4395_v1 }
0x1207   : > { %4402 = vrcp.f32 %v3267_v34  ;;  %v3482_v22 = vpop.f32.mrf.mxu0 }
0x1208   : > { %4156 = vmatmul.msk.f32.gmra.mxu1 %vm1468_vm14, %v3272_v60 }
0x120d   : > { %v4403_v35 = vpop.eup %4402 }
0x120e   : > { %v3273_v19 = vmul.f32 %v4403_v35, %v4397_v7 }
0x120f   : > { %v3485_v39 = vpop.f32.mrf.mxu0 }
0x1210   : > { %v3486_v26 = vadd.f32 %v3485_v39, %v4827_v4  ;;  %4157 = vmatmul.msk.f32.gmra.mxu1 %vm1468_vm14, %v3273_v19 }
0x1212   : > { %v3494_v40 = vsel %vm1468_vm14, %v3486_v26, -inf }
0x1213   : > { %3495 = vmax.xlane.f32.xlu1 %v3494_v40  ;;  %v2854_v40 = vadd.f32 %v5199_v29, %v5246_v14  ;;  %v3680_v29 = vld [vmem:[%s5448_s18 + $0x8] sm:$0xff] }
0x1218   : > { %4181 = vmatmul.msk.f32.vlgmr.msrb.gmra.mxu1 %vm1235_vm1, %v5096_v61 }
0x1220   : > { %4182 = vmatmul.msk.f32.gmra.mxu1 %vm1235_vm1, %v5103_v36  ;;  %v3483_v36 = vadd.f32 %v3482_v22, %v4827_v4 }
0x1222   : > { %v3491_v50 = vsel %vm1468_vm14, %v3483_v36, -inf }
0x1228   : > { %4183 = vmatmul.msk.f32.gmra.mxu1 %vm1235_vm1, %v5110_v46 }
0x1276   : > { %v3490_v16 = vpop.xlane.xlu0 %3489 }
0x1277   : > { %v3497_v42 = vsub.f32 %v3480_v30, %v3490_v16  ;;  %v3101_v16 = vadd.f32 %v5291_v21, %v2854_v40 }
0x1279   : > { %v3500_v43 = vmul.f32 1.442695, %v3497_v42 }
0x127b   : > { %4404 = vpow2.f32 %v3500_v43 }
0x127d   : > { %v3300_v45 = vpop.f32.mrf.mxu1 }
0x127e   : > { %4159 = vmatmul.msk.f32.vlgmr.msra.gmra.mxu3 %vm1432_vm12, %v3300_v45 }
0x1281   : > { %v4405_v37 = vpop.eup %4404 }
0x1282   : > { %v3506_v61 = vsel %vm1468_vm14, %v4405_v37, 0.0 }
0x1283   : > { %3507 = vadd.xlane.f32.xlu0 %v3506_v61 }
0x1285   : > { %v3303_v48 = vpop.f32.mrf.mxu1 }
0x1286   : > { %v3496_v46 = vpop.xlane.xlu1 %3495  ;;  %4160 = vmatmul.msk.f32.gmra.mxu3 %vm1432_vm12, %v3303_v48 }
0x1287   : > { %v3499_v32 = vsub.f32 %v3486_v26, %v3496_v46  ;;  %v3681_v46 = vld [vmem:[%s5448_s18 + $0x10] sm:$0xff] }
0x1289   : > { %v3504_v49 = vmul.f32 1.442695, %v3499_v32 }
0x128b   : > { %4406 = vpow2.f32 %v3504_v49  ;;  %3492 = vmax.xlane.f32.xlu0 %v3491_v50 }
0x128d   : > { %v3306_v51 = vpop.f32.mrf.mxu1 }
0x128e   : > { %4161 = vmatmul.msk.f32.gmra.mxu3 %vm1432_vm12, %v3306_v51 }
0x1291   : > { %v4407_v52 = vpop.eup %4406 }
0x1292   : > { %v3512_v20 = vsel %vm1468_vm14, %v4407_v52, 0.0 }
0x1293   : > { %3513 = vadd.xlane.f32.xlu1 %v3512_v20 }
0x1295   : > { %v3444_v53 = vpop.f32.mrf.mxu1 }
0x1296   : > { %v3445_v57 = vadd.f32 %v4286_v55, %v3444_v53 }
0x129d   : > { %v3447_v54 = vpop.f32.mrf.mxu1 }
0x129e   : > { %v3448_v28 = vadd.f32 %v4286_v55, %v3447_v54 }
0x12a5   : > { %v3450_v4 = vpop.f32.mrf.mxu1 }
0x12a6   : > { %v3451_v56 = vadd.f32 %v4286_v55, %v3450_v4 }
0x12a8   : > { %3543 = vmatpush.msrb.mxu3 %v3451_v56 }
0x12aa   : > { %3544 = vmatpush.msrb.mxu3 %v3448_v28  ;;  %v5338_v28 = vld [vmem:[%s5449_s0] ss:$0 sm:$0xff]  ;;  %s5452_s0 = sld [smem:[#allocation20_spill]] }
0x12ac   : > { %3545 = vmatpush.msrb.mxu3 %v3445_v57 }
0x12f6   : > { %v3508_v33 = vpop.xlane.xlu0 %3507 }
0x12f7   : > { %4408 = vrcp.f32 %v3508_v33 }
0x12fd   : > { %v4409_v58 = vpop.eup %4408 }
0x12fe   : > { %v3518_v62 = vmul.f32 %v4409_v58, %v4405_v37  ;;  %v3493_v63 = vpop.xlane.xlu0 %3492 }
0x12ff   : > { %v3498_v0 = vsub.f32 %v3483_v36, %v3493_v63  ;;  %v3682_v36 = vld [vmem:[%s5448_s18 + $0x18] sm:$0xff] }
0x1300   : > { %4187 = vmatmul.msk.f32.vlgmr.msrb.gmra.mxu3 %vm1468_vm14, %v3518_v62  ;;  %3708 = vmatpush.msra.mxu1 %v3682_v36  ;;  %v5342_v62 = vld [vmem:[%s5450_s10] ss:$0 sm:$0xff]  ;;  %s5453_s10 = sld [smem:[#allocation22_spill]] }
0x1301   : > { %v3502_v1 = vmul.f32 1.442695, %v3498_v0  ;;  %v3337_v2 = vpop.f32.mrf.mxu3 }
0x1302   : > { %v3346_v3 = vadd.f32 %v3337_v2, %v5261_v44  ;;  %3709 = vmatpush.msra.mxu1 %v3681_v46 }
0x1303   : > { %4410 = vpow2.f32 %v3502_v1 }
0x1304   : > { %3710 = vmatpush.msra.mxu1 %v3680_v29 }
0x1306   : > { %v3514_v13 = vpop.xlane.xlu1 %3513 }
0x1309   : > { %v4411_v5 = vpop.eup %4410  ;;  %v3340_v6 = vpop.f32.mrf.mxu3 }
0x130a   : > { %v3347_v7 = vadd.f32 %v3340_v6, %v5264_v47  ;;  %v3509_v8 = vsel %vm1468_vm14, %v4411_v5, 0.0  ;;  %v3764_v6 = vld [vmem:[%s5451_s1 + $0x78] sm:$0xff] }
0x130b   : > { %3510 = vadd.xlane.f32.xlu0 %v3509_v8  ;;  %3765 = vmatpush.msrb.mxu0 %v3764_v6  ;;  %v3762_v8 = vld [vmem:[%s5451_s1 + $0x68] sm:$0xff] }
0x1311   : > { %v3343_v10 = vpop.f32.mrf.mxu3 }
0x1312   : > { %v3348_v43 = vadd.f32 %v3343_v10, %v3101_v16  ;;  %v3760_v10 = vld [vmem:[%s5451_s1 + $0x58] sm:$0xff] }
0x137e   : > { %v3511_v12 = vpop.xlane.xlu0 %3510 }
0x137f   : > { %4412 = vrcp.f32 %v3511_v12  ;;  %v3759_v12 = vld [vmem:[%s5451_s1 + $0x50] sm:$0xff] }
0x1380   : > { %4414 = vrcp.f32 %v3514_v13  ;;  %v3758_v13 = vld [vmem:[%s5451_s1 + $0x48] sm:$0xff] }
0x1383   : > { %v3547_v15 = vpop.f32.mrf.mxu3 }
0x1384   : > { %4191 = vmatmul.msk.f32.vlgmr.msrb.gmra.mxu2 %vm1432_vm12, %v3547_v15  ;;  %v3757_v15 = vld [vmem:[%s5451_s1 + $0x40] sm:$0xff] }
0x1385   : > { %v4413_v17 = vpop.eup %4412 }
0x1386   : > { %v3519_v44 = vmul.f32 %v4413_v17, %v4411_v5  ;;  %v4415_v18 = vpop.eup %4414  ;;  %v3756_v17 = vld [vmem:[%s5451_s1 + $0x38] sm:$0xff] }
0x1387   : > { %v3520_v24 = vmul.f32 %v4415_v18, %v4407_v52  ;;  %v3754_v18 = vld [vmem:[%s5451_s1 + $0x28] sm:$0xff] }
0x1388   : > { %4188 = vmatmul.msk.f32.gmra.mxu3 %vm1468_vm14, %v3519_v44  ;;  %v3755_v44 = vld [vmem:[%s5451_s1 + $0x30] sm:$0xff] }
0x1390   : > { %4189 = vmatmul.msk.f32.gmra.mxu3 %vm1468_vm14, %v3520_v24  ;;  %v3753_v24 = vld [vmem:[%s5451_s1 + $0x20] sm:$0xff] }
0x1407   : > { %v3584_v47 = vpop.f32.mrf.mxu2 }
0x1408   : > { %v3593_v25 = vadd.f32 %v3584_v47, %v3346_v3 }
0x140a   : > { %v5310_v30 = vadd.f32 %v3593_v25, %v5041_v11 }
0x140b   : > { %v3550_v31 = vpop.f32.mrf.mxu3 }
0x140c   : > { %4192 = vmatmul.msk.f32.gmra.mxu2 %vm1432_vm12, %v3550_v31  ;;  %v3601_v59 = vsel %vm1235_vm1, %v5310_v30, 0.0  ;;  %v3752_v31 = vld [vmem:[%s5451_s1 + $0x18] sm:$0xff] }
0x140d   : > { %3602 = vadd.xlane.f32.xlu2 %v3601_v59 }
0x1413   : > { %v3553_v34 = vpop.f32.mrf.mxu3 }
0x1414   : > { %4193 = vmatmul.msk.f32.gmra.mxu2 %vm1432_vm12, %v3553_v34  ;;  %v3751_v34 = vld [vmem:[%s5451_s1 + $0x10] sm:$0xff] }
0x1480   : > { %v3603_v60 = vpop.xlane.xlu2 %3602 }
0x1481   : > { %v3610_v22 = vmul.f32 %v3603_v60, %v4718_v27  ;;  %v3750_v60 = vld [vmem:[%s5451_s1 + $0x8] sm:$0xff] }
0x1483   : > { %v3613_v35 = vsub.f32 %v5310_v30, %v3610_v22  ;;  %v3749_v22 = vld [vmem:[%s5451_s1] sm:$0xff] }
0x1485   : > { %v3616_v19 = vmul.f32 %v3613_v35, %v3613_v35 }
0x1487   : > { %v3619_v11 = vsel %vm1235_vm1, %v3616_v19, 0.0 }
0x1488   : > { %3620 = vadd.xlane.f32.xlu0 %v3619_v11 }
0x148f   : > { %v3587_v39 = vpop.f32.mrf.mxu2 }
0x1490   : > { %v3594_v26 = vadd.f32 %v3587_v39, %v3347_v7  ;;  %v3763_v7 = vld [vmem:[%s5451_s1 + $0x70] sm:$0xff] }
0x1491   : > { %3766 = vmatpush.msrb.mxu0 %v3763_v7 }
0x1492   : > { %v3597_v41 = vadd.f32 %v3594_v26, %v5046_v38  ;;  %v3679_v38 = vld [vmem:[%s5448_s18] sm:$0xff] }
0x1493   : > { %3711 = vmatpush.msra.mxu1 %v3679_v38  ;;  %3767 = vmatpush.msrb.mxu0 %v3762_v8 }
0x1494   : > { %v3604_v42 = vsel %vm1235_vm1, %v3597_v41, 0.0 }
0x1495   : > { %3605 = vadd.xlane.f32.xlu1 %v3604_v42  ;;  %3768 = vmatpush.msrb.mxu0 %v3761_v9  ;;  %v4290_v9 = vld [vmem:[%s5453_s10] ss:$0 sm:$0xff]  ;;  %s3957_s10 = sshll.u32 %s5456_s23, 3 }
0x1496   : > { %s1180_s1 = scalar_lea.vmem %s4683_s6, %s3957_s10 }
0x1497   : > { %v3590_v45 = vpop.f32.mrf.mxu2  ;;  %3769 = vmatpush.msrb.mxu0 %v3760_v10 }
0x1498   : > { %v3595_v37 = vadd.f32 %v3590_v45, %v3348_v43 }
0x1499   : > { %3770 = vmatpush.msrb.mxu0 %v3759_v12 }
0x149a   : > { %v3598_v61 = vadd.f32 %v3595_v37, %v5051_v23 }
0x149b   : > { %3771 = vmatpush.msrb.mxu0 %v3758_v13 }
0x149c   : > { %v3607_v48 = vsel %vm1235_vm1, %v3598_v61, 0.0 }
0x149d   : > { %3608 = vadd.xlane.f32.xlu2 %v3607_v48  ;;  %3772 = vmatpush.msrb.mxu0 %v3757_v15 }
0x149f   : > { %3773 = vmatpush.msrb.mxu0 %v3756_v17 }
0x14a1   : > { %3774 = vmatpush.msrb.mxu0 %v3755_v44 }
0x14a3   : > { %3775 = vmatpush.msrb.mxu0 %v3754_v18 }
0x14a5   : > { %3776 = vmatpush.msrb.mxu0 %v3753_v24 }
0x14a7   : > { %3777 = vmatpush.msrb.mxu0 %v3752_v31 }
0x14a9   : > { %3778 = vmatpush.msrb.mxu0 %v3751_v34 }
0x14ab   : > { %3779 = vmatpush.msrb.mxu0 %v3750_v60 }
0x14ad   : > { %3780 = vmatpush.msrb.mxu0 %v3749_v22 }
0x14fb   : > { %v3621_v14 = vpop.xlane.xlu0 %3620 }
0x14fc   : > { %v3628_v21 = vmul.f32 %v3621_v14, %v4718_v27 }
0x14fe   : > { %v3631_v32 = vadd.f32 1e-05, %v3628_v21 }
0x1500   : > { %4416 = vrsqrt.f32 %v3631_v32  ;;  %vm3640_vm14 = vweird.f32 %v3631_v32 }
0x1506   : > { %v4417_v49 = vpop.eup %4416 }
0x1507   : > { %v3635_v50 = vmul.f32 %v4417_v49, %v3631_v32  ;;  %vm3641_vm12 = vweird.f32 %v4417_v49 }
0x1508   : > { %v3606_v23 = vpop.xlane.xlu1 %3605  ;;  %vm3642_vm5 = vmor %vm3640_vm14, %vm3641_vm12 }
0x1509   : > { %v3636_v51 = vmul.f32 %v4417_v49, %v3635_v50  ;;  %v3611_v52 = vmul.f32 %v3606_v23, %v4718_v27 }
0x150b   : > { %v3637_v20 = vmul.f32 0.5, %v3636_v51  ;;  %v5332_v53 = vsub.f32 %v3597_v41, %v3611_v52  ;;  %v4289_v41 = vld [vmem:[%s5452_s0] ss:$0 sm:$0xff]  ;;  %s5454_s0 = sld [smem:[#allocation23_spill]] }
0x150d   : > { %v3638_v54 = vsub.f32 1.5, %v3637_v20  ;;  %v3617_v55 = vmul.f32 %v5332_v53, %v5332_v53 }
0x150f   : > { %v3639_v4 = vmul.f32 %v4417_v49, %v3638_v54  ;;  %v3622_v56 = vsel %vm1235_vm1, %v3617_v55, 0.0 }
0x1510   : > { %3623 = vadd.xlane.f32.xlu0 %v3622_v56  ;;  %v3609_v57 = vpop.xlane.xlu2 %3608 }
0x1511   : > { %v3643_v33 = vsel %vm3642_vm5, %v4417_v49, %v3639_v4  ;;  %v3612_v58 = vmul.f32 %v3609_v57, %v4718_v27 }
0x1512   : > { %v3664_v63 = vmul.f32 %v3643_v33, %v3613_v35 }
0x1513   : > { %v5344_v0 = vsub.f32 %v3598_v61, %v3612_v58 }
0x1514   : > { %v3670_v1 = vmul.f32 %v5338_v28, %v3664_v63 }
0x1515   : > { %v3618_v2 = vmul.f32 %v5344_v0, %v5344_v0 }
0x1516   : > { %v3676_v3 = vadd.f32 %v5342_v62, %v3670_v1 }
0x1517   : > { %v3625_v5 = vsel %vm1235_vm1, %v3618_v2, 0.0 }
0x1518   : > { %4194 = vmatmul.msk.f32.vlgmr.msra.gmra.mxu1 %vm1235_vm1, %v3676_v3  ;;  %3626 = vadd.xlane.f32.xlu1 %v3625_v5 }
0x1583   : > { %v3624_v47 = vpop.xlane.xlu0 %3623 }
0x1584   : > { %v3629_v25 = vmul.f32 %v3624_v47, %v4718_v27 }
0x1586   : > { %v3632_v59 = vadd.f32 1e-05, %v3629_v25 }
0x1588   : > { %4418 = vrsqrt.f32 %v3632_v59  ;;  %vm3650_vm7 = vweird.f32 %v3632_v59 }
0x158b   : > { %v3627_v35 = vpop.xlane.xlu1 %3626 }
0x158c   : > { %v3630_v19 = vmul.f32 %v3627_v35, %v4718_v27 }
0x158e   : > { %v4419_v11 = vpop.eup %4418  ;;  %v3633_v39 = vadd.f32 1e-05, %v3630_v19 }
0x158f   : > { %v3645_v26 = vmul.f32 %v4419_v11, %v3632_v59  ;;  %vm3651_vm6 = vweird.f32 %v4419_v11 }
0x1590   : > { %4420 = vrsqrt.f32 %v3633_v39  ;;  %vm3652_vm8 = vmor %vm3650_vm7, %vm3651_vm6  ;;  %vm3660_vm10 = vweird.f32 %v3633_v39 }
0x1591   : > { %v3646_v40 = vmul.f32 %v4419_v11, %v3645_v26 }
0x1593   : > { %v3647_v16 = vmul.f32 0.5, %v3646_v40 }
0x1595   : > { %v3648_v42 = vsub.f32 1.5, %v3647_v16  ;;  %v3713_v43 = vpop.f32.mrf.mxu1  ;;  %v3829_v16 = vld [vmem:[%s4673_s4 + $0x10] sm:$0xff] }
0x1596   : > { %v4421_v45 = vpop.eup %4420  ;;  %v3714_v37 = vadd.f32 %v4289_v41, %v3713_v43  ;;  %v3827_v43 = vld [vmem:[%s4673_s4] sm:$0xff] }
0x1597   : > { %v3649_v61 = vmul.f32 %v4419_v11, %v3648_v42  ;;  %v3655_v48 = vmul.f32 %v4421_v45, %v3633_v39  ;;  %vm3661_vm9 = vweird.f32 %v4421_v45  ;;  %v3828_v42 = vld [vmem:[%s4673_s4 + $0x8] sm:$0xff] }
0x1598   : > { %v3725_v36 = vmul.f32 0.044715, %v3714_v37  ;;  %vm3662_vm11 = vmor %vm3660_vm10, %vm3661_vm9  ;;  %v3722_v57 = vmul.f32 0.5, %v3714_v37 }
0x1599   : > { %v3653_v46 = vsel %vm3652_vm8, %v4419_v11, %v3649_v61  ;;  %v3656_v29 = vmul.f32 %v4421_v45, %v3655_v48 }
0x159a   : > { %v3665_v38 = vmul.f32 %v3653_v46, %v5332_v53  ;;  %v3728_v14 = vmul.f32 %v3725_v36, %v3714_v37 }
0x159b   : > { %v3657_v21 = vmul.f32 0.5, %v3656_v29 }
0x159c   : > { %v3731_v32 = vmul.f32 %v3728_v14, %v3714_v37  ;;  %v3671_v49 = vmul.f32 %v5338_v28, %v3665_v38 }
0x159d   : > { %v3658_v50 = vsub.f32 1.5, %v3657_v21  ;;  %v4291_v21 = vld [vmem:[%s5454_s0] ss:$0 sm:$0xff] }
0x159e   : > { %v3734_v23 = vadd.f32 %v3731_v32, %v3714_v37  ;;  %v3677_v51 = vadd.f32 %v5342_v62, %v3671_v49  ;;  %v4292_v49 = vld [vmem:[%s4668_s27] ss:$0 sm:$0xff] }
0x159f   : > { %v3659_v52 = vmul.f32 %v4421_v45, %v3658_v50 }
0x15a0   : > { %v3737_v20 = vmul.f32 0.7978846, %v3734_v23  ;;  %4195 = vmatmul.msk.f32.gmra.mxu1 %vm1235_vm1, %v3677_v51  ;;  %v4293_v51 = vld [vmem:[%s4678_s12] ss:$0 sm:$0xff] }
0x15a1   : > { %v3663_v54 = vsel %vm3662_vm11, %v4421_v45, %v3659_v52 }
0x15a2   : > { %v3666_v55 = vmul.f32 %v3663_v54, %v5344_v0  ;;  %4422 = vtanh.f32 %v3737_v20 }
0x15a4   : > { %v3672_v53 = vmul.f32 %v5338_v28, %v3666_v55 }
0x15a6   : > { %v3678_v4 = vadd.f32 %v5342_v62, %v3672_v53 }
0x15a8   : > { %v4423_v56 = vpop.eup %4422  ;;  %4196 = vmatmul.msk.f32.gmra.mxu1 %vm1235_vm1, %v3678_v4 }
0x15a9   : > { %v3743_v33 = vadd.f32 1.0, %v4423_v56 }
0x15ab   : > { %v3746_v58 = vmul.f32 %v3743_v33, %v3722_v57 }
0x15ad   : > { %3781 = vmatmul.f32.vlgmr.msrb.gmra.mxu0 %v3746_v58 }
0x161d   : > { %v3716_v63 = vpop.f32.mrf.mxu1 }
0x161e   : > { %v3717_v1 = vadd.f32 %v4289_v41, %v3716_v63 }
0x1620   : > { %v3726_v2 = vmul.f32 0.044715, %v3717_v1  ;;  %v3723_v47 = vmul.f32 0.5, %v3717_v1 }
0x1622   : > { %v3729_v3 = vmul.f32 %v3726_v2, %v3717_v1 }
0x1624   : > { %v3732_v5 = vmul.f32 %v3729_v3, %v3717_v1 }
0x1625   : > { %v3719_v6 = vpop.f32.mrf.mxu1 }
0x1626   : > { %v3720_v0 = vadd.f32 %v4289_v41, %v3719_v6  ;;  %v3735_v7 = vadd.f32 %v3732_v5, %v3717_v1  ;;  %v3830_v41 = vld [vmem:[%s4673_s4 + $0x18] sm:$0xff] }
0x1627   : > { %3850 = vmatpush.msra.mxu3 %v3830_v41 }
0x1628   : > { %v3727_v8 = vmul.f32 0.044715, %v3720_v0  ;;  %v3738_v28 = vmul.f32 0.7978846, %v3735_v7  ;;  %v3724_v34 = vmul.f32 0.5, %v3720_v0 }
0x1629   : > { %3851 = vmatpush.msra.mxu3 %v3829_v16 }
0x162a   : > { %v3782_v62 = vpop.f32.mrf.mxu0  ;;  %4424 = vtanh.f32 %v3738_v28  ;;  %v3730_v10 = vmul.f32 %v3727_v8, %v3720_v0 }
0x162b   : > { %v3789_v12 = vadd.f32 %v3782_v62, %v5310_v30  ;;  %3852 = vmatpush.msra.mxu3 %v3828_v42 }
0x162c   : > { %v3733_v13 = vmul.f32 %v3730_v10, %v3720_v0 }
0x162d   : > { %v3794_v15 = vadd.f32 %v4290_v9, %v3789_v12  ;;  %3853 = vmatpush.msra.mxu3 %v3827_v43 }
0x162e   : > { %v3736_v17 = vadd.f32 %v3733_v13, %v3720_v0 }
0x162f   : > { %v3797_v44 = vsel %vm1235_vm1, %v3794_v15, 0.0 }
0x1630   : > { %v4425_v18 = vpop.eup %4424  ;;  %3798 = vadd.xlane.f32.xlu2 %v3797_v44  ;;  %v3739_v24 = vmul.f32 0.7978846, %v3736_v17 }
0x1631   : > { %v3744_v25 = vadd.f32 1.0, %v4425_v18 }
0x1632   : > { %4426 = vtanh.f32 %v3739_v24 }
0x1633   : > { %v3747_v31 = vmul.f32 %v3744_v25, %v3723_v47 }
0x1635   : > { %3784 = vmatmul.f32.gmra.mxu0 %v3747_v31 }
0x1638   : > { %v4427_v59 = vpop.eup %4426 }
0x1639   : > { %v3745_v60 = vadd.f32 1.0, %v4427_v59 }
0x163b   : > { %v3748_v30 = vmul.f32 %v3745_v60, %v3724_v34 }
0x163d   : > { %3786 = vmatmul.f32.gmra.mxu0 %v3748_v30 }
0x16a3   : > { %v3799_v22 = vpop.xlane.xlu2 %3798 }
0x16a4   : > { %v3800_v35 = vmul.f32 %v3799_v22, %v4718_v27 }
0x16a6   : > { %v3801_v19 = vsub.f32 %v3794_v15, %v3800_v35 }
0x16a8   : > { %v3802_v11 = vmul.f32 %v3801_v19, %v3801_v19 }
0x16aa   : > { %v3803_v39 = vsel %vm1235_vm1, %v3802_v11, 0.0 }
0x16ab   : > { %3804 = vadd.xlane.f32.xlu0 %v3803_v39 }
0x16b2   : > { %v3785_v26 = vpop.f32.mrf.mxu0 }
0x16ba   : > { %v3787_v40 = vpop.f32.mrf.mxu0 }
0x171e   : > { %v3805_v45 = vpop.xlane.xlu0 %3804 }
0x171f   : > { %v3806_v37 = vmul.f32 %v3805_v45, %v4718_v27 }
0x1721   : > { %v3807_v61 = vadd.f32 1e-05, %v3806_v37 }
0x1723   : > { %4428 = vrsqrt.f32 %v3807_v61  ;;  %vm3814_vm15 = vweird.f32 %v3807_v61 }
0x1729   : > { %v4429_v48 = vpop.eup %4428 }
0x172a   : > { %v3809_v36 = vmul.f32 %v4429_v48, %v3807_v61  ;;  %vm3815_vm13 = vweird.f32 %v4429_v48 }
0x172b   : > { %vm3816_vm0 = vmor %vm3814_vm15, %vm3815_vm13 }
0x172c   : > { %v3810_v46 = vmul.f32 %v4429_v48, %v3809_v36 }
0x172e   : > { %v3811_v29 = vmul.f32 0.5, %v3810_v46 }
0x1730   : > { %v3812_v38 = vsub.f32 1.5, %v3811_v29 }
0x1732   : > { %v3813_v14 = vmul.f32 %v4429_v48, %v3812_v38 }
0x1734   : > { %v3817_v32 = vsel %vm3816_vm0, %v4429_v48, %v3813_v14 }
0x1735   : > { %v3818_v50 = vmul.f32 %v3817_v32, %v3801_v19 }
0x1737   : > { %v3822_v23 = vmul.f32 %v4291_v21, %v3818_v50 }
0x1739   : > { %v3826_v27 = vadd.f32 %v4292_v49, %v3822_v23 }
0x173b   : > { %4197 = vmatmul.msk.f32.vlgmr.msra.gmra.mxu3 %vm1235_vm1, %v3826_v27 }
0x17be   : > { %v3855_v52 = vpop.f32.mrf.mxu3 }
0x17bf   : > { %v3856_v20 = vadd.f32 %v4293_v51, %v3855_v52 }
0x17c1   : > { %3858 = vst [vmem:[%s1180_s1] sm:$0xff] %v3856_v20 }
0x17c2 PF: > { %s89_s22 = sadd.s32 1, %s4436_s22  }
0x17c3   : > { %p86_p4 = scmp.ge.s32.totalorder %s89_s22, 4  }
0x17c5   :  { %88 = sbr.rel (!%p86_p4) target bundleno = 68 (0x44), region = 287 }

</bundles_post_ra>
